<compile_context>
chip_gen: v5e
topology: v5e:2x2
jax: 0.10.0
libtpu: 0.0.40
codegen_flags: <defaults>
</compile_context>

<pallas_src>
import jax
import jax.numpy as jnp
from jax.experimental import pallas as pl
from jax.experimental.pallas import tpu as pltpu

NEG_SLOPE = 0.2
BN_EPS = 1e-5


def _leaky_relu(x, slope=NEG_SLOPE):
    return jnp.where(x > 0, x, slope * x)


# ----------------------------------------------------------------------------
# Fused PointNet kernel.
#   x_ref : (B*N, C_in) f32   (batch flattened into the point axis)
#   w1/t1 : (C_in, 64) f32 folded weight, (1, 64) f32 folded shift
#   w2/t2 : (64, 128) bf16,   (1, 128) f32
#   w3/t3 : (128, 1024) bf16, (1, 1024) f32
#   out   : (B, 1024) f32
# ----------------------------------------------------------------------------
def pointnet_kernel(x_ref, w1_ref, t1_ref, w2_ref, t2_ref, w3_ref, t3_ref,
                    out_ref):
    M, C_in = x_ref.shape
    B = out_ref.shape[0]
    N = M // B

    x = x_ref[...].astype(jnp.float32)                       # (M, C_in)

    # ---- layer 1: K = C_in = 3 contraction as VPU broadcast-FMAs (no MXU) ----
    acc = x[:, 0:1] * w1_ref[0:1, :]                          # (M, 64)
    for c in range(1, C_in):                                  # static, C_in is tiny
        acc = acc + x[:, c:c + 1] * w1_ref[c:c + 1, :]
    h = _leaky_relu(acc + t1_ref[...])                        # conv1 + bn1 + lrelu

    # ---- layer 2: (M,64)@(64,128), bf16 operands, f32 accumulation ----
    h = jnp.dot(h.astype(jnp.bfloat16), w2_ref[...],
                preferred_element_type=jnp.float32)
    h = _leaky_relu(h + t2_ref[...])                          # conv2 + bn2 + lrelu

    # ---- layer 3: (M,128)@(128,1024) + bn3 shift (no activation) ----
    h = jnp.dot(h.astype(jnp.bfloat16), w3_ref[...],
                preferred_element_type=jnp.float32)
    h = h + t3_ref[...]                                       # (M, 1024) f32

    # ---- global max over the N points of each batch element ----
    for b in range(B):                                        # B is tiny; reduce only
        out_ref[b, :] = jnp.max(h[b * N:(b + 1) * N, :], axis=0)


# ----------------------------------------------------------------------------
# Wrapper: one pallas_call, full arrays pinned to VMEM (no grid).
# ----------------------------------------------------------------------------
def _vmem_spec():
    return pl.BlockSpec(memory_space=pltpu.MemorySpace.VMEM)


def pointnet_forward(x, params):
    """x: (B, N, C_in) f32; params: (w1, t1, w2, t2, w3, t3) folded."""
    B, N, C_in = x.shape
    x_flat = x.reshape(B * N, C_in)
    return pl.pallas_call(
        pointnet_kernel,
        out_shape=jax.ShapeDtypeStruct((B, 1024), jnp.float32),
        in_specs=[_vmem_spec() for _ in range(1 + len(params))],
        out_specs=_vmem_spec(),
    )(x_flat, *params)


# ----------------------------------------------------------------------------
# Deterministic synthetic parameters (raw PyTorch-style) + host-side folding.
# ----------------------------------------------------------------------------
def _init_layer(key, c_in, c_out):
    ks = jax.random.split(key, 6)
    w = 0.05 * jax.random.normal(ks[0], (c_in, c_out), jnp.float32)   # conv W^T
    b = 0.05 * jax.random.normal(ks[1], (1, c_out), jnp.float32)      # conv bias
    gamma = 1.0 + 0.1 * jax.random.normal(ks[2], (1, c_out), jnp.float32)
    beta = 0.1 * jax.random.normal(ks[3], (1, c_out), jnp.float32)
    mean = 0.1 * jax.random.normal(ks[4], (1, c_out), jnp.float32)
    var = jnp.abs(jax.random.normal(ks[5], (1, c_out), jnp.float32)) + 0.5
    return (w, b, gamma, beta, mean, var)


def init_pointnet_raw(key, input_dims=3):
    k1, k2, k3 = jax.random.split(key, 3)
    return [_init_layer(k1, input_dims, 64),
            _init_layer(k2, 64, 128),
            _init_layer(k3, 128, 1024)]


def fold_params(raw):
    """Fold conv bias + eval-mode BN into (weight, shift); bf16 for MXU layers."""
    out = []
    for i, (w, b, gamma, beta, mean, var) in enumerate(raw):
        scale = gamma / jnp.sqrt(var + BN_EPS)                # (1, C_out)
        w_fold = w * scale                                    # (C_in, C_out)
        t_fold = (b * scale + beta - mean * scale).astype(jnp.float32)
        w_dtype = jnp.float32 if i == 0 else jnp.bfloat16     # layer 1 stays on VPU/f32
        out += [w_fold.astype(w_dtype), t_fold]
    return tuple(out)


# ----------------------------------------------------------------------------
# Pure-JAX reference (f32, unfolded params) for a correctness check.
# ----------------------------------------------------------------------------
def pointnet_reference(x, raw):
    h = x.astype(jnp.float32)                                 # (B, N, C_in)
    for i, (w, b, gamma, beta, mean, var) in enumerate(raw):
        h = jnp.einsum('bnc,cd->bnd', h, w) + b               # 1x1 conv == matmul
        scale = gamma / jnp.sqrt(var + BN_EPS)
        h = h * scale + (beta - mean * scale)                 # eval-mode BN
        if i < 2:
            h = jnp.where(h > 0, h, NEG_SLOPE * h)            # leaky_relu(0.2)
    return jnp.max(h, axis=1)                                 # (B, 1024)


if __name__ == "__main__":
    key = jax.random.PRNGKey(0)
    k_x, k_p = jax.random.split(key)

    B, N, C_IN = 2, 128, 3
    x = jax.random.normal(k_x, (B, N, C_IN), jnp.float32)     # (batch, points, xyz)

    raw = init_pointnet_raw(k_p, input_dims=C_IN)
    params = fold_params(raw)

    feat = jax.jit(pointnet_forward)(x, params)
    jax.block_until_ready(feat)

    ref = pointnet_reference(x, raw)
    assert feat.shape == (B, 1024)
    assert bool(jnp.all(jnp.isfinite(feat)))
    assert bool(jnp.allclose(feat, ref, rtol=5e-2, atol=5e-2)), \
        float(jnp.max(jnp.abs(feat - ref)))
    print("KERNEL_OK")
</pallas_src>

<mosaic_0001>
module attributes {stable_mosaic.version = 11 : i64} {
  func.func @pointnet_kernel(%arg0: memref<256x3xf32, #tpu.memory_space<vmem>>, %arg1: memref<3x64xf32, #tpu.memory_space<vmem>>, %arg2: memref<1x64xf32, #tpu.memory_space<vmem>>, %arg3: memref<64x128xbf16, #tpu.memory_space<vmem>>, %arg4: memref<1x128xf32, #tpu.memory_space<vmem>>, %arg5: memref<128x1024xbf16, #tpu.memory_space<vmem>>, %arg6: memref<1x1024xf32, #tpu.memory_space<vmem>>, %arg7: memref<2x1024xf32, #tpu.memory_space<vmem>>) attributes {dimension_semantics = [], scalar_prefetch = 0 : i64, scratch_operands = 0 : i64, tpu.core_type = #tpu.core_type<tc>} {
    %c0 = arith.constant 0 : index
    %c0_0 = arith.constant 0 : index
    %0 = vector.load %arg0[%c0, %c0_0] : memref<256x3xf32, #tpu.memory_space<vmem>>, vector<256x3xf32>
    %1 = vector.extract_strided_slice %0 {offsets = [0, 0], sizes = [256, 1], strides = [1, 1]} : vector<256x3xf32> to vector<256x1xf32>
    %c0_1 = arith.constant 0 : index
    %c0_2 = arith.constant 0 : index
    %2 = vector.load %arg1[%c0_1, %c0_2] : memref<3x64xf32, #tpu.memory_space<vmem>>, vector<1x64xf32>
    %3 = vector.broadcast %1 : vector<256x1xf32> to vector<256x64xf32>
    %4 = vector.broadcast %2 : vector<1x64xf32> to vector<256x64xf32>
    %5 = arith.mulf %3, %4 : vector<256x64xf32>
    %6 = vector.extract_strided_slice %0 {offsets = [0, 1], sizes = [256, 1], strides = [1, 1]} : vector<256x3xf32> to vector<256x1xf32>
    %c1 = arith.constant 1 : index
    %c0_3 = arith.constant 0 : index
    %7 = vector.load %arg1[%c1, %c0_3] : memref<3x64xf32, #tpu.memory_space<vmem>>, vector<1x64xf32>
    %8 = vector.broadcast %6 : vector<256x1xf32> to vector<256x64xf32>
    %9 = vector.broadcast %7 : vector<1x64xf32> to vector<256x64xf32>
    %10 = arith.mulf %8, %9 : vector<256x64xf32>
    %11 = arith.addf %5, %10 : vector<256x64xf32>
    %12 = vector.extract_strided_slice %0 {offsets = [0, 2], sizes = [256, 1], strides = [1, 1]} : vector<256x3xf32> to vector<256x1xf32>
    %c2 = arith.constant 2 : index
    %c0_4 = arith.constant 0 : index
    %13 = vector.load %arg1[%c2, %c0_4] : memref<3x64xf32, #tpu.memory_space<vmem>>, vector<1x64xf32>
    %14 = vector.broadcast %12 : vector<256x1xf32> to vector<256x64xf32>
    %15 = vector.broadcast %13 : vector<1x64xf32> to vector<256x64xf32>
    %16 = arith.mulf %14, %15 : vector<256x64xf32>
    %17 = arith.addf %11, %16 : vector<256x64xf32>
    %c0_5 = arith.constant 0 : index
    %c0_6 = arith.constant 0 : index
    %18 = vector.load %arg2[%c0_5, %c0_6] : memref<1x64xf32, #tpu.memory_space<vmem>>, vector<1x64xf32>
    %19 = vector.broadcast %18 : vector<1x64xf32> to vector<256x64xf32>
    %20 = arith.addf %17, %19 : vector<256x64xf32>
    %cst = arith.constant 0.000000e+00 : f32
    %21 = vector.broadcast %cst : f32 to vector<256x64xf32>
    %22 = arith.cmpf ogt, %20, %21 : vector<256x64xf32>
    %cst_7 = arith.constant 2.000000e-01 : f32
    %23 = vector.broadcast %cst_7 : f32 to vector<256x64xf32>
    %24 = arith.mulf %23, %20 : vector<256x64xf32>
    %25 = arith.select %22, %20, %24 : vector<256x64xi1>, vector<256x64xf32>
    %26 = arith.truncf %25 : vector<256x64xf32> to vector<256x64xbf16>
    %c0_8 = arith.constant 0 : index
    %c0_9 = arith.constant 0 : index
    %27 = vector.load %arg3[%c0_8, %c0_9] : memref<64x128xbf16, #tpu.memory_space<vmem>>, vector<64x128xbf16>
    %cst_10 = arith.constant dense<0.000000e+00> : vector<256x128xf32>
    %28 = tpu.matmul %26, %27, %cst_10 {dimension_numbers = #tpu.dot_dimension_numbers<[1], [0], [0], [1], [0, 0, 1, 1], [], []>} : vector<256x64xbf16>, vector<64x128xbf16>, vector<256x128xf32> -> vector<256x128xf32>
    %c0_11 = arith.constant 0 : index
    %c0_12 = arith.constant 0 : index
    %29 = vector.load %arg4[%c0_11, %c0_12] : memref<1x128xf32, #tpu.memory_space<vmem>>, vector<1x128xf32>
    %30 = vector.broadcast %29 : vector<1x128xf32> to vector<256x128xf32>
    %31 = arith.addf %28, %30 : vector<256x128xf32>
    %cst_13 = arith.constant 0.000000e+00 : f32
    %32 = vector.broadcast %cst_13 : f32 to vector<256x128xf32>
    %33 = arith.cmpf ogt, %31, %32 : vector<256x128xf32>
    %cst_14 = arith.constant 2.000000e-01 : f32
    %34 = vector.broadcast %cst_14 : f32 to vector<256x128xf32>
    %35 = arith.mulf %34, %31 : vector<256x128xf32>
    %36 = arith.select %33, %31, %35 : vector<256x128xi1>, vector<256x128xf32>
    %37 = arith.truncf %36 : vector<256x128xf32> to vector<256x128xbf16>
    %c0_15 = arith.constant 0 : index
    %c0_16 = arith.constant 0 : index
    %38 = vector.load %arg5[%c0_15, %c0_16] : memref<128x1024xbf16, #tpu.memory_space<vmem>>, vector<128x1024xbf16>
    %cst_17 = arith.constant dense<0.000000e+00> : vector<256x1024xf32>
    %39 = tpu.matmul %37, %38, %cst_17 {dimension_numbers = #tpu.dot_dimension_numbers<[1], [0], [0], [1], [0, 0, 1, 1], [], []>} : vector<256x128xbf16>, vector<128x1024xbf16>, vector<256x1024xf32> -> vector<256x1024xf32>
    %c0_18 = arith.constant 0 : index
    %c0_19 = arith.constant 0 : index
    %40 = vector.load %arg6[%c0_18, %c0_19] : memref<1x1024xf32, #tpu.memory_space<vmem>>, vector<1x1024xf32>
    %41 = vector.broadcast %40 : vector<1x1024xf32> to vector<256x1024xf32>
    %42 = arith.addf %39, %41 : vector<256x1024xf32>
    %43 = vector.extract_strided_slice %42 {offsets = [0, 0], sizes = [128, 1024], strides = [1, 1]} : vector<256x1024xf32> to vector<128x1024xf32>
    %cst_20 = arith.constant dense<0xFF800000> : vector<1024xf32>
    %44 = vector.multi_reduction <maximumf>, %43, %cst_20 [0] : vector<128x1024xf32> to vector<1024xf32>
    %c0_21 = arith.constant 0 : index
    %c0_22 = arith.constant 0 : index
    %45 = vector.load %arg7[%c0_21, %c0_22] : memref<2x1024xf32, #tpu.memory_space<vmem>>, vector<1x1024xf32>
    %46 = vector.shape_cast %45 : vector<1x1024xf32> to vector<1024xf32>
    %47 = vector.shape_cast %44 : vector<1024xf32> to vector<1x1024xf32>
    tpu.vector_store %arg7[%c0_21, %c0_22], %47 {strides = array<i32>} : memref<2x1024xf32, #tpu.memory_space<vmem>>, vector<1x1024xf32>,
    %48 = vector.extract_strided_slice %42 {offsets = [128, 0], sizes = [128, 1024], strides = [1, 1]} : vector<256x1024xf32> to vector<128x1024xf32>
    %cst_23 = arith.constant dense<0xFF800000> : vector<1024xf32>
    %49 = vector.multi_reduction <maximumf>, %48, %cst_23 [0] : vector<128x1024xf32> to vector<1024xf32>
    %c1_24 = arith.constant 1 : index
    %c0_25 = arith.constant 0 : index
    %50 = vector.load %arg7[%c1_24, %c0_25] : memref<2x1024xf32, #tpu.memory_space<vmem>>, vector<1x1024xf32>
    %51 = vector.shape_cast %50 : vector<1x1024xf32> to vector<1024xf32>
    %52 = vector.shape_cast %49 : vector<1024xf32> to vector<1x1024xf32>
    tpu.vector_store %arg7[%c1_24, %c0_25], %52 {strides = array<i32>} : memref<2x1024xf32, #tpu.memory_space<vmem>>, vector<1x1024xf32>,
    return
  }
}

</mosaic_0001>

<bundles_post_ra>
// kernel: pointnet_forward.1
= control target key start
LH: loop header
LB: loop body
LE: loop exit
PB: predicated region body
PF: predicated region fallthrough
CT: control target
= control target key end

     0   :  { %12 = vsyncpa [#allocation3], 0  ;;  %s4355_s0 = inlined_call_operand.vmem [shape: f32[256,3], index: 0, kind: input, shape index: {}]   ;;  %s4356_s1 = inlined_call_operand.vmem [shape: f32[3,64], index: 1, kind: input, shape index: {}]   ;;  %s4357_s2 = inlined_call_operand.vmem [shape: f32[1,64], index: 2, kind: input, shape index: {}]   ;;  %s4358_s3 = inlined_call_operand.vmem [shape: bf16[64,128], index: 3, kind: input, shape index: {}]   ;;  %s4359_s4 = inlined_call_operand.vmem [shape: f32[1,128], index: 4, kind: input, shape index: {}]   ;;  %s4360_s5 = inlined_call_operand.hbm [shape: bf16[128,1024], index: 5, kind: input, shape index: {}]   ;;  %s4361_s6 = inlined_call_operand.vmem [shape: f32[1,1024], index: 6, kind: input, shape index: {}]   ;;  %s4362_s7 = inlined_call_operand.hbm [shape: f32[2,1024], index: 7, kind: output, shape index: {}]  }
   0x1   :  { %13 = vsyncpa [#allocation4], 0  ;;  %s28_s26 = sshll.u32 %s4360_s5, 4  ;;  %s3131_s27 = smov [#allocation2]   ;;  %s29_s26 = int_to_ptr.hbm [resolvable:$true] %s28_s26 }
   0x2   :  { %s30_s28 = sshll.u32 %s3131_s27, 4  ;;  %s3132_s29 = smov 512   ;;  %s31_s28 = int_to_ptr.vmem [resolvable:$true] %s30_s28 }
   0x3   :  { %s3133_s30 = smov 32  }
   0x4   :  { %36 = dma.hbm_to_vmem [thread:$0]  %s29_s26, 8192, %s31_s28, [#allocation3], %s3132_s29, %s3132_s29, %s3133_s30  }
   0x5   :  { %3127 = dma.done.wait [#allocation3], 8192  }
   0x6   :  { %3128 = vsyncadd [#allocation3], 4294959104  ;;  %v3134_v0 = vmov 2   ;;  %v3135_v1 = vmov 1   ;;  %v3136_v2 = vmov 0   ;;  %v44_v3 = vld [vmem:[%s4355_s0] sm:$0xff] }
   0x7   :  { %3000 = vset.pattern.permute.xlu2 %v3134_v0  ;;  %2999 = vset.pattern.permute.xlu1 %v3135_v1  ;;  %v45_v4 = vld [vmem:[%s4355_s0 + $0x8] sm:$0xff]  ;;  %v46_v5 = vld [vmem:[%s4355_s0 + $0x10] sm:$0xff]  ;;  %v47_v6 = vld [vmem:[%s4355_s0 + $0x18] sm:$0xff]  ;;  %vm842_vm2 = vcmask 523264   ;;  %s2605_s27 = sshll.u32 %s4362_s7, 4  ;;  %s2606_s27 = int_to_ptr.hbm [resolvable:$true] %s2605_s27 }
   0x8   :  { %2998 = vset.pattern.permute.xlu0 %v3136_v2  ;;  %466 = vperm.xlu2 %3000, %v44_v3   ;;  %v53_v7 = vld [vmem:[%s4355_s0 + $0x48] sm:$0xff]  ;;  %v3206_v8 = vld [vmem:[%s4355_s0 + $0x50] sm:$0xff]  ;;  %v48_v10 = vld [vmem:[%s4355_s0 + $0x20] sm:$0xff] }
   0x9   :  { %272 = vperm.xlu1 %2999, %v44_v3   ;;  %79 = vperm.xlu0 %2998, %v44_v3   ;;  %v49_v9 = vld [vmem:[%s4355_s0 + $0x28] sm:$0xff]  ;;  %v51_v11 = vld [vmem:[%s4355_s0 + $0x38] sm:$0xff]  ;;  %v50_v12 = vld [vmem:[%s4355_s0 + $0x30] sm:$0xff] }
   0xa   :  { %v55_v13 = vld [vmem:[%s4355_s0 + $0x58] sm:$0xff]  ;;  %v3236_v14 = vld [vmem:[%s4355_s0 + $0xc0] sm:$0xff]  ;;  %v3247_v16 = vld [vmem:[%s4355_s0 + $0xd0] sm:$0xff] }
   0xb   :  { %v52_v15 = vld [vmem:[%s4355_s0 + $0x40] sm:$0xff]  ;;  %v2906_v18 = vld [vmem:[%s4358_s3 + $0x18] sm:$0xff]  ;;  %v2905_v20 = vld [vmem:[%s4358_s3 + $0x10] sm:$0xff] }
   0xc   :  { %v3254_v17 = vld [vmem:[%s4355_s0 + $0xe0] sm:$0xff]  ;;  %895 = vmatpush.bf16.msra.mxu0 %v2906_v18  ;;  %2971 = vmatpush.bf16.msra.mxu1 %v2906_v18  ;;  %v2904_v21 = vld [vmem:[%s4358_s3 + $0x8] sm:$0xff]  ;;  %v3319_v42 = vld [vmem:[%s4355_s0 + $0xd8] sm:$0xff] }
   0xd   :  { %2973 = vmatpush.bf16.msra.mxu3 %v2906_v18  ;;  %2972 = vmatpush.bf16.msra.mxu2 %v2906_v18  ;;  %v2903_v23 = vld [vmem:[%s4358_s3] sm:$0xff]  ;;  %v69_v24 = vld [vmem:[%s4355_s0 + $0xc8] sm:$0xff]  ;;  %v3337_v55 = vld [vmem:[%s4355_s0 + $0x70] sm:$0xff] }
   0xe   :  { %v3287_v26 = vld [vmem:[%s4356_s1 + $0x1] ss:$0 sm:$0xff]  ;;  %v3292_v27 = vld [vmem:[%s4356_s1] ss:$0 sm:$0xff]  ;;  %v3297_v28 = vld [vmem:[%s4356_s1 + $0x2] ss:$0 sm:$0xff] }
   0xf   :  { %v56_v30 = vld [vmem:[%s4355_s0 + $0x60] sm:$0xff]  ;;  %v57_v52 = vld [vmem:[%s4355_s0 + $0x68] sm:$0xff] }
  0x10   :  { %470 = vperm.xlu2 %3000, %v45_v4   ;;  %896 = vmatpush.bf16.msra.mxu0 %v2905_v20  ;;  %v3313_v37 = vld [vmem:[%s4357_s2] ss:$0 sm:$0xff]  ;;  %v3350_v62 = vld [vmem:[%s4355_s0 + $0xe8] sm:$0xff] }
  0x11   :  { %276 = vperm.xlu1 %2999, %v45_v4   ;;  %84 = vperm.xlu0 %2998, %v45_v4  }
  0x12   :  { %2974 = vmatpush.bf16.msra.mxu1 %v2905_v20  ;;  %2976 = vmatpush.bf16.msra.mxu3 %v2905_v20 }
  0x13   :  { %2975 = vmatpush.bf16.msra.mxu2 %v2905_v20 }
  0x14   :  { %897 = vmatpush.bf16.msra.mxu0 %v2904_v21 }
  0x16   :  { %2977 = vmatpush.bf16.msra.mxu1 %v2904_v21  ;;  %2979 = vmatpush.bf16.msra.mxu3 %v2904_v21 }
  0x17   :  { %2978 = vmatpush.bf16.msra.mxu2 %v2904_v21 }
  0x18   :  { %3002 = vset.pattern.permute.xlu2 %v3135_v1  ;;  %898 = vmatpush.bf16.msra.mxu0 %v2903_v23 }
  0x19   :  { %3001 = vset.pattern.permute.xlu1 %v3136_v2  ;;  %89 = vperm.xlu0 %2998, %v46_v5  }
  0x1a   :  { %280 = vperm.xlu2 %3002, %v46_v5   ;;  %94 = vperm.xlu1 %3001, %v47_v6  }
  0x1b   :  { %2980 = vmatpush.bf16.msra.mxu1 %v2903_v23  ;;  %2982 = vmatpush.bf16.msra.mxu3 %v2903_v23 }
  0x1c   :  { %2981 = vmatpush.bf16.msra.mxu2 %v2903_v23  ;;  %v65_v23 = vld [vmem:[%s4355_s0 + $0xa8] sm:$0xff] }
  0x21   :  { %124 = vperm.xlu0 %2998, %v53_v7  }
  0x22   :  { %3004 = vset.pattern.permute.xlu2 %v3134_v0  ;;  %3003 = vset.pattern.permute.xlu1 %v3134_v0 }
  0x23   :  { %478 = vperm.xlu2 %3004, %v47_v6   ;;  %474 = vperm.xlu1 %3003, %v46_v5  }
  0x29   :  { %129 = vperm.xlu0 %2998, %v3206_v8  }
  0x2b   :  { %3006 = vset.pattern.permute.xlu2 %v3136_v2  ;;  %3005 = vset.pattern.permute.xlu1 %v3136_v2 }
  0x2c   :  { %104 = vperm.xlu2 %3006, %v49_v9   ;;  %99 = vperm.xlu1 %3005, %v48_v10  }
  0x31   :  { %3019 = vset.pattern.permute.xlu0 %v3135_v1 }
  0x32   :  { %284 = vperm.xlu0 %3019, %v47_v6   ;;  %v64_v6 = vld [vmem:[%s4355_s0 + $0xa0] sm:$0xff] }
  0x34   :  { %3008 = vset.pattern.permute.xlu2 %v3134_v0  ;;  %3007 = vset.pattern.permute.xlu1 %v3135_v1 }
  0x35   :  { %482 = vperm.xlu2 %3008, %v48_v10   ;;  %292 = vperm.xlu1 %3007, %v49_v9  }
  0x3a   :  { %288 = vperm.xlu0 %3019, %v48_v10  }
  0x3d   :  { %3010 = vset.pattern.permute.xlu2 %v3136_v2  ;;  %3009 = vset.pattern.permute.xlu1 %v3136_v2 }
  0x3e   :  { %114 = vperm.xlu2 %3010, %v51_v11   ;;  %109 = vperm.xlu1 %3009, %v50_v12  }
  0x42   :  { %316 = vperm.xlu0 %3019, %v55_v13  }
  0x46   :  { %3012 = vset.pattern.permute.xlu2 %v3135_v1  ;;  %3011 = vset.pattern.permute.xlu1 %v3135_v1 }
  0x47   :  { %300 = vperm.xlu2 %3012, %v51_v11   ;;  %296 = vperm.xlu1 %3011, %v50_v12  }
  0x4a   :  { %368 = vperm.xlu0 %3019, %v3236_v14  }
  0x4f   :  { %3014 = vset.pattern.permute.xlu2 %v3136_v2  ;;  %3013 = vset.pattern.permute.xlu1 %v3134_v0 }
  0x50   :  { %119 = vperm.xlu2 %3014, %v52_v15   ;;  %494 = vperm.xlu1 %3013, %v51_v11  }
  0x52   :  { %376 = vperm.xlu0 %3019, %v3247_v16  }
  0x58   :  { %3016 = vset.pattern.permute.xlu2 %v3135_v1  ;;  %3015 = vset.pattern.permute.xlu1 %v3135_v1 }
  0x59   :  { %308 = vperm.xlu2 %3016, %v53_v7   ;;  %304 = vperm.xlu1 %3015, %v52_v15  }
  0x5a   :  { %384 = vperm.xlu0 %3019, %v3254_v17  }
  0x61   :  { %3018 = vset.pattern.permute.xlu2 %v3134_v0  ;;  %3017 = vset.pattern.permute.xlu1 %v3134_v0 }
  0x62   :  { %502 = vperm.xlu2 %3018, %v53_v7   ;;  %498 = vperm.xlu1 %3017, %v52_v15   ;;  %v467_v19 = vpop.permute.xlu2 %466 }
  0x63   :  { %3048 = vset.pattern.permute.xlu0 %v3134_v0  ;;  %v594_v35 = vmul.f32 %v3297_v28, %v467_v19 }
  0x64   :  { %486 = vperm.xlu0 %3048, %v49_v9  }
  0x6a   :  { %3021 = vset.pattern.permute.xlu2 %v3135_v1  ;;  %3020 = vset.pattern.permute.xlu1 %v3136_v2  ;;  %v471_v22 = vpop.permute.xlu2 %470 }
  0x6b   :  { %312 = vperm.xlu2 %3021, %v3206_v8   ;;  %134 = vperm.xlu1 %3020, %v55_v13   ;;  %v595_v46 = vmul.f32 %v3297_v28, %v471_v22 }
  0x6c   :  { %490 = vperm.xlu0 %3048, %v50_v12  }
  0x73   :  { %3023 = vset.pattern.permute.xlu2 %v3134_v0  ;;  %3022 = vset.pattern.permute.xlu1 %v3134_v0 }
  0x74   :  { %510 = vperm.xlu2 %3023, %v55_v13   ;;  %v3281_v25 = vpop.permute.xlu2 %280  ;;  %506 = vperm.xlu1 %3022, %v3206_v8   ;;  %v3368_v8 = vld [vmem:[%s4355_s0 + $0x80] sm:$0xff] }
  0x75   :  { %566 = vperm.xlu0 %3048, %v69_v24   ;;  %v402_v4 = vmul.f32 %v3287_v26, %v3281_v25 }
  0x7b   :  { %v273_v29 = vpop.permute.xlu1 %272  ;;  %v80_v32 = vpop.permute.xlu0 %79 }
  0x7c   :  { %v400_v31 = vmul.f32 %v3287_v26, %v273_v29  ;;  %3025 = vset.pattern.permute.xlu2 %v3136_v2  ;;  %v238_v33 = vmul.f32 %v3292_v27, %v80_v32  ;;  %3024 = vset.pattern.permute.xlu1 %v3136_v2 }
  0x7d   :  { %204 = vperm.xlu2 %3025, %v69_v24   ;;  %v3306_v34 = vpop.permute.xlu2 %478  ;;  %199 = vperm.xlu1 %3024, %v3236_v14  }
  0x7e   :  { %514 = vperm.xlu0 %3048, %v56_v30   ;;  %v432_v36 = vadd.f32 %v400_v31, %v238_v33  ;;  %v597_v18 = vmul.f32 %v3297_v28, %v3306_v34 }
  0x80   :  { %v626_v38 = vadd.f32 %v594_v35, %v432_v36 }
  0x82   :  { %v662_v45 = vadd.f32 %v3313_v37, %v626_v38 }
  0x83   :  { %v277_v39 = vpop.permute.xlu1 %276  ;;  %v85_v41 = vpop.permute.xlu0 %84 }
  0x84   :  { %v401_v40 = vmul.f32 %v3287_v26, %v277_v39  ;;  %v239_v43 = vmul.f32 %v3292_v27, %v85_v41  ;;  %v726_v50 = vmul.f32 0.2, %v662_v45  ;;  %vm694_vm0 = vcmp.gt.f32.partialorder %v662_v45, 0.0 }
  0x85   :  { %3027 = vset.pattern.permute.xlu2 %v3134_v0  ;;  %3026 = vset.pattern.permute.xlu1 %v3135_v1 }
  0x86   :  { %562 = vperm.xlu2 %3027, %v3236_v14   ;;  %v3325_v44 = vpop.permute.xlu2 %104  ;;  %v433_v47 = vadd.f32 %v401_v40, %v239_v43  ;;  %372 = vperm.xlu1 %3026, %v69_v24   ;;  %v758_v56 = vsel %vm694_vm0, %v662_v45, %v726_v50 }
  0x87   :  { %574 = vperm.xlu0 %3048, %v3319_v42  }
  0x88   :  { %v627_v48 = vadd.f32 %v595_v46, %v433_v47  ;;  %v59_v47 = vld [vmem:[%s4355_s0 + $0x78] sm:$0xff] }
  0x8a   :  { %v663_v49 = vadd.f32 %v3313_v37, %v627_v48 }
  0x8b   :  { %v90_v51 = vpop.permute.xlu0 %89 }
  0x8c   :  { %v95_v53 = vpop.permute.xlu1 %94  ;;  %vm695_vm1 = vcmp.gt.f32.partialorder %v663_v49, 0.0  ;;  %v727_v54 = vmul.f32 0.2, %v663_v49  ;;  %v240_v5 = vmul.f32 %v3292_v27, %v90_v51 }
  0x8d   :  { %v241_v14 = vmul.f32 %v3292_v27, %v95_v53 }
  0x8e   :  { %3029 = vset.pattern.permute.xlu2 %v3136_v2  ;;  %3028 = vset.pattern.permute.xlu1 %v3136_v2  ;;  %v759_v57 = vsel %vm695_vm1, %v663_v49, %v727_v54  ;;  %v434_v11 = vadd.f32 %v402_v4, %v240_v5 }
  0x8f   :  { %144 = vperm.xlu2 %3029, %v57_v52   ;;  %v3341_v58 = vpop.permute.xlu2 %482  ;;  %139 = vperm.xlu1 %3028, %v56_v30   ;;  %v790_v59 = vpack.c.bf16 %v759_v57, %v758_v56  ;;  %v243_v57 = vmul.f32 %v3292_v27, %v3325_v44 }
  0x90   :  { %522 = vperm.xlu0 %3048, %v3337_v55   ;;  %v598_v53 = vmul.f32 %v3297_v28, %v3341_v58 }
  0x91   :  { %2631 = vmatmul.msk.bf16.vlgmr.msra.gmra.mxu0 %vm842_vm2, %v790_v59 }
  0x93   :  { %v3345_v60 = vpop.permute.xlu0 %124 }
  0x95   :  { %v475_v61 = vpop.permute.xlu1 %474 }
  0x96   :  { %v596_v9 = vmul.f32 %v3297_v28, %v475_v61 }
  0x97   :  { %3031 = vset.pattern.permute.xlu2 %v3135_v1  ;;  %3030 = vset.pattern.permute.xlu1 %v3135_v1 }
  0x98   :  { %324 = vperm.xlu2 %3031, %v57_v52   ;;  %v3354_v63 = vpop.permute.xlu2 %114  ;;  %320 = vperm.xlu1 %3030, %v56_v30   ;;  %v628_v12 = vadd.f32 %v596_v9, %v434_v11 }
  0x99   :  { %582 = vperm.xlu0 %3048, %v3350_v62  }
  0x9a   :  { %v664_v19 = vadd.f32 %v3313_v37, %v628_v12  ;;  %v3445_v12 = vld [vmem:[%s4355_s0 + $0xb0] sm:$0xff] }
  0x9b   :  { %v3357_v3 = vpop.permute.xlu0 %129 }
  0x9c   :  { %v728_v25 = vmul.f32 0.2, %v664_v19  ;;  %vm696_vm3 = vcmp.gt.f32.partialorder %v664_v19, 0.0 }
  0x9e   :  { %v100_v7 = vpop.permute.xlu1 %99  ;;  %v760_v32 = vsel %vm696_vm3, %v664_v19, %v728_v25  ;;  %v2964_v19 = vld [vmem:[#allocation2 + $0x1cc] sm:$0xf] }
  0x9f   :  { %v242_v48 = vmul.f32 %v3292_v27, %v100_v7  ;;  %v2883_v25 = vld [vmem:[#allocation2 + $0x1e8] sm:$0xf0] }
  0xa0   :  { %3033 = vset.pattern.permute.xlu2 %v3136_v2  ;;  %3032 = vset.pattern.permute.xlu1 %v3134_v0 }
  0xa1   :  { %179 = vperm.xlu2 %3033, %v64_v6   ;;  %v3373_v10 = vpop.permute.xlu2 %300  ;;  %518 = vperm.xlu1 %3032, %v57_v52   ;;  %v3423_v52 = vld [vmem:[%s4355_s0 + $0xb8] sm:$0xff] }
  0xa2   :  { %530 = vperm.xlu0 %3048, %v3368_v8  }
  0xa4   :  { %v285_v13 = vpop.permute.xlu0 %284 }
  0xa5   :  { %v403_v15 = vmul.f32 %v3287_v26, %v285_v13  ;;  %v245_v13 = vmul.f32 %v3292_v27, %v3354_v63 }
  0xa7   :  { %v435_v20 = vadd.f32 %v403_v15, %v241_v14  ;;  %v293_v21 = vpop.permute.xlu1 %292 }
  0xa8   :  { %v405_v56 = vmul.f32 %v3287_v26, %v293_v21 }
  0xa9   :  { %214 = vperm.xlu2 %3033, %v3319_v42   ;;  %v629_v22 = vadd.f32 %v597_v18, %v435_v20  ;;  %3034 = vset.pattern.permute.xlu1 %v3136_v2 }
  0xaa   :  { %3055 = vset.pattern.permute.xlu0 %v3136_v2  ;;  %v3387_v24 = vpop.permute.xlu2 %119  ;;  %209 = vperm.xlu1 %3034, %v3247_v16   ;;  %v437_v5 = vadd.f32 %v405_v56, %v243_v57  ;;  %v2948_v56 = vld [vmem:[#allocation2 + $0x14c] sm:$0xf] }
  0xab   :  { %184 = vperm.xlu0 %3055, %v65_v23   ;;  %v665_v29 = vadd.f32 %v3313_v37, %v629_v22  ;;  %v2819_v57 = vld [vmem:[#allocation2 + $0x168] sm:$0xf0] }
  0xac   :  { %v289_v30 = vpop.permute.xlu0 %288 }
  0xad   :  { %vm697_vm4 = vcmp.gt.f32.partialorder %v665_v29, 0.0  ;;  %v729_v31 = vmul.f32 0.2, %v665_v29 }
  0xaf   :  { %v761_v33 = vsel %vm697_vm4, %v665_v29, %v729_v31  ;;  %v2886_v31 = vor.u32 %v2964_v19, %v2883_v25 }
  0xb0   :  { %v110_v34 = vpop.permute.xlu1 %109  ;;  %v791_v35 = vpack.c.bf16 %v761_v33, %v760_v32 }
  0xb1   :  { %3036 = vset.pattern.permute.xlu2 %v3135_v1  ;;  %v244_v14 = vmul.f32 %v3292_v27, %v110_v34  ;;  %1761 = vmatpush.bf16.msrb.mxu0 %v2886_v31 }
  0xb2   :  { %356 = vperm.xlu2 %3036, %v65_v23   ;;  %3035 = vset.pattern.permute.xlu1 %v3135_v1 }
  0xb3   :  { %2632 = vmatmul.msk.bf16.gmra.mxu0 %vm842_vm2, %v791_v35  ;;  %v3394_v36 = vpop.permute.xlu2 %308  ;;  %352 = vperm.xlu1 %3035, %v64_v6  }
  0xb4   :  { %v317_v38 = vpop.permute.xlu0 %316  ;;  %194 = vperm.xlu0 %3055, %v3423_v52  }
  0xb5   :  { %v411_v15 = vmul.f32 %v3287_v26, %v317_v38 }
  0xb9   :  { %v297_v39 = vpop.permute.xlu1 %296 }
  0xba   :  { %3037 = vset.pattern.permute.xlu2 %v3134_v0  ;;  %v406_v9 = vmul.f32 %v3287_v26, %v297_v39 }
  0xbb   :  { %546 = vperm.xlu2 %3037, %v64_v6   ;;  %380 = vperm.xlu1 %3035, %v3319_v42   ;;  %v404_v42 = vmul.f32 %v3287_v26, %v289_v30 }
  0xbc   :  { %v3398_v40 = vpop.permute.xlu2 %502  ;;  %v3400_v41 = vpop.permute.xlu0 %368  ;;  %v438_v20 = vadd.f32 %v406_v9, %v244_v14  ;;  %v2940_v14 = vld [vmem:[#allocation2 + $0x10c] sm:$0xf] }
  0xbd   :  { %v436_v50 = vadd.f32 %v404_v42, %v242_v48  ;;  %v2851_v42 = vld [vmem:[#allocation2 + $0x1a8] sm:$0xf0]  ;;  %v424_v25 = vmul.f32 %v3287_v26, %v3400_v41 }
  0xbf   :  { %v630_v54 = vadd.f32 %v598_v53, %v436_v50  ;;  %v248_v53 = vmul.f32 %v3292_v27, %v3357_v3 }
  0xc1   :  { %v666_v61 = vadd.f32 %v3313_v37, %v630_v54 }
  0xc2   :  { %v495_v43 = vpop.permute.xlu1 %494 }
  0xc3   :  { %570 = vperm.xlu2 %3037, %v3247_v16   ;;  %3038 = vset.pattern.permute.xlu1 %v3134_v0  ;;  %v730_v11 = vmul.f32 0.2, %v666_v61  ;;  %vm698_vm5 = vcmp.gt.f32.partialorder %v666_v61, 0.0  ;;  %v601_v21 = vmul.f32 %v3297_v28, %v495_v43  ;;  %v2956_v43 = vld [vmem:[#allocation2 + $0x18c] sm:$0xf] }
  0xc4   :  { %550 = vperm.xlu1 %3038, %v65_v23   ;;  %v3404_v45 = vpop.permute.xlu0 %376  ;;  %v2854_v50 = vor.u32 %v2956_v43, %v2851_v42  ;;  %v2924_v43 = vld [vmem:[#allocation2 + $0x8c] sm:$0xf] }
  0xc5   :  { %v3406_v46 = vpop.permute.xlu2 %312  ;;  %v762_v63 = vsel %vm698_vm5, %v666_v61, %v730_v11  ;;  %v247_v11 = vmul.f32 %v3292_v27, %v3345_v60  ;;  %v2723_v42 = vld [vmem:[#allocation2 + $0xa8] sm:$0xf0] }
  0xc6   :  { %1762 = vmatpush.bf16.msrb.mxu0 %v2854_v50  ;;  %v2726_v50 = vor.u32 %v2924_v43, %v2723_v42 }
  0xcb   :  { %3040 = vset.pattern.permute.xlu2 %v3136_v2  ;;  %v3414_v49 = vpop.permute.xlu1 %304 }
  0xcc   :  { %154 = vperm.xlu2 %3040, %v59_v47   ;;  %3039 = vset.pattern.permute.xlu1 %v3136_v2  ;;  %v3417_v16 = vpop.permute.xlu0 %384 }
  0xcd   :  { %149 = vperm.xlu1 %3039, %v3337_v55  }
  0xce   :  { %v511_v51 = vpop.permute.xlu2 %510 }
  0xcf   :  { %v605_v32 = vmul.f32 %v3297_v28, %v511_v51  ;;  %v410_v51 = vmul.f32 %v3287_v26, %v3406_v46 }
  0xd4   :  { %3042 = vset.pattern.permute.xlu2 %v3135_v1  ;;  %v3432_v59 = vpop.permute.xlu1 %498 }
  0xd5   :  { %332 = vperm.xlu2 %3042, %v59_v47   ;;  %3041 = vset.pattern.permute.xlu1 %v3135_v1  ;;  %v602_v60 = vmul.f32 %v3297_v28, %v3432_v59  ;;  %v2755_v59 = vld [vmem:[#allocation2 + $0xe8] sm:$0xf0] }
  0xd6   :  { %v487_v4 = vpop.permute.xlu0 %486  ;;  %328 = vperm.xlu1 %3041, %v3337_v55   ;;  %v407_v55 = vmul.f32 %v3287_v26, %v3373_v10 }
  0xd7   :  { %v599_v6 = vmul.f32 %v3297_v28, %v487_v4  ;;  %v3438_v58 = vpop.permute.xlu2 %204 }
  0xd8   :  { %v439_v35 = vadd.f32 %v407_v55, %v245_v13  ;;  %v2787_v55 = vld [vmem:[#allocation2 + $0x128] sm:$0xf0] }
  0xd9   :  { %v631_v7 = vadd.f32 %v599_v6, %v437_v5  ;;  %v2822_v5 = vor.u32 %v2948_v56, %v2819_v57  ;;  %v442_v6 = vadd.f32 %v410_v51, %v248_v53  ;;  %v2790_v19 = vor.u32 %v2940_v14, %v2787_v55  ;;  %v3508_v56 = vld [vmem:[%s4355_s0 + $0xf8] sm:$0xff]  ;;  %v2916_v57 = vld [vmem:[#allocation2 + $0x4c] sm:$0xf] }
  0xda   :  { %v633_v48 = vadd.f32 %v601_v21, %v439_v35  ;;  %234 = vperm.xlu0 %3055, %v3508_v56  }
  0xdb   :  { %v667_v44 = vadd.f32 %v3313_v37, %v631_v7  ;;  %1763 = vmatpush.bf16.msrb.mxu0 %v2822_v5 }
  0xdc   :  { %v669_v61 = vadd.f32 %v3313_v37, %v633_v48 }
  0xdd   :  { %v731_v18 = vmul.f32 0.2, %v667_v44  ;;  %3044 = vset.pattern.permute.xlu2 %v3136_v2  ;;  %vm699_vm6 = vcmp.gt.f32.partialorder %v667_v44, 0.0  ;;  %v135_v22 = vpop.permute.xlu1 %134 }
  0xde   :  { %v491_v23 = vpop.permute.xlu0 %490  ;;  %189 = vperm.xlu2 %3044, %v3445_v12   ;;  %v249_v29 = vmul.f32 %v3292_v27, %v135_v22  ;;  %3043 = vset.pattern.permute.xlu1 %v3134_v0  ;;  %vm701_vm8 = vcmp.gt.f32.partialorder %v669_v61, 0.0  ;;  %v246_v22 = vmul.f32 %v3292_v27, %v3387_v24 }
  0xdf   :  { %v600_v10 = vmul.f32 %v3297_v28, %v491_v23  ;;  %v763_v30 = vsel %vm699_vm6, %v667_v44, %v731_v18  ;;  %526 = vperm.xlu1 %3043, %v59_v47   ;;  %v409_v44 = vmul.f32 %v3287_v26, %v3394_v36  ;;  %v408_v18 = vmul.f32 %v3287_v26, %v3414_v49  ;;  %v2932_v49 = vld [vmem:[#allocation2 + $0xcc] sm:$0xf] }
  0xe0   :  { %v792_v33 = vpack.c.bf16 %v763_v30, %v762_v63  ;;  %v3460_v34 = vpop.permute.xlu2 %562  ;;  %v443_v38 = vadd.f32 %v411_v15, %v249_v29  ;;  %v733_v15 = vmul.f32 0.2, %v669_v61  ;;  %1764 = vmatpush.bf16.msrb.mxu0 %v2790_v19  ;;  %v603_v29 = vmul.f32 %v3297_v28, %v3398_v40 }
  0xe1   :  { %v632_v39 = vadd.f32 %v600_v10, %v438_v20  ;;  %v441_v23 = vadd.f32 %v409_v44, %v247_v11  ;;  %v440_v10 = vadd.f32 %v408_v18, %v246_v22  ;;  %v2758_v35 = vor.u32 %v2932_v49, %v2755_v59  ;;  %v2908_v44 = vld [vmem:[#allocation2 + $0xc] sm:$0xf] }
  0xe2   :  { %2633 = vmatmul.msk.bf16.gmra.mxu0 %vm842_vm2, %v792_v33  ;;  %v637_v47 = vadd.f32 %v605_v32, %v443_v38  ;;  %v765_v24 = vsel %vm701_vm8, %v669_v61, %v733_v15  ;;  %v618_v53 = vmul.f32 %v3297_v28, %v3460_v34  ;;  %v2691_v61 = vld [vmem:[#allocation2 + $0x68] sm:$0xf0] }
  0xe3   :  { %v668_v54 = vadd.f32 %v3313_v37, %v632_v39  ;;  %v634_v38 = vadd.f32 %v602_v60, %v440_v10  ;;  %v635_v48 = vadd.f32 %v603_v29, %v441_v23  ;;  %v2694_v5 = vor.u32 %v2916_v57, %v2691_v61 }
  0xe4   :  { %v673_v7 = vadd.f32 %v3313_v37, %v637_v47  ;;  %1765 = vmatpush.bf16.msrb.mxu0 %v2758_v35 }
  0xe5   :  { %v732_v46 = vmul.f32 0.2, %v668_v54  ;;  %vm700_vm7 = vcmp.gt.f32.partialorder %v668_v54, 0.0  ;;  %v670_v47 = vadd.f32 %v3313_v37, %v634_v38  ;;  %v3553_v38 = vld [vmem:[%s4359_s4] ss:$0 sm:$0xff] }
  0xe6   :  { %224 = vperm.xlu2 %3044, %v3350_v62   ;;  %v507_v4 = vpop.permute.xlu1 %506  ;;  %v737_v21 = vmul.f32 0.2, %v673_v7  ;;  %vm705_vm9 = vcmp.gt.f32.partialorder %v673_v7, 0.0 }
  0xe7   :  { %v604_v3 = vmul.f32 %v3297_v28, %v507_v4  ;;  %3045 = vset.pattern.permute.xlu1 %v3136_v2  ;;  %v764_v36 = vsel %vm700_vm7, %v668_v54, %v732_v46  ;;  %v567_v54 = vpop.permute.xlu0 %566  ;;  %v671_v4 = vadd.f32 %v3313_v37, %v635_v48  ;;  %vm702_vm11 = vcmp.gt.f32.partialorder %v670_v47, 0.0 }
  0xe8   :  { %219 = vperm.xlu1 %3045, %v3254_v17   ;;  %v793_v31 = vpack.c.bf16 %v765_v24, %v764_v36  ;;  %v769_v33 = vsel %vm705_vm9, %v673_v7, %v737_v21  ;;  %1766 = vmatpush.bf16.msrb.mxu0 %v2726_v50  ;;  %v619_v46 = vmul.f32 %v3297_v28, %v567_v54 }
  0xe9   :  { %v3474_v9 = vpop.permute.xlu2 %144  ;;  %v636_v13 = vadd.f32 %v604_v3, %v442_v6  ;;  %v734_v6 = vmul.f32 0.2, %v670_v47  ;;  %v263_v3 = vmul.f32 %v3292_v27, %v3438_v58  ;;  %v735_v14 = vmul.f32 0.2, %v671_v4  ;;  %v3525_v58 = vld [vmem:[%s4355_s0 + $0x90] sm:$0xff] }
  0xea   :  { %vm703_vm12 = vcmp.gt.f32.partialorder %v671_v4, 0.0  ;;  %169 = vperm.xlu0 %3055, %v3525_v58  }
  0xeb   :  { %v672_v20 = vadd.f32 %v3313_v37, %v636_v13  ;;  %v2659_v13 = vld [vmem:[#allocation2 + $0x28] sm:$0xf0]  ;;  %v766_v19 = vsel %vm702_vm11, %v670_v47, %v734_v6  ;;  %v767_v21 = vsel %vm703_vm12, %v671_v4, %v735_v14  ;;  %v74_v4 = vld [vmem:[%s4355_s0 + $0xf0] sm:$0xff]  ;;  %v3575_v6 = vld [vmem:[%s4355_s0 + $0x98] sm:$0xff] }
  0xec   :  { %1767 = vmatpush.bf16.msrb.mxu0 %v2694_v5  ;;  %v2662_v15 = vor.u32 %v2908_v44, %v2659_v13  ;;  %v794_v60 = vpack.c.bf16 %v767_v21, %v766_v19 }
  0xed   :  { %v736_v63 = vmul.f32 0.2, %v672_v20  ;;  %vm704_vm10 = vcmp.gt.f32.partialorder %v672_v20, 0.0 }
  0xee   :  { %3047 = vset.pattern.permute.xlu2 %v3135_v1 }
  0xef   :  { %364 = vperm.xlu2 %3047, %v3423_v52   ;;  %v200_v30 = vpop.permute.xlu1 %199  ;;  %v768_v32 = vsel %vm704_vm10, %v672_v20, %v736_v63 }
  0xf0   :  { %v262_v39 = vmul.f32 %v3292_v27, %v200_v30  ;;  %3046 = vset.pattern.permute.xlu1 %v3135_v1  ;;  %v795_v41 = vpack.c.bf16 %v769_v33, %v768_v32  ;;  %1768 = vmatpush.bf16.msrb.mxu0 %v2662_v15 }
  0xf1   :  { %360 = vperm.xlu1 %3046, %v3445_v12  }
  0xf2   :  { %2634 = vmatmul.msk.bf16.gmra.mxu0 %vm842_vm2, %v793_v31  ;;  %v3499_v40 = vpop.permute.xlu2 %324  ;;  %2636 = vmatmul.msk.bf16.vlgmr.msra.gmra.mxu1 %vm842_vm2, %v795_v41  ;;  %v456_v51 = vadd.f32 %v424_v25, %v262_v39  ;;  %v251_v39 = vmul.f32 %v3292_v27, %v3474_v9 }
  0xf3   :  { %3064 = vset.pattern.permute.xlu0 %v3135_v1  ;;  %v413_v41 = vmul.f32 %v3287_v26, %v3499_v40 }
  0xf4   :  { %v650_v34 = vadd.f32 %v618_v53, %v456_v51  ;;  %348 = vperm.xlu0 %3064, %v3575_v6  }
  0xf5   :  { %v445_v53 = vadd.f32 %v413_v41, %v251_v39 }
  0xf7   :  { %3049 = vset.pattern.permute.xlu2 %v3134_v0 }
  0xf8   :  { %554 = vperm.xlu2 %3049, %v3445_v12   ;;  %v373_v7 = vpop.permute.xlu1 %372  ;;  %v686_v12 = vadd.f32 %v3313_v37, %v650_v34 }
  0xf9   :  { %v425_v11 = vmul.f32 %v3287_v26, %v373_v7  ;;  %388 = vperm.xlu1 %3046, %v3350_v62   ;;  %v515_v62 = vpop.permute.xlu0 %514 }
  0xfa   :  { %v750_v36 = vmul.f32 0.2, %v686_v12  ;;  %vm718_vm13 = vcmp.gt.f32.partialorder %v686_v12, 0.0  ;;  %v606_v32 = vmul.f32 %v3297_v28, %v515_v62  ;;  %v426_v62 = vmul.f32 %v3287_v26, %v3404_v45 }
  0xfb   :  { %v3519_v55 = vpop.permute.xlu2 %179  ;;  %v457_v18 = vadd.f32 %v425_v11, %v263_v3 }
  0xfc   :  { %v782_v25 = vsel %vm718_vm13, %v686_v12, %v750_v36  ;;  %3067 = vset.pattern.permute.xlu0 %v3134_v0 }
  0xfd   :  { %v651_v20 = vadd.f32 %v619_v46, %v457_v18 }
  0xff   :  { %v687_v22 = vadd.f32 %v3313_v37, %v651_v20 }
 0x100   :  { %578 = vperm.xlu2 %3049, %v3254_v17   ;;  %v61_v17 = vld [vmem:[%s4355_s0 + $0x88] sm:$0xff] }
 0x101   :  { %3050 = vset.pattern.permute.xlu1 %v3134_v0  ;;  %v140_v23 = vpop.permute.xlu1 %139  ;;  %vm719_vm14 = vcmp.gt.f32.partialorder %v687_v22, 0.0  ;;  %v751_v63 = vmul.f32 0.2, %v687_v22  ;;  %v3541_v24 = vpop.permute.xlu0 %574 }
 0x102   :  { %2635 = vmatmul.msk.bf16.gmra.mxu0 %vm842_vm2, %v794_v60  ;;  %558 = vperm.xlu1 %3050, %v3423_v52   ;;  %v250_v59 = vmul.f32 %v3292_v27, %v140_v23 }
 0x103   :  { %v3533_v49 = vpop.permute.xlu2 %214  ;;  %v783_v29 = vsel %vm719_vm14, %v687_v22, %v751_v63 }
 0x104   :  { %v802_v10 = vpack.c.bf16 %v783_v29, %v782_v25  ;;  %v258_v25 = vmul.f32 %v3292_v27, %v3519_v55  ;;  %v265_v45 = vmul.f32 %v3292_v27, %v3533_v49 }
 0x106   :  { %2643 = vmatmul.msk.bf16.vlgmr.msra.gmra.mxu3 %vm842_vm2, %v802_v10  ;;  %v621_v10 = vmul.f32 %v3297_v28, %v3541_v24 }
 0x108   :  { %3052 = vset.pattern.permute.xlu2 %v3136_v2 }
 0x109   :  { %164 = vperm.xlu2 %3052, %v61_v17   ;;  %v3560_v42 = vpop.permute.xlu0 %522 }
 0x10a   :  { %3051 = vset.pattern.permute.xlu1 %v3136_v2  ;;  %v321_v52 = vpop.permute.xlu1 %320 }
 0x10b   :  { %v412_v30 = vmul.f32 %v3287_v26, %v321_v52  ;;  %159 = vperm.xlu1 %3051, %v3368_v8  }
 0x10c   :  { %v3547_v31 = vpop.permute.xlu2 %356 }
 0x10d   :  { %v444_v33 = vadd.f32 %v412_v30, %v250_v59  ;;  %v421_v49 = vmul.f32 %v3287_v26, %v3547_v31 }
 0x10e   :  { %v900_v35 = vpop.f32.mrf.mxu0 }
 0x10f   :  { %v638_v43 = vadd.f32 %v606_v32, %v444_v33  ;;  %v901_v48 = vadd.f32 %v3553_v38, %v900_v35 }
 0x111   :  { %3054 = vset.pattern.permute.xlu2 %v3135_v1  ;;  %v674_v51 = vadd.f32 %v3313_v37, %v638_v43  ;;  %v1012_v57 = vmul.f32 0.2, %v901_v48  ;;  %vm980_vm15 = vcmp.gt.f32.partialorder %v901_v48, 0.0  ;;  %v3581_v44 = vpop.permute.xlu0 %582 }
 0x112   :  { %340 = vperm.xlu2 %3054, %v61_v17  }
 0x113   :  { %3053 = vset.pattern.permute.xlu1 %v3135_v1  ;;  %v519_v50 = vpop.permute.xlu1 %518  ;;  %v738_v34 = vmul.f32 0.2, %v674_v51  ;;  %vm706_vm1 = vcmp.gt.f32.partialorder %v674_v51, 0.0  ;;  %v1044_v3 = vsel %vm980_vm15, %v901_v48, %v1012_v57 }
 0x114   :  { %v607_v47 = vmul.f32 %v3297_v28, %v519_v50  ;;  %336 = vperm.xlu1 %3053, %v3368_v8  }
 0x115   :  { %v547_v9 = vpop.permute.xlu2 %546  ;;  %v770_v14 = vsel %vm706_vm1, %v674_v51, %v738_v34 }
 0x116   :  { %v639_v40 = vadd.f32 %v607_v47, %v445_v53  ;;  %v902_v54 = vpop.f32.mrf.mxu0  ;;  %v614_v52 = vmul.f32 %v3297_v28, %v547_v9 }
 0x117   :  { %v903_v61 = vadd.f32 %v3553_v38, %v902_v54 }
 0x118   :  { %v675_v5 = vadd.f32 %v3313_v37, %v639_v40 }
 0x119   :  { %vm981_vm0 = vcmp.gt.f32.partialorder %v903_v61, 0.0  ;;  %v1013_v8 = vmul.f32 0.2, %v903_v61  ;;  %v3593_v21 = vpop.permute.xlu0 %530 }
 0x11a   :  { %3057 = vset.pattern.permute.xlu2 %v3136_v2  ;;  %v739_v7 = vmul.f32 0.2, %v675_v5  ;;  %vm707_vm3 = vcmp.gt.f32.partialorder %v675_v5, 0.0 }
 0x11b   :  { %229 = vperm.xlu2 %3057, %v74_v4   ;;  %v1045_v46 = vsel %vm981_vm0, %v903_v61, %v1013_v8 }
 0x11c   :  { %v3579_v11 = vpack.c.bf16 %v1045_v46, %v1044_v3  ;;  %3056 = vset.pattern.permute.xlu1 %v3134_v0  ;;  %v210_v13 = vpop.permute.xlu1 %209  ;;  %v771_v15 = vsel %vm707_vm3, %v675_v5, %v739_v7 }
 0x11d   :  { %534 = vperm.xlu1 %3056, %v61_v17   ;;  %v796_v12 = vpack.c.bf16 %v771_v15, %v770_v14  ;;  %v571_v18 = vpop.permute.xlu2 %570  ;;  %v264_v19 = vmul.f32 %v3292_v27, %v210_v13 }
 0x11e   :  { %1769 = vmatmul.bf16.vlgmr.msrb.gmra.mxu0 %v3579_v11  ;;  %v620_v36 = vmul.f32 %v3297_v28, %v571_v18 }
 0x11f   :  { %2637 = vmatmul.msk.bf16.gmra.mxu1 %vm842_vm2, %v796_v12  ;;  %v458_v60 = vadd.f32 %v426_v62, %v264_v19 }
 0x121   :  { %v652_v63 = vadd.f32 %v620_v36, %v458_v60  ;;  %v185_v32 = vpop.permute.xlu0 %184  ;;  %v608_v36 = vmul.f32 %v3297_v28, %v3560_v42  ;;  %v2843_v42 = vld [vmem:[#allocation2 + $0x1a0] sm:$0xf0] }
 0x122   :  { %v259_v24 = vmul.f32 %v3292_v27, %v185_v32 }
 0x123   :  { %3059 = vset.pattern.permute.xlu2 %v3135_v1 }
 0x124   :  { %396 = vperm.xlu2 %3059, %v3508_v56   ;;  %v453_v47 = vadd.f32 %v421_v49, %v259_v24 }
 0x125   :  { %3058 = vset.pattern.permute.xlu1 %v3135_v1  ;;  %v353_v20 = vpop.permute.xlu1 %352 }
 0x126   :  { %392 = vperm.xlu1 %3058, %v74_v4   ;;  %v3595_v22 = vpop.permute.xlu2 %154  ;;  %v420_v23 = vmul.f32 %v3287_v26, %v353_v20 }
 0x128   :  { %v452_v59 = vadd.f32 %v420_v23, %v258_v25  ;;  %v253_v23 = vmul.f32 %v3292_v27, %v3595_v22  ;;  %v2963_v25 = vld [vmem:[#allocation2 + $0x1c4] sm:$0xf] }
 0x12a   :  { %v646_v39 = vadd.f32 %v614_v52, %v452_v59 }
 0x12c   :  { %3061 = vset.pattern.permute.xlu2 %v3134_v0  ;;  %v682_v51 = vadd.f32 %v3313_v37, %v646_v39 }
 0x12d   :  { %590 = vperm.xlu2 %3061, %v3508_v56   ;;  %v381_v29 = vpop.permute.xlu1 %380  ;;  %v688_v56 = vadd.f32 %v3313_v37, %v652_v63 }
 0x12e   :  { %v427_v17 = vmul.f32 %v3287_v26, %v381_v29  ;;  %3060 = vset.pattern.permute.xlu1 %v3134_v0  ;;  %vm714_vm8 = vcmp.gt.f32.partialorder %v682_v51, 0.0  ;;  %v2875_v29 = vld [vmem:[#allocation2 + $0x1e0] sm:$0xf0] }
 0x12f   :  { %586 = vperm.xlu1 %3060, %v74_v4   ;;  %v333_v33 = vpop.permute.xlu2 %332  ;;  %v752_v41 = vmul.f32 0.2, %v688_v56  ;;  %vm720_vm4 = vcmp.gt.f32.partialorder %v688_v56, 0.0 }
 0x130   :  { %v905_v30 = vpop.f32.mrf.mxu0  ;;  %v459_v55 = vadd.f32 %v427_v17, %v265_v45  ;;  %v2878_v45 = vor.u32 %v2963_v25, %v2875_v29 }
 0x131   :  { %v906_v48 = vadd.f32 %v3553_v38, %v905_v30  ;;  %v2955_v30 = vld [vmem:[#allocation2 + $0x184] sm:$0xf] }
 0x132   :  { %v653_v35 = vadd.f32 %v621_v10, %v459_v55  ;;  %1583 = vmatpush.bf16.msrb.mxu2 %v2878_v45  ;;  %v2846_v32 = vor.u32 %v2955_v30, %v2843_v42  ;;  %v2651_v45 = vld [vmem:[#allocation2 + $0x20] sm:$0xf0] }
 0x133   :  { %v1014_v40 = vmul.f32 0.2, %v906_v48  ;;  %vm982_vm6 = vcmp.gt.f32.partialorder %v906_v48, 0.0 }
 0x134   :  { %v689_v43 = vadd.f32 %v3313_v37, %v653_v35  ;;  %v2811_v35 = vld [vmem:[#allocation2 + $0x160] sm:$0xf0] }
 0x135   :  { %3063 = vset.pattern.permute.xlu2 %v3135_v1  ;;  %v784_v1 = vsel %vm720_vm4, %v688_v56, %v752_v41  ;;  %v1046_v7 = vsel %vm982_vm6, %v906_v48, %v1014_v40 }
 0x136   :  { %344 = vperm.xlu2 %3063, %v3525_v58   ;;  %v551_v50 = vpop.permute.xlu1 %550  ;;  %vm721_vm5 = vcmp.gt.f32.partialorder %v689_v43, 0.0  ;;  %v753_v53 = vmul.f32 0.2, %v689_v43  ;;  %1584 = vmatpush.bf16.msrb.mxu2 %v2846_v32 }
 0x137   :  { %v615_v31 = vmul.f32 %v3297_v28, %v551_v50  ;;  %3062 = vset.pattern.permute.xlu1 %v3136_v2  ;;  %v746_v2 = vmul.f32 0.2, %v682_v51 }
 0x138   :  { %v907_v9 = vpop.f32.mrf.mxu0  ;;  %174 = vperm.xlu1 %3062, %v3575_v6   ;;  %v785_v57 = vsel %vm721_vm5, %v689_v43, %v753_v53  ;;  %v3625_v8 = vpop.permute.xlu2 %189  ;;  %v2939_v53 = vld [vmem:[#allocation2 + $0x104] sm:$0xf] }
 0x139   :  { %v908_v54 = vadd.f32 %v3553_v38, %v907_v9  ;;  %v647_v61 = vadd.f32 %v615_v31, %v453_v47  ;;  %v803_v4 = vpack.c.bf16 %v785_v57, %v784_v1  ;;  %v778_v15 = vsel %vm714_vm8, %v682_v51, %v746_v2  ;;  %v2779_v51 = vld [vmem:[#allocation2 + $0x120] sm:$0xf0] }
 0x13a   :  { %v2782_v47 = vor.u32 %v2939_v53, %v2779_v51  ;;  %v2931_v31 = vld [vmem:[#allocation2 + $0xc4] sm:$0xf] }
 0x13b   :  { %vm983_vm7 = vcmp.gt.f32.partialorder %v908_v54, 0.0  ;;  %v1015_v5 = vmul.f32 0.2, %v908_v54  ;;  %v683_v34 = vadd.f32 %v3313_v37, %v647_v61  ;;  %2644 = vmatmul.msk.bf16.gmra.mxu3 %vm842_vm2, %v803_v4  ;;  %v2747_v9 = vld [vmem:[#allocation2 + $0xe0] sm:$0xf0] }
 0x13c   :  { %v2750_v40 = vor.u32 %v2931_v31, %v2747_v9  ;;  %v2873_v4 = vld [vmem:[#allocation2 + $0x1c0] sm:$0xf]  ;;  %v2923_v2 = vld [vmem:[#allocation2 + $0x84] sm:$0xf] }
 0x13d   :  { %v1047_v3 = vsel %vm983_vm7, %v908_v54, %v1015_v5  ;;  %v747_v46 = vmul.f32 0.2, %v683_v34  ;;  %vm715_vm9 = vcmp.gt.f32.partialorder %v683_v34, 0.0  ;;  %v428_v5 = vmul.f32 %v3287_v26, %v3417_v16 }
 0x13e   :  { %v3627_v13 = vpack.c.bf16 %v1047_v3, %v1046_v7  ;;  %3066 = vset.pattern.permute.xlu2 %v3134_v0  ;;  %v2715_v7 = vld [vmem:[#allocation2 + $0xa0] sm:$0xf0] }
 0x13f   :  { %542 = vperm.xlu2 %3066, %v3575_v6   ;;  %v150_v14 = vpop.permute.xlu1 %149  ;;  %v779_v12 = vsel %vm715_vm9, %v683_v34, %v747_v46  ;;  %v2967_v34 = vld [vmem:[#allocation2 + $0x1dc] sm:$0xf0]  ;;  %v2718_v46 = vor.u32 %v2923_v2, %v2715_v7 }
 0x140   :  { %1774 = vmatmul.bf16.gmra.mxu0 %v3627_v13  ;;  %3065 = vset.pattern.permute.xlu1 %v3134_v0  ;;  %v800_v18 = vpack.c.bf16 %v779_v12, %v778_v15  ;;  %v3635_v19 = vpop.permute.xlu2 %224  ;;  %v252_v62 = vmul.f32 %v3292_v27, %v150_v14  ;;  %v415_v0 = vmul.f32 %v3287_v26, %v333_v33  ;;  %v2947_v33 = vld [vmem:[#allocation2 + $0x144] sm:$0xf] }
 0x141   :  { %538 = vperm.xlu1 %3065, %v3525_v58   ;;  %v2814_v39 = vor.u32 %v2947_v33, %v2811_v35  ;;  %v2874_v3 = vor.u32 %v2967_v34, %v2873_v4  ;;  %v2841_v35 = vld [vmem:[#allocation2 + $0x180] sm:$0xf] }
 0x142   :  { %2641 = vmatmul.msk.bf16.vlgmr.msra.gmra.mxu2 %vm842_vm2, %v800_v18  ;;  %v447_v17 = vadd.f32 %v415_v0, %v253_v23 }
 0x143   :  { %1585 = vmatpush.bf16.msrb.mxu2 %v2814_v39  ;;  %1494 = vmatpush.bf16.msrb.mxu1 %v2874_v3  ;;  %v2881_v39 = vld [vmem:[#allocation2 + $0x1c8] sm:$0xf] }
 0x144   :  { %v2849_v3 = vld [vmem:[#allocation2 + $0x188] sm:$0xf] }
 0x147   :  { %1586 = vmatpush.bf16.msrb.mxu2 %v2782_v47 }
 0x148   :  { %v329_v20 = vpop.permute.xlu1 %328 }
 0x149   :  { %v414_v60 = vmul.f32 %v3287_v26, %v329_v20  ;;  %v3644_v58 = vpop.permute.xlu2 %364  ;;  %v2915_v20 = vld [vmem:[#allocation2 + $0x44] sm:$0xf] }
 0x14b   :  { %v446_v6 = vadd.f32 %v414_v60, %v252_v62  ;;  %1587 = vmatpush.bf16.msrb.mxu2 %v2750_v40  ;;  %v2683_v62 = vld [vmem:[#allocation2 + $0x60] sm:$0xf0] }
 0x14c   :  { %v2686_v16 = vor.u32 %v2915_v20, %v2683_v62 }
 0x14d   :  { %v640_v63 = vadd.f32 %v608_v36, %v446_v6  ;;  %v3660_v36 = vld [vmem:[%s4356_s1] ss:$0 sm:$0xff] }
 0x14e   :  { %v267_v0 = vmul.f32 %v3660_v36, %v3635_v19 }
 0x14f   :  { %v676_v52 = vadd.f32 %v3313_v37, %v640_v63  ;;  %1588 = vmatpush.bf16.msrb.mxu2 %v2718_v46  ;;  %v2960_v46 = vld [vmem:[#allocation2 + $0x1a4] sm:$0xf0] }
 0x151   :  { %v527_v10 = vpop.permute.xlu1 %526  ;;  %v740_v55 = vmul.f32 0.2, %v676_v52  ;;  %vm708_vm10 = vcmp.gt.f32.partialorder %v676_v52, 0.0 }
 0x152   :  { %v609_v59 = vmul.f32 %v3297_v28, %v527_v10  ;;  %v555_v24 = vpop.permute.xlu2 %554  ;;  %v3669_v10 = vld [vmem:[%s4356_s1 + $0x2] ss:$0 sm:$0xff] }
 0x153   :  { %v772_v43 = vsel %vm708_vm10, %v676_v52, %v740_v55  ;;  %1589 = vmatpush.bf16.msrb.mxu2 %v2686_v16  ;;  %v623_v42 = vmul.f32 %v3669_v10, %v3581_v44 }
 0x154   :  { %v641_v56 = vadd.f32 %v609_v59, %v447_v17  ;;  %v616_v17 = vmul.f32 %v3669_v10, %v555_v24 }
 0x156   :  { %v677_v22 = vadd.f32 %v3313_v37, %v641_v56  ;;  %v3685_v56 = vld [vmem:[%s4357_s2] ss:$0 sm:$0xff] }
 0x158   :  { %v741_v49 = vmul.f32 0.2, %v677_v22  ;;  %vm709_vm11 = vcmp.gt.f32.partialorder %v677_v22, 0.0 }
 0x15a   :  { %v220_v41 = vpop.permute.xlu1 %219  ;;  %v773_v48 = vsel %vm709_vm11, %v677_v22, %v741_v49  ;;  %v579_v1 = vpop.permute.xlu2 %578  ;;  %v2959_v49 = vld [vmem:[#allocation2 + $0x19c] sm:$0xf0] }
 0x15b   :  { %v797_v50 = vpack.c.bf16 %v773_v48, %v772_v43  ;;  %v266_v54 = vmul.f32 %v3292_v27, %v220_v41  ;;  %v622_v15 = vmul.f32 %v3297_v28, %v579_v1  ;;  %v260_v28 = vmul.f32 %v3660_v36, %v3625_v8  ;;  %v3677_v8 = vld [vmem:[%s4356_s1 + $0x1] ss:$0 sm:$0xff]  ;;  %v195_v22 = vpop.permute.xlu0 %194  ;;  %v2968_v43 = vld [vmem:[#allocation2 + $0x1e4] sm:$0xf0] }
 0x15c   :  { %v2842_v41 = vor.u32 %v2959_v49, %v2841_v35  ;;  %v423_v53 = vmul.f32 %v3677_v8, %v3644_v58  ;;  %v261_v51 = vmul.f32 %v3660_v36, %v195_v22 }
 0x15d   :  { %2638 = vmatmul.msk.bf16.gmra.mxu1 %vm842_vm2, %v797_v50  ;;  %v460_v14 = vadd.f32 %v428_v5, %v266_v54  ;;  %v2882_v50 = vor.u32 %v2968_v43, %v2881_v39 }
 0x15e   :  { %1495 = vmatpush.bf16.msrb.mxu1 %v2842_v41  ;;  %v455_v1 = vadd.f32 %v423_v53, %v261_v51 }
 0x15f   :  { %v910_v37 = vpop.f32.mrf.mxu0  ;;  %v654_v23 = vadd.f32 %v622_v15, %v460_v14  ;;  %1672 = vmatpush.bf16.msrb.mxu3 %v2882_v50  ;;  %v2809_v14 = vld [vmem:[#allocation2 + $0x140] sm:$0xf] }
 0x160   :  { %v911_v57 = vadd.f32 %v3553_v38, %v910_v37 }
 0x161   :  { %v690_v32 = vadd.f32 %v3685_v56, %v654_v23 }
 0x162   :  { %v1016_v18 = vmul.f32 0.2, %v911_v57  ;;  %vm984_vm12 = vcmp.gt.f32.partialorder %v911_v57, 0.0 }
 0x163   :  { %v361_v61 = vpop.permute.xlu1 %360  ;;  %v3689_v24 = vpop.permute.xlu2 %164  ;;  %v754_v47 = vmul.f32 0.2, %v690_v32  ;;  %vm722_vm14 = vcmp.gt.f32.partialorder %v690_v32, 0.0 }
 0x164   :  { %v422_v60 = vmul.f32 %v3287_v26, %v361_v61  ;;  %v1048_v63 = vsel %vm984_vm12, %v911_v57, %v1016_v18  ;;  %v2907_v26 = vld [vmem:[#allocation2 + $0x4] sm:$0xf]  ;;  %v2951_v18 = vld [vmem:[#allocation2 + $0x15c] sm:$0xf0] }
 0x165   :  { %v2654_v30 = vor.u32 %v2907_v26, %v2651_v45  ;;  %v786_v4 = vsel %vm722_vm14, %v690_v32, %v754_v47  ;;  %v2817_v45 = vld [vmem:[#allocation2 + $0x148] sm:$0xf]  ;;  %v610_v47 = vmul.f32 %v3669_v10, %v3593_v21 }
 0x166   :  { %v454_v52 = vadd.f32 %v422_v60, %v260_v28  ;;  %v2810_v60 = vor.u32 %v2951_v18, %v2809_v14 }
 0x167   :  { %v912_v12 = vpop.f32.mrf.mxu0  ;;  %1590 = vmatpush.bf16.msrb.mxu2 %v2654_v30 }
 0x168   :  { %v913_v27 = vadd.f32 %v3553_v38, %v912_v12  ;;  %v648_v44 = vadd.f32 %v616_v17, %v454_v52  ;;  %v2850_v12 = vor.u32 %v2960_v46, %v2849_v3  ;;  %1496 = vmatpush.bf16.msrb.mxu1 %v2810_v60  ;;  %v2952_v17 = vld [vmem:[#allocation2 + $0x164] sm:$0xf0]  ;;  %v2777_v52 = vld [vmem:[#allocation2 + $0x100] sm:$0xf] }
 0x169   :  { %v2818_v32 = vor.u32 %v2952_v17, %v2817_v45 }
 0x16a   :  { %vm985_vm13 = vcmp.gt.f32.partialorder %v913_v27, 0.0  ;;  %v1017_v6 = vmul.f32 0.2, %v913_v27  ;;  %v684_v9 = vadd.f32 %v3685_v56, %v648_v44  ;;  %1673 = vmatpush.bf16.msrb.mxu3 %v2850_v12  ;;  %v2785_v44 = vld [vmem:[#allocation2 + $0x108] sm:$0xf] }
 0x16b   :  { %v389_v29 = vpop.permute.xlu1 %388 }
 0x16c   :  { %v1049_v25 = vsel %vm985_vm13, %v913_v27, %v1017_v6  ;;  %v429_v19 = vmul.f32 %v3677_v8, %v389_v29  ;;  %v748_v15 = vmul.f32 0.2, %v684_v9  ;;  %v341_v27 = vpop.permute.xlu2 %340  ;;  %vm716_vm3 = vcmp.gt.f32.partialorder %v684_v9, 0.0 }
 0x16d   :  { %v3672_v59 = vpack.c.bf16 %v1049_v25, %v1048_v63 }
 0x16e   :  { %v461_v55 = vadd.f32 %v429_v19, %v267_v0  ;;  %v780_v63 = vsel %vm716_vm3, %v684_v9, %v748_v15  ;;  %v2943_v19 = vld [vmem:[#allocation2 + $0x11c] sm:$0xf0]  ;;  %1674 = vmatpush.bf16.msrb.mxu3 %v2818_v32  ;;  %v2928_v15 = vld [vmem:[#allocation2 + $0xa4] sm:$0xf0] }
 0x16f   :  { %v915_v33 = vpop.f32.mrf.mxu0  ;;  %1779 = vmatmul.bf16.gmra.mxu0 %v3672_v59  ;;  %v2778_v22 = vor.u32 %v2943_v19, %v2777_v52  ;;  %v2657_v32 = vld [vmem:[#allocation2 + $0x8] sm:$0xf] }
 0x170   :  { %v655_v48 = vadd.f32 %v623_v42, %v461_v55  ;;  %v916_v31 = vadd.f32 %v3553_v38, %v915_v33  ;;  %v925_v55 = vpop.f32.mrf.mxu1 }
 0x171   :  { %1497 = vmatpush.bf16.msrb.mxu1 %v2778_v22  ;;  %v2912_v22 = vld [vmem:[#allocation2 + $0x24] sm:$0xf0] }
 0x172   :  { %v691_v37 = vadd.f32 %v3685_v56, %v655_v48  ;;  %v1018_v61 = vmul.f32 0.2, %v916_v31  ;;  %vm986_vm0 = vcmp.gt.f32.partialorder %v916_v31, 0.0  ;;  %v2944_v48 = vld [vmem:[#allocation2 + $0x124] sm:$0xf0] }
 0x173   :  { %v2786_v51 = vor.u32 %v2944_v48, %v2785_v44 }
 0x174   :  { %v559_v40 = vpop.permute.xlu1 %558  ;;  %vm723_vm15 = vcmp.gt.f32.partialorder %v691_v37, 0.0  ;;  %v755_v54 = vmul.f32 0.2, %v691_v37  ;;  %v1050_v16 = vsel %vm986_vm0, %v916_v31, %v1018_v61  ;;  %v2935_v31 = vld [vmem:[#allocation2 + $0xdc] sm:$0xf0] }
 0x175   :  { %v617_v57 = vmul.f32 %v3669_v10, %v559_v40  ;;  %v3705_v30 = vpop.permute.xlu2 %229  ;;  %1675 = vmatpush.bf16.msrb.mxu3 %v2786_v51 }
 0x176   :  { %v787_v5 = vsel %vm723_vm15, %v691_v37, %v755_v54  ;;  %v2745_v37 = vld [vmem:[#allocation2 + $0xc0] sm:$0xf] }
 0x177   :  { %v917_v58 = vpop.f32.mrf.mxu0  ;;  %v649_v34 = vadd.f32 %v617_v57, %v455_v1  ;;  %v804_v7 = vpack.c.bf16 %v787_v5, %v786_v4  ;;  %v2746_v54 = vor.u32 %v2935_v31, %v2745_v37  ;;  %v255_v1 = vmul.f32 %v3660_v36, %v3689_v24  ;;  %v2753_v4 = vld [vmem:[#allocation2 + $0xc8] sm:$0xf]  ;;  %v2965_v31 = vld [vmem:[#allocation2 + $0x1d4] sm:$0xf] }
 0x178   :  { %v918_v2 = vadd.f32 %v3553_v38, %v917_v58  ;;  %v417_v57 = vmul.f32 %v3677_v8, %v341_v27  ;;  %v2721_v24 = vld [vmem:[#allocation2 + $0x88] sm:$0xf] }
 0x179   :  { %v685_v20 = vadd.f32 %v3685_v56, %v649_v34  ;;  %2645 = vmatmul.msk.bf16.gmra.mxu3 %vm842_vm2, %v804_v7  ;;  %1498 = vmatpush.bf16.msrb.mxu1 %v2746_v54  ;;  %v2936_v34 = vld [vmem:[#allocation2 + $0xe4] sm:$0xf0]  ;;  %v2722_v18 = vor.u32 %v2928_v15, %v2721_v24 }
 0x17a   :  { %vm987_vm1 = vcmp.gt.f32.partialorder %v918_v2, 0.0  ;;  %v1019_v62 = vmul.f32 0.2, %v918_v2  ;;  %v2754_v21 = vor.u32 %v2936_v34, %v2753_v4  ;;  %v449_v3 = vadd.f32 %v417_v57, %v255_v1 }
 0x17b   :  { %v749_v6 = vmul.f32 0.2, %v685_v20  ;;  %vm717_vm4 = vcmp.gt.f32.partialorder %v685_v20, 0.0 }
 0x17c   :  { %v1051_v28 = vsel %vm987_vm1, %v918_v2, %v1019_v62  ;;  %v927_v2 = vpop.f32.mrf.mxu1  ;;  %1676 = vmatpush.bf16.msrb.mxu3 %v2754_v21  ;;  %v235_v62 = vpop.permute.xlu0 %234  ;;  %v2919_v21 = vld [vmem:[#allocation2 + $0x5c] sm:$0xf0] }
 0x17d   :  { %v3701_v23 = vpack.c.bf16 %v1051_v28, %v1050_v16  ;;  %v160_v0 = vpop.permute.xlu1 %159  ;;  %v781_v25 = vsel %vm717_vm4, %v685_v20, %v749_v6  ;;  %v928_v12 = vadd.f32 %v3553_v38, %v927_v2  ;;  %v926_v20 = vadd.f32 %v3553_v38, %v925_v55  ;;  %v2689_v6 = vld [vmem:[#allocation2 + $0x48] sm:$0xf]  ;;  %v2681_v2 = vld [vmem:[#allocation2 + $0x40] sm:$0xf] }
 0x17e   :  { %v801_v26 = vpack.c.bf16 %v781_v25, %v780_v63  ;;  %v254_v49 = vmul.f32 %v3660_v36, %v160_v0  ;;  %v397_v5 = vpop.permute.xlu2 %396  ;;  %v269_v0 = vmul.f32 %v3660_v36, %v235_v62  ;;  %v2920_v63 = vld [vmem:[#allocation2 + $0x64] sm:$0xf0] }
 0x17f   :  { %v920_v29 = vpop.f32.mrf.mxu0  ;;  %1784 = vmatmul.bf16.gmra.mxu0 %v3701_v23  ;;  %vm991_vm7 = vcmp.gt.f32.partialorder %v928_v12, 0.0  ;;  %v1023_v28 = vmul.f32 0.2, %v928_v12  ;;  %v431_v25 = vmul.f32 %v3677_v8, %v397_v5  ;;  %v1022_v45 = vmul.f32 0.2, %v926_v20 }
 0x180   :  { %2642 = vmatmul.msk.bf16.gmra.mxu2 %vm842_vm2, %v801_v26  ;;  %v921_v42 = vadd.f32 %v3553_v38, %v920_v29  ;;  %1677 = vmatpush.bf16.msrb.mxu3 %v2722_v18  ;;  %v2690_v26 = vor.u32 %v2920_v63, %v2689_v6  ;;  %vm990_vm10 = vcmp.gt.f32.partialorder %v926_v20, 0.0  ;;  %v2649_v63 = vld [vmem:[#allocation2] sm:$0xf] }
 0x181   :  { %v1055_v55 = vsel %vm991_vm7, %v928_v12, %v1023_v28  ;;  %v1054_v44 = vsel %vm990_vm10, %v926_v20, %v1022_v45 }
 0x182   :  { %v1020_v39 = vmul.f32 0.2, %v921_v42  ;;  %vm988_vm5 = vcmp.gt.f32.partialorder %v921_v42, 0.0 }
 0x184   :  { %v1052_v9 = vsel %vm988_vm5, %v921_v42, %v1020_v39  ;;  %1678 = vmatpush.bf16.msrb.mxu3 %v2690_v26 }
 0x186   :  { %v337_v33 = vpop.permute.xlu1 %336 }
 0x187   :  { %v922_v35 = vpop.f32.mrf.mxu0  ;;  %v416_v41 = vmul.f32 %v3677_v8, %v337_v33  ;;  %v591_v17 = vpop.permute.xlu2 %590 }
 0x188   :  { %v923_v43 = vadd.f32 %v3553_v38, %v922_v35  ;;  %v2658_v35 = vor.u32 %v2912_v22, %v2657_v32  ;;  %v625_v39 = vmul.f32 %v3669_v10, %v591_v17  ;;  %v2970_v32 = vld [vmem:[#allocation2 + $0x1f4] sm:$0xf0] }
 0x189   :  { %v448_v50 = vadd.f32 %v416_v41, %v254_v49  ;;  %v463_v49 = vadd.f32 %v431_v25, %v269_v0  ;;  %v2713_v41 = vld [vmem:[#allocation2 + $0x80] sm:$0xf] }
 0x18a   :  { %vm989_vm6 = vcmp.gt.f32.partialorder %v923_v43, 0.0  ;;  %v1021_v53 = vmul.f32 0.2, %v923_v43  ;;  %1679 = vmatpush.bf16.msrb.mxu3 %v2658_v35  ;;  %v2911_v25 = vld [vmem:[#allocation2 + $0x1c] sm:$0xf0] }
 0x18b   :  { %v642_v61 = vadd.f32 %v610_v47, %v448_v50  ;;  %v3730_v50 = vpack.c.bf16 %v1055_v55, %v1054_v44  ;;  %v657_v51 = vadd.f32 %v625_v39, %v463_v49  ;;  %v170_v47 = vpop.permute.xlu0 %169  ;;  %v2650_v17 = vor.u32 %v2911_v25, %v2649_v63  ;;  %v3755_v44 = vld [vmem:[%s4361_s6] sm:$0xff]  ;;  %v2867_v63 = vld [vmem:[#allocation2 + $0x1b8] sm:$0xf0] }
 0x18c   :  { %v1053_v40 = vsel %vm989_vm6, %v923_v43, %v1021_v53  ;;  %v2927_v43 = vld [vmem:[#allocation2 + $0x9c] sm:$0xf0]  ;;  %v256_v49 = vmul.f32 %v3660_v36, %v170_v47 }
 0x18d   :  { %v3716_v58 = vpack.c.bf16 %v1053_v40, %v1052_v9  ;;  %v678_v46 = vadd.f32 %v3685_v56, %v642_v61  ;;  %v2714_v48 = vor.u32 %v2927_v43, %v2713_v41  ;;  %v268_v9 = vmul.f32 %v3660_v36, %v3705_v30  ;;  %v2891_v40 = vld [vmem:[#allocation2 + $0x1f0] sm:$0xf0]  ;;  %v2889_v41 = vld [vmem:[#allocation2 + $0x1d0] sm:$0xf] }
 0x18e   :  { %v2894_v57 = vor.u32 %v2965_v31, %v2891_v40  ;;  %v693_v61 = vadd.f32 %v3685_v56, %v657_v51 }
 0x18f   :  { %1789 = vmatmul.bf16.gmra.mxu0 %v3716_v58  ;;  %v535_v7 = vpop.permute.xlu1 %534  ;;  %v742_v16 = vmul.f32 0.2, %v678_v46  ;;  %vm710_vm8 = vcmp.gt.f32.partialorder %v678_v46, 0.0  ;;  %1499 = vmatpush.bf16.msrb.mxu1 %v2714_v48 }
 0x190   :  { %v611_v14 = vmul.f32 %v3669_v10, %v535_v7  ;;  %1591 = vmatmul.bf16.vlgmr.msrb.gmra.mxu2 %v3579_v11  ;;  %v345_v54 = vpop.permute.xlu2 %344  ;;  %vm725_vm12 = vcmp.gt.f32.partialorder %v693_v61, 0.0 }
 0x191   :  { %v774_v19 = vsel %vm710_vm8, %v678_v46, %v742_v16  ;;  %1939 = vmatpush.bf16.msra.mxu2 %v2894_v57  ;;  %v2682_v46 = vor.u32 %v2919_v21, %v2681_v2  ;;  %v2859_v21 = vld [vmem:[#allocation2 + $0x1b0] sm:$0xf0] }
 0x192   :  { %v643_v27 = vadd.f32 %v611_v14, %v449_v3  ;;  %v757_v14 = vmul.f32 0.2, %v693_v61 }
 0x193   :  { %v349_v15 = vpop.permute.xlu0 %348  ;;  %1500 = vmatpush.bf16.msrb.mxu1 %v2682_v46  ;;  %v2899_v46 = vld [vmem:[#allocation2 + $0x1f8] sm:$0xf0] }
 0x194   :  { %v679_v60 = vadd.f32 %v3685_v56, %v643_v27  ;;  %v419_v62 = vmul.f32 %v3677_v8, %v349_v15  ;;  %v789_v0 = vsel %vm725_vm12, %v693_v61, %v757_v14  ;;  %v2865_v14 = vld [vmem:[#allocation2 + $0x198] sm:$0xf] }
 0x196   :  { %v743_v29 = vmul.f32 0.2, %v679_v60  ;;  %vm711_vm9 = vcmp.gt.f32.partialorder %v679_v60, 0.0 }
 0x197   :  { %1501 = vmatpush.bf16.msrb.mxu1 %v2650_v17 }
 0x198   :  { %v393_v52 = vpop.permute.xlu1 %392  ;;  %v775_v42 = vsel %vm711_vm9, %v679_v60, %v743_v29 }
 0x199   :  { %v798_v33 = vpack.c.bf16 %v775_v42, %v774_v19  ;;  %v430_v37 = vmul.f32 %v3677_v8, %v393_v52  ;;  %v543_v60 = vpop.permute.xlu2 %542  ;;  %v2897_v42 = vld [vmem:[#allocation2 + $0x1d8] sm:$0xf] }
 0x19a   :  { %v613_v19 = vmul.f32 %v3669_v10, %v543_v60  ;;  %v2898_v55 = vor.u32 %v2970_v32, %v2897_v42  ;;  %v2949_v60 = vld [vmem:[#allocation2 + $0x154] sm:$0xf] }
 0x19b   :  { %2639 = vmatmul.msk.bf16.gmra.mxu1 %vm842_vm2, %v798_v33  ;;  %v462_v4 = vadd.f32 %v430_v37, %v268_v9  ;;  %v1770_v16 = vpop.f32.mrf.mxu0  ;;  %v418_v33 = vmul.f32 %v3677_v8, %v345_v54  ;;  %v2969_v37 = vld [vmem:[#allocation2 + $0x1ec] sm:$0xf0]  ;;  %v3760_v9 = vperm.slane %v3755_v44, 3 }
 0x19c   :  { %v930_v53 = vpop.f32.mrf.mxu1  ;;  %2028 = vmatpush.bf16.msra.mxu3 %v2898_v55  ;;  %v2890_v8 = vor.u32 %v2969_v37, %v2889_v41  ;;  %v2954_v41 = vld [vmem:[#allocation2 + $0x174] sm:$0xf0] }
 0x19d   :  { %v931_v34 = vadd.f32 %v3553_v38, %v930_v53  ;;  %v450_v43 = vadd.f32 %v418_v33, %v256_v49 }
 0x19e   :  { %1850 = vmatpush.bf16.msra.mxu1 %v2890_v8 }
 0x19f   :  { %1794 = vmatmul.bf16.gmra.mxu0 %v3730_v50  ;;  %v1024_v12 = vmul.f32 0.2, %v931_v34  ;;  %vm992_vm13 = vcmp.gt.f32.partialorder %v931_v34, 0.0 }
 0x1a0   :  { %1596 = vmatmul.bf16.gmra.mxu2 %v3627_v13 }
 0x1a1   :  { %v587_v1 = vpop.permute.xlu1 %586  ;;  %v1056_v29 = vsel %vm992_vm13, %v931_v34, %v1024_v12  ;;  %v2857_v12 = vld [vmem:[#allocation2 + $0x190] sm:$0xf] }
 0x1a2   :  { %v624_v5 = vmul.f32 %v3669_v10, %v587_v1  ;;  %v1771_v1 = vadd.f32 %v1770_v16, %v3760_v9  ;;  %v2827_v16 = vld [vmem:[#allocation2 + $0x170] sm:$0xf0] }
 0x1a3   :  { %v1772_v48 = vpop.f32.mrf.mxu0 }
 0x1a4   :  { %v656_v7 = vadd.f32 %v624_v5, %v462_v4  ;;  %v932_v3 = vpop.f32.mrf.mxu1  ;;  %v1773_v40 = vadd.f32 %v1772_v48, %v3760_v9 }
 0x1a5   :  { %v933_v30 = vadd.f32 %v3553_v38, %v932_v3 }
 0x1a6   :  { %v692_v24 = vadd.f32 %v3685_v56, %v656_v7  ;;  %v2269_v4 = vmax.f32 %v1771_v1, %v1773_v40  ;;  %v2966_v7 = vld [vmem:[#allocation2 + $0x1dc] sm:$0xf] }
 0x1a7   :  { %vm993_vm11 = vcmp.gt.f32.partialorder %v933_v30, 0.0  ;;  %v1025_v18 = vmul.f32 0.2, %v933_v30 }
 0x1a8   :  { %v756_v27 = vmul.f32 0.2, %v692_v24  ;;  %vm724_vm14 = vcmp.gt.f32.partialorder %v692_v24, 0.0 }
 0x1a9   :  { %v1057_v20 = vsel %vm993_vm11, %v933_v30, %v1025_v18  ;;  %v3769_v30 = vor.u32 %v2966_v7, %v2899_v46  ;;  %v2961_v18 = vld [vmem:[#allocation2 + $0x1ac] sm:$0xf0] }
 0x1aa   :  { %v175_v6 = vpop.permute.xlu1 %174  ;;  %v788_v28 = vsel %vm724_vm14, %v692_v24, %v756_v27  ;;  %v3744_v52 = vpack.c.bf16 %v1057_v20, %v1056_v29  ;;  %v2962_v24 = vld [vmem:[#allocation2 + $0x1b4] sm:$0xf0]  ;;  %v2858_v27 = vor.u32 %v2961_v18, %v2857_v12 }
 0x1ab   :  { %v257_v26 = vmul.f32 %v3660_v36, %v175_v6  ;;  %v805_v45 = vpack.c.bf16 %v789_v0, %v788_v28  ;;  %2117 = vmatpush.bf16.msra.mxu0 %v3769_v30  ;;  %v2866_v15 = vor.u32 %v2962_v24, %v2865_v14  ;;  %v2958_v6 = vld [vmem:[#allocation2 + $0x19c] sm:$0xf]  ;;  %v2830_v0 = vor.u32 %v2949_v60, %v2827_v16  ;;  %v2801_v18 = vld [vmem:[#allocation2 + $0x118] sm:$0xf]  ;;  %v2793_v16 = vld [vmem:[#allocation2 + $0x110] sm:$0xf] }
 0x1ac   :  { %1851 = vmatpush.bf16.msra.mxu1 %v2858_v27  ;;  %v2946_v27 = vld [vmem:[#allocation2 + $0x134] sm:$0xf0] }
 0x1ad   :  { %v451_v22 = vadd.f32 %v419_v62, %v257_v26  ;;  %2646 = vmatmul.msk.bf16.gmra.mxu3 %vm842_vm2, %v805_v45  ;;  %v3780_v45 = vor.u32 %v2958_v6, %v2867_v63  ;;  %v2945_v6 = vld [vmem:[#allocation2 + $0x12c] sm:$0xf0] }
 0x1ae   :  { %2029 = vmatpush.bf16.msra.mxu3 %v2866_v15 }
 0x1af   :  { %1799 = vmatmul.bf16.gmra.mxu0 %v3744_v52  ;;  %v645_v35 = vadd.f32 %v613_v19, %v451_v22 }
 0x1b0   :  { %1601 = vmatmul.bf16.gmra.mxu2 %v3672_v59  ;;  %2118 = vmatpush.bf16.msra.mxu0 %v3780_v45 }
 0x1b1   :  { %v681_v53 = vadd.f32 %v3685_v56, %v645_v35 }
 0x1b3   :  { %v539_v39 = vpop.permute.xlu1 %538  ;;  %v745_v36 = vmul.f32 0.2, %v681_v53  ;;  %vm713_vm15 = vcmp.gt.f32.partialorder %v681_v53, 0.0 }
 0x1b4   :  { %v612_v51 = vmul.f32 %v3669_v10, %v539_v39  ;;  %v2833_v39 = vld [vmem:[#allocation2 + $0x158] sm:$0xf] }
 0x1b5   :  { %v777_v10 = vsel %vm713_vm15, %v681_v53, %v745_v36  ;;  %v2834_v48 = vor.u32 %v2954_v41, %v2833_v39  ;;  %v2953_v53 = vld [vmem:[#allocation2 + $0x16c] sm:$0xf0] }
 0x1b6   :  { %v644_v31 = vadd.f32 %v612_v51, %v450_v43  ;;  %v2825_v43 = vld [vmem:[#allocation2 + $0x150] sm:$0xf] }
 0x1b7   :  { %v2826_v37 = vor.u32 %v2953_v53, %v2825_v43  ;;  %2030 = vmatpush.bf16.msra.mxu3 %v2834_v48  ;;  %v2933_v48 = vld [vmem:[#allocation2 + $0xd4] sm:$0xf] }
 0x1b8   :  { %v680_v47 = vadd.f32 %v3685_v56, %v644_v31  ;;  %v2957_v56 = vld [vmem:[#allocation2 + $0x194] sm:$0xf]  ;;  %v3794_v31 = vpop.f32.mrf.mxu3 }
 0x1b9   :  { %v2862_v3 = vor.u32 %v2957_v56, %v2859_v21  ;;  %1852 = vmatpush.bf16.msra.mxu1 %v2826_v37  ;;  %v2763_v53 = vld [vmem:[#allocation2 + $0xf0] sm:$0xf0] }
 0x1ba   :  { %v744_v54 = vmul.f32 0.2, %v680_v47  ;;  %vm712_vm0 = vcmp.gt.f32.partialorder %v680_v47, 0.0 }
 0x1bb   :  { %1940 = vmatpush.bf16.msra.mxu2 %v2862_v3 }
 0x1bc   :  { %v776_v61 = vsel %vm712_vm0, %v680_v47, %v744_v54 }
 0x1bd   :  { %v1775_v57 = vpop.f32.mrf.mxu0  ;;  %1680 = vmatmul.bf16.vlgmr.msrb.gmra.mxu3 %v3579_v11  ;;  %v799_v34 = vpack.c.bf16 %v777_v10, %v776_v61  ;;  %v2795_v61 = vld [vmem:[#allocation2 + $0x130] sm:$0xf0]  ;;  %v2950_v10 = vld [vmem:[#allocation2 + $0x15c] sm:$0xf] }
 0x1be   :  { %v1776_v5 = vadd.f32 %v1775_v57, %v3760_v9  ;;  %v2941_v57 = vld [vmem:[#allocation2 + $0x114] sm:$0xf] }
 0x1bf   :  { %2640 = vmatmul.msk.bf16.gmra.mxu1 %vm842_vm2, %v799_v34  ;;  %1941 = vmatpush.bf16.msra.mxu2 %v2830_v0  ;;  %v2794_v0 = vor.u32 %v2945_v6, %v2793_v16 }
 0x1c0   :  { %v2270_v2 = vmax.f32 %v2269_v4, %v1776_v5  ;;  %1606 = vmatmul.bf16.gmra.mxu2 %v3701_v23  ;;  %v2798_v4 = vor.u32 %v2941_v57, %v2795_v61  ;;  %v2835_v5 = vld [vmem:[#allocation2 + $0x178] sm:$0xf0]  ;;  %v3807_v21 = vpop.f32.mrf.mxu3 }
 0x1c1   :  { %v3802_v34 = vor.u32 %v2950_v10, %v2835_v5  ;;  %1853 = vmatpush.bf16.msra.mxu1 %v2794_v0 }
 0x1c3   :  { %1942 = vmatpush.bf16.msra.mxu2 %v2798_v4  ;;  %2119 = vmatpush.bf16.msra.mxu0 %v3802_v34 }
 0x1c5   :  { %v1777_v25 = vpop.f32.mrf.mxu0  ;;  %v3791_v49 = vpop.f32.mrf.mxu2 }
 0x1c6   :  { %v1778_v32 = vadd.f32 %v1777_v25, %v3760_v9 }
 0x1c8   :  { %v2271_v33 = vmax.f32 %v2270_v2, %v1778_v32  ;;  %v3812_v14 = vpop.f32.mrf.mxu3 }
 0x1cd   :  { %1685 = vmatmul.bf16.gmra.mxu3 %v3627_v13  ;;  %v3796_v36 = vpop.f32.mrf.mxu2 }
 0x1cf   :  { %1502 = vmatmul.bf16.vlgmr.msrb.gmra.mxu1 %v3579_v11 }
 0x1d0   :  { %1611 = vmatmul.bf16.gmra.mxu2 %v3716_v58 }
 0x1da   :  { %v935_v20 = vpop.f32.mrf.mxu1 }
 0x1db   :  { %v936_v62 = vadd.f32 %v3553_v38, %v935_v20  ;;  %v2802_v20 = vor.u32 %v2946_v27, %v2801_v18 }
 0x1dd   :  { %1690 = vmatmul.bf16.gmra.mxu3 %v3672_v59  ;;  %v1026_v29 = vmul.f32 0.2, %v936_v62  ;;  %vm994_vm2 = vcmp.gt.f32.partialorder %v936_v62, 0.0 }
 0x1de   :  { %2031 = vmatpush.bf16.msra.mxu3 %v2802_v20 }
 0x1df   :  { %1507 = vmatmul.bf16.gmra.mxu1 %v3627_v13  ;;  %v1058_v19 = vsel %vm994_vm2, %v936_v62, %v1026_v29 }
 0x1e0   :  { %1616 = vmatmul.bf16.gmra.mxu2 %v3730_v50 }
 0x1e2   :  { %v937_v28 = vpop.f32.mrf.mxu1 }
 0x1e3   :  { %v938_v26 = vadd.f32 %v3553_v38, %v937_v28  ;;  %v3817_v28 = vpop.f32.mrf.mxu3 }
 0x1e5   :  { %vm995_vm1 = vcmp.gt.f32.partialorder %v938_v26, 0.0  ;;  %v1027_v17 = vmul.f32 0.2, %v938_v26 }
 0x1e7   :  { %v1059_v42 = vsel %vm995_vm1, %v938_v26, %v1027_v17 }
 0x1e8   :  { %v3784_v22 = vpack.c.bf16 %v1059_v42, %v1058_v19  ;;  %v3823_v19 = vld [vmem:[%s4359_s4] ss:$0 sm:$0xff] }
 0x1ea   :  { %1804 = vmatmul.bf16.gmra.mxu0 %v3784_v22 }
 0x1ec   :  { %v1780_v55 = vpop.f32.mrf.mxu0 }
 0x1ed   :  { %v1781_v38 = vadd.f32 %v1780_v55, %v3760_v9  ;;  %1695 = vmatmul.bf16.gmra.mxu3 %v3701_v23 }
 0x1ef   :  { %v2272_v35 = vmax.f32 %v2271_v33, %v1781_v38  ;;  %1512 = vmatmul.bf16.gmra.mxu1 %v3672_v59  ;;  %v3831_v33 = vperm.slane %v3755_v44, 1 }
 0x1f0   :  { %1621 = vmatmul.bf16.gmra.mxu2 %v3744_v52 }
 0x1f4   :  { %v1782_v51 = vpop.f32.mrf.mxu0 }
 0x1f5   :  { %v1783_v8 = vadd.f32 %v1782_v51, %v3760_v9  ;;  %v2942_v51 = vld [vmem:[#allocation2 + $0x11c] sm:$0xf] }
 0x1f7   :  { %v2273_v40 = vmax.f32 %v2272_v35, %v1783_v8  ;;  %v2766_v8 = vor.u32 %v2933_v48, %v2763_v53 }
 0x1f9   :  { %1943 = vmatpush.bf16.msra.mxu2 %v2766_v8 }
 0x1fc   :  { %v1785_v47 = vpop.f32.mrf.mxu0  ;;  %v3828_v55 = vpop.f32.mrf.mxu3 }
 0x1fd   :  { %v1786_v54 = vadd.f32 %v1785_v47, %v3760_v9  ;;  %1700 = vmatmul.bf16.gmra.mxu3 %v3716_v58  ;;  %v2803_v47 = vld [vmem:[#allocation2 + $0x138] sm:$0xf0] }
 0x1fe   :  { %v3837_v57 = vor.u32 %v2942_v51, %v2803_v47  ;;  %v2925_v47 = vld [vmem:[#allocation2 + $0x94] sm:$0xf] }
 0x1ff   :  { %v2274_v1 = vmax.f32 %v2273_v40, %v1786_v54  ;;  %1517 = vmatmul.bf16.gmra.mxu1 %v3701_v23 }
 0x200   :  { %1626 = vmatmul.bf16.gmra.mxu2 %v3784_v22  ;;  %2120 = vmatpush.bf16.msra.mxu0 %v3837_v57 }
 0x203   :  { %v3805_v2 = vpop.f32.mrf.mxu2 }
 0x204   :  { %v1787_v56 = vpop.f32.mrf.mxu0 }
 0x205   :  { %v1788_v7 = vadd.f32 %v1787_v56, %v3760_v9 }
 0x207   :  { %v2275_v24 = vmax.f32 %v2274_v1, %v1788_v7 }
 0x20b   :  { %v3810_v3 = vpop.f32.mrf.mxu2 }
 0x20c   :  { %v1790_v46 = vpop.f32.mrf.mxu0 }
 0x20d   :  { %v1791_v15 = vadd.f32 %v1790_v46, %v3760_v9  ;;  %1705 = vmatmul.bf16.gmra.mxu3 %v3730_v50  ;;  %v3843_v46 = vpop.f32.mrf.mxu3 }
 0x20f   :  { %v2276_v12 = vmax.f32 %v2275_v24, %v1791_v15  ;;  %1522 = vmatmul.bf16.gmra.mxu1 %v3716_v58 }
 0x213   :  { %v1592_v62 = vpop.f32.mrf.mxu2 }
 0x214   :  { %v1792_v60 = vpop.f32.mrf.mxu0  ;;  %v1593_v37 = vadd.f32 %v1592_v62, %v3831_v33  ;;  %v2769_v62 = vld [vmem:[#allocation2 + $0xd8] sm:$0xf] }
 0x215   :  { %v1793_v63 = vadd.f32 %v1792_v60, %v3760_v9  ;;  %v2938_v60 = vld [vmem:[#allocation2 + $0xf4] sm:$0xf0] }
 0x216   :  { %v2770_v16 = vor.u32 %v2938_v60, %v2769_v62  ;;  %v3868_v62 = vperm.slane %v3755_v44, 2 }
 0x217   :  { %v2277_v17 = vmax.f32 %v2276_v12, %v1793_v63 }
 0x218   :  { %v940_v25 = vpop.f32.mrf.mxu1  ;;  %2032 = vmatpush.bf16.msra.mxu3 %v2770_v16 }
 0x219   :  { %v941_v42 = vadd.f32 %v3823_v19, %v940_v25  ;;  %v2761_v25 = vld [vmem:[#allocation2 + $0xd0] sm:$0xf] }
 0x21b   :  { %v1594_v29 = vpop.f32.mrf.mxu2  ;;  %v1028_v35 = vmul.f32 0.2, %v941_v42  ;;  %vm996_vm3 = vcmp.gt.f32.partialorder %v941_v42, 0.0 }
 0x21c   :  { %v1795_v26 = vpop.f32.mrf.mxu0  ;;  %v1595_v39 = vadd.f32 %v1594_v29, %v3831_v33 }
 0x21d   :  { %v1796_v32 = vadd.f32 %v1795_v26, %v3760_v9  ;;  %1710 = vmatmul.bf16.gmra.mxu3 %v3744_v52  ;;  %v1060_v4 = vsel %vm996_vm3, %v941_v42, %v1028_v35  ;;  %vm2391_vm3 = vcmask 1042434  }
 0x21e   :  { %v2227_v61 = vmax.f32 %v1593_v37, %v1595_v39 }
 0x21f   :  { %v2278_v38 = vmax.f32 %v2277_v17, %v1796_v32  ;;  %1527 = vmatmul.bf16.gmra.mxu1 %v3730_v50  ;;  %v2937_v17 = vld [vmem:[#allocation2 + $0xec] sm:$0xf0] }
 0x220   :  { %v942_v41 = vpop.f32.mrf.mxu1  ;;  %v2762_v32 = vor.u32 %v2937_v17, %v2761_v25 }
 0x221   :  { %v943_v43 = vadd.f32 %v3823_v19, %v942_v41 }
 0x222   :  { %1854 = vmatpush.bf16.msra.mxu1 %v2762_v32 }
 0x223   :  { %vm997_vm4 = vcmp.gt.f32.partialorder %v943_v43, 0.0  ;;  %v1029_v40 = vmul.f32 0.2, %v943_v43  ;;  %v1597_v54 = vpop.f32.mrf.mxu2 }
 0x224   :  { %v1797_v1 = vpop.f32.mrf.mxu0  ;;  %v1598_v10 = vadd.f32 %v1597_v54, %v3831_v33 }
 0x225   :  { %v1061_v5 = vsel %vm997_vm4, %v943_v43, %v1029_v40  ;;  %v1798_v24 = vadd.f32 %v1797_v1, %v3760_v9  ;;  %v2731_v1 = vld [vmem:[#allocation2 + $0xb0] sm:$0xf0]  ;;  %vm2389_vm4 = vcmask 1040384  }
 0x226   :  { %v3841_v56 = vpack.c.bf16 %v1061_v5, %v1060_v4  ;;  %v2228_v7 = vmax.f32 %v2227_v61, %v1598_v10  ;;  %v2934_v61 = vld [vmem:[#allocation2 + $0xdc] sm:$0xf]  ;;  %v2734_v5 = vor.u32 %v2925_v47, %v2731_v1 }
 0x227   :  { %v2279_v18 = vmax.f32 %v2278_v38, %v1798_v24  ;;  %v2771_v10 = vld [vmem:[#allocation2 + $0xf8] sm:$0xf0] }
 0x228   :  { %1631 = vmatmul.bf16.gmra.mxu2 %v3841_v56  ;;  %1809 = vmatmul.bf16.gmra.mxu0 %v3841_v56 }
 0x229   :  { %1944 = vmatpush.bf16.msra.mxu2 %v2734_v5 }
 0x22b   :  { %v1599_v15 = vpop.f32.mrf.mxu2 }
 0x22c   :  { %v1800_v12 = vpop.f32.mrf.mxu0  ;;  %v1600_v6 = vadd.f32 %v1599_v15, %v3831_v33 }
 0x22d   :  { %v1801_v27 = vadd.f32 %v1800_v12, %v3760_v9  ;;  %1715 = vmatmul.bf16.gmra.mxu3 %v3784_v22 }
 0x22e   :  { %v2229_v29 = vmax.f32 %v2228_v7, %v1600_v6  ;;  %v3863_v7 = vor.u32 %v2934_v61, %v2771_v10 }
 0x22f   :  { %v3850_v20 = vmax.f32 %v2279_v18, %v1801_v27  ;;  %1532 = vmatmul.bf16.gmra.mxu1 %v3744_v52 }
 0x230   :  { %v975_v0 = vpop.f32.mrf.mxu3  ;;  %2121 = vmatpush.bf16.msra.mxu0 %v3863_v7 }
 0x231   :  { %v976_v42 = vadd.f32 %v3823_v19, %v975_v0 }
 0x233   :  { %v1602_v63 = vpop.f32.mrf.mxu2  ;;  %v1042_v39 = vmul.f32 0.2, %v976_v42  ;;  %vm1010_vm5 = vcmp.gt.f32.partialorder %v976_v42, 0.0 }
 0x234   :  { %v1603_v26 = vadd.f32 %v1602_v63, %v3831_v33 }
 0x235   :  { %v1074_v51 = vsel %vm1010_vm5, %v976_v42, %v1042_v39  ;;  %v2737_v39 = vld [vmem:[#allocation2 + $0x98] sm:$0xf]  ;;  %vm2393_vm5 = vcmask 1041408  }
 0x236   :  { %v2230_v38 = vmax.f32 %v2229_v29, %v1603_v26 }
 0x238   :  { %v977_v35 = vpop.f32.mrf.mxu3 }
 0x239   :  { %v978_v41 = vadd.f32 %v3823_v19, %v977_v35  ;;  %v953_v35 = vadd.f32 %v3823_v19, %v3796_v36 }
 0x23b   :  { %vm1011_vm6 = vcmp.gt.f32.partialorder %v978_v41, 0.0  ;;  %v1043_v43 = vmul.f32 0.2, %v978_v41  ;;  %v1604_v48 = vpop.f32.mrf.mxu2  ;;  %vm1001_vm9 = vcmp.gt.f32.partialorder %v953_v35, 0.0 }
 0x23c   :  { %v945_v53 = vpop.f32.mrf.mxu1  ;;  %v1605_v40 = vadd.f32 %v1604_v48, %v3831_v33 }
 0x23d   :  { %v1075_v37 = vsel %vm1011_vm6, %v978_v41, %v1043_v43  ;;  %1720 = vmatmul.bf16.gmra.mxu3 %v3841_v56  ;;  %v946_v4 = vadd.f32 %v3823_v19, %v945_v53  ;;  %v2930_v41 = vld [vmem:[#allocation2 + $0xb4] sm:$0xf0]  ;;  %vm2397_vm6 = vcmask 1046534  }
 0x23e   :  { %v3858_v8 = vpack.c.bf16 %v1075_v37, %v1074_v51  ;;  %v2231_v15 = vmax.f32 %v2230_v38, %v1605_v40  ;;  %v2738_v53 = vor.u32 %v2930_v41, %v2737_v39  ;;  %v951_v51 = vadd.f32 %v3823_v19, %v3791_v49  ;;  %v2917_v39 = vld [vmem:[#allocation2 + $0x54] sm:$0xf] }
 0x23f   :  { %1537 = vmatmul.bf16.gmra.mxu1 %v3784_v22  ;;  %v1030_v27 = vmul.f32 0.2, %v946_v4  ;;  %vm998_vm7 = vcmp.gt.f32.partialorder %v946_v4, 0.0  ;;  %v3885_v37 = vperm.slane %v3755_v44, 0  ;;  %v1033_v40 = vmul.f32 0.2, %v953_v35 }
 0x240   :  { %v1681_v54 = vpop.f32.mrf.mxu3  ;;  %2033 = vmatpush.bf16.msra.mxu3 %v2738_v53  ;;  %vm1000_vm10 = vcmp.gt.f32.partialorder %v951_v51, 0.0  ;;  %v956_v41 = vadd.f32 %v3823_v19, %v3805_v2  ;;  %v2699_v53 = vld [vmem:[#allocation2 + $0x70] sm:$0xf0] }
 0x241   :  { %v1062_v63 = vsel %vm998_vm7, %v946_v4, %v1030_v27  ;;  %v1682_v25 = vadd.f32 %v1681_v54, %v3868_v62  ;;  %v1032_v4 = vmul.f32 0.2, %v951_v51  ;;  %v1065_v44 = vsel %vm1001_vm9, %v953_v35, %v1033_v40  ;;  %v2929_v35 = vld [vmem:[#allocation2 + $0xac] sm:$0xf0] }
 0x242   :  { %vm1002_vm12 = vcmp.gt.f32.partialorder %v956_v41, 0.0  ;;  %vm2395_vm7 = vcmask 1044484   ;;  %vm2401_vm9 = vcmask 1043456  }
 0x243   :  { %v1607_v24 = vpop.f32.mrf.mxu2 }
 0x244   :  { %v1608_v12 = vadd.f32 %v1607_v24, %v3831_v33  ;;  %v947_v18 = vpop.f32.mrf.mxu1 }
 0x245   :  { %v948_v60 = vadd.f32 %v3823_v19, %v947_v18  ;;  %v1064_v18 = vsel %vm1000_vm10, %v951_v51, %v1032_v4  ;;  %v2926_v51 = vld [vmem:[#allocation2 + $0x9c] sm:$0xf] }
 0x246   :  { %v2232_v16 = vmax.f32 %v2231_v15, %v1608_v12 }
 0x247   :  { %vm999_vm8 = vcmp.gt.f32.partialorder %v948_v60, 0.0  ;;  %v1031_v6 = vmul.f32 0.2, %v948_v60 }
 0x248   :  { %v1683_v0 = vpop.f32.mrf.mxu3 }
 0x249   :  { %v1063_v29 = vsel %vm999_vm8, %v948_v60, %v1031_v6  ;;  %v1684_v26 = vadd.f32 %v1683_v0, %v3868_v62  ;;  %v3892_v60 = vpack.c.bf16 %v1065_v44, %v1064_v18  ;;  %vm2399_vm8 = vcmask 1045508  }
 0x24a   :  { %v3873_v17 = vpack.c.bf16 %v1063_v29, %v1062_v63  ;;  %v1802_v29 = vpop.f32.mrf.mxu0 }
 0x24b   :  { %v2248_v42 = vmax.f32 %v1682_v25, %v1684_v26  ;;  %v1609_v32 = vpop.f32.mrf.mxu2  ;;  %v958_v25 = vadd.f32 %v3823_v19, %v3810_v3  ;;  %v2702_v3 = vor.u32 %v2917_v39, %v2699_v53 }
 0x24c   :  { %v1503_v38 = vpop.f32.mrf.mxu1  ;;  %1636 = vmatmul.bf16.gmra.mxu2 %v3873_v17  ;;  %1814 = vmatmul.bf16.gmra.mxu0 %v3873_v17  ;;  %v1610_v43 = vadd.f32 %v1609_v32, %v3831_v33 }
 0x24d   :  { %1725 = vmatmul.bf16.gmra.mxu3 %v3873_v17  ;;  %v1504_v5 = vadd.f32 %v1503_v38, %v3885_v37  ;;  %v2729_v38 = vld [vmem:[#allocation2 + $0x90] sm:$0xf]  ;;  %vm1003_vm11 = vcmp.gt.f32.partialorder %v958_v25, 0.0  ;;  %1945 = vmatpush.bf16.msra.mxu2 %v2702_v3 }
 0x24e   :  { %v2233_v1 = vmax.f32 %v2232_v16, %v1610_v43 }
 0x24f   :  { %1542 = vmatmul.bf16.gmra.mxu1 %v3841_v56 }
 0x250   :  { %v1686_v48 = vpop.f32.mrf.mxu3 }
 0x251   :  { %v1687_v47 = vadd.f32 %v1686_v48, %v3868_v62  ;;  %v2730_v48 = vor.u32 %v2929_v35, %v2729_v38 }
 0x253   :  { %v2249_v54 = vmax.f32 %v2248_v42, %v1687_v47  ;;  %v1612_v36 = vpop.f32.mrf.mxu2  ;;  %v2739_v47 = vld [vmem:[#allocation2 + $0xb8] sm:$0xf0]  ;;  %1855 = vmatpush.bf16.msra.mxu1 %v2730_v48 }
 0x254   :  { %v1613_v61 = vadd.f32 %v1612_v36, %v3831_v33  ;;  %v1505_v10 = vpop.f32.mrf.mxu1  ;;  %v3905_v40 = vor.u32 %v2926_v51, %v2739_v47 }
 0x255   :  { %v1506_v24 = vadd.f32 %v1505_v10, %v3885_v37 }
 0x256   :  { %v2234_v49 = vmax.f32 %v2233_v1, %v1613_v61  ;;  %v1803_v61 = vadd.f32 %v1802_v29, %v3760_v9  ;;  %2122 = vmatpush.bf16.msra.mxu0 %v3905_v40 }
 0x257   :  { %v2206_v15 = vmax.f32 %v1504_v5, %v1506_v24  ;;  %v1034_v5 = vmul.f32 0.2, %v956_v41 }
 0x258   :  { %v1688_v12 = vpop.f32.mrf.mxu3 }
 0x259   :  { %v1689_v27 = vadd.f32 %v1688_v12, %v3868_v62 }
 0x25b   :  { %v2250_v6 = vmax.f32 %v2249_v54, %v1689_v27  ;;  %v1614_v16 = vpop.f32.mrf.mxu2  ;;  %v1035_v54 = vmul.f32 0.2, %v958_v25  ;;  %v2281_v27 = vmax.f32 %v3850_v20, %v1803_v61  ;;  %v963_v20 = vadd.f32 %v3823_v19, %v3807_v21 }
 0x25c   :  { %v1508_v0 = vpop.f32.mrf.mxu1  ;;  %1641 = vmatmul.bf16.gmra.mxu2 %v3892_v60  ;;  %1819 = vmatmul.bf16.gmra.mxu0 %v3892_v60  ;;  %v1615_v42 = vadd.f32 %v1614_v16, %v3831_v33 }
 0x25d   :  { %v1509_v63 = vadd.f32 %v1508_v0, %v3885_v37  ;;  %1730 = vmatmul.bf16.gmra.mxu3 %v3892_v60  ;;  %v1037_v48 = vmul.f32 0.2, %v963_v20  ;;  %vm1005_vm13 = vcmp.gt.f32.partialorder %v963_v20, 0.0 }
 0x25e   :  { %v2235_v10 = vmax.f32 %v2234_v49, %v1615_v42  ;;  %v1066_v49 = vsel %vm1002_vm12, %v956_v41, %v1034_v5  ;;  %v961_v41 = vadd.f32 %v3823_v19, %v3794_v31 }
 0x25f   :  { %v2207_v26 = vmax.f32 %v2206_v15, %v1509_v63  ;;  %1547 = vmatmul.bf16.gmra.mxu1 %v3873_v17  ;;  %v1067_v15 = vsel %vm1003_vm11, %v958_v25, %v1035_v54  ;;  %v1069_v61 = vsel %vm1005_vm13, %v963_v20, %v1037_v48  ;;  %v2918_v20 = vld [vmem:[#allocation2 + $0x5c] sm:$0xf] }
 0x260   :  { %v1691_v32 = vpop.f32.mrf.mxu3  ;;  %v3914_v63 = vpack.c.bf16 %v1067_v15, %v1066_v49  ;;  %v1036_v21 = vmul.f32 0.2, %v961_v41  ;;  %vm1004_vm14 = vcmp.gt.f32.partialorder %v961_v41, 0.0  ;;  %v2921_v49 = vld [vmem:[#allocation2 + $0x6c] sm:$0xf0] }
 0x261   :  { %v1692_v43 = vadd.f32 %v1691_v32, %v3868_v62 }
 0x263   :  { %v2251_v36 = vmax.f32 %v2250_v6, %v1692_v43  ;;  %v1617_v1 = vpop.f32.mrf.mxu2 }
 0x264   :  { %v1618_v4 = vadd.f32 %v1617_v1, %v3831_v33  ;;  %v1510_v2 = vpop.f32.mrf.mxu1 }
 0x265   :  { %v1511_v24 = vadd.f32 %v1510_v2, %v3885_v37  ;;  %v1068_v2 = vsel %vm1004_vm14, %v961_v41, %v1036_v21  ;;  %v2707_v41 = vld [vmem:[#allocation2 + $0x78] sm:$0xf0] }
 0x266   :  { %v2236_v44 = vmax.f32 %v2235_v10, %v1618_v4  ;;  %v3932_v5 = vpack.c.bf16 %v1069_v61, %v1068_v2 }
 0x267   :  { %v2208_v12 = vmax.f32 %v2207_v26, %v1511_v24  ;;  %v1805_v18 = vpop.f32.mrf.mxu0 }
 0x268   :  { %v1806_v6 = vadd.f32 %v1805_v18, %v3760_v9  ;;  %v1693_v16 = vpop.f32.mrf.mxu3  ;;  %v2922_v18 = vld [vmem:[#allocation2 + $0x74] sm:$0xf0] }
 0x269   :  { %v1694_v0 = vadd.f32 %v1693_v16, %v3868_v62  ;;  %v2697_v16 = vld [vmem:[#allocation2 + $0x50] sm:$0xf] }
 0x26a   :  { %v3916_v29 = vmax.f32 %v2281_v27, %v1806_v6 }
 0x26b   :  { %v2252_v42 = vmax.f32 %v2251_v36, %v1694_v0  ;;  %v1619_v32 = vpop.f32.mrf.mxu2  ;;  %v2698_v0 = vor.u32 %v2921_v49, %v2697_v16  ;;  %v971_v16 = vadd.f32 %v3823_v19, %v3828_v55  ;;  %v2675_v55 = vld [vmem:[#allocation2 + $0x38] sm:$0xf0] }
 0x26c   :  { %v1513_v38 = vpop.f32.mrf.mxu1  ;;  %1646 = vmatmul.bf16.gmra.mxu2 %v3914_v63  ;;  %1824 = vmatmul.bf16.gmra.mxu0 %v3914_v63  ;;  %v1620_v35 = vadd.f32 %v1619_v32, %v3831_v33 }
 0x26d   :  { %v1514_v25 = vadd.f32 %v1513_v38, %v3885_v37  ;;  %1735 = vmatmul.bf16.gmra.mxu3 %v3914_v63  ;;  %v2909_v38 = vld [vmem:[#allocation2 + $0x14] sm:$0xf]  ;;  %1856 = vmatpush.bf16.msra.mxu1 %v2698_v0  ;;  %vm1008_vm1 = vcmp.gt.f32.partialorder %v971_v16, 0.0 }
 0x26e   :  { %v2237_v47 = vmax.f32 %v2236_v44, %v1620_v35  ;;  %v2705_v44 = vld [vmem:[#allocation2 + $0x58] sm:$0xf] }
 0x26f   :  { %v2209_v26 = vmax.f32 %v2208_v12, %v1514_v25  ;;  %1552 = vmatmul.bf16.gmra.mxu1 %v3892_v60  ;;  %v2706_v6 = vor.u32 %v2922_v18, %v2705_v44  ;;  %v2667_v25 = vld [vmem:[#allocation2 + $0x30] sm:$0xf0]  ;;  %v2673_v18 = vld [vmem:[#allocation2 + $0x18] sm:$0xf] }
 0x270   :  { %v1696_v39 = vpop.f32.mrf.mxu3 }
 0x271   :  { %v1697_v43 = vadd.f32 %v1696_v39, %v3868_v62  ;;  %2034 = vmatpush.bf16.msra.mxu3 %v2706_v6  ;;  %v2670_v39 = vor.u32 %v2909_v38, %v2667_v25  ;;  %v2913_v38 = vld [vmem:[#allocation2 + $0x2c] sm:$0xf0] }
 0x273   :  { %v2253_v53 = vmax.f32 %v2252_v42, %v1697_v43  ;;  %v1622_v51 = vpop.f32.mrf.mxu2  ;;  %v968_v42 = vadd.f32 %v3823_v19, %v3817_v28  ;;  %v966_v43 = vadd.f32 %v3823_v19, %v3812_v14  ;;  %1946 = vmatpush.bf16.msra.mxu2 %v2670_v39 }
 0x274   :  { %v1623_v3 = vadd.f32 %v1622_v51, %v3831_v33  ;;  %v1515_v54 = vpop.f32.mrf.mxu1 }
 0x275   :  { %v1516_v36 = vadd.f32 %v1515_v54, %v3885_v37  ;;  %v1039_v28 = vmul.f32 0.2, %v968_v42  ;;  %vm1007_vm15 = vcmp.gt.f32.partialorder %v968_v42, 0.0  ;;  %vm1006_vm0 = vcmp.gt.f32.partialorder %v966_v43, 0.0 }
 0x276   :  { %v2238_v1 = vmax.f32 %v2237_v47, %v1623_v3 }
 0x277   :  { %v2210_v10 = vmax.f32 %v2209_v26, %v1516_v36  ;;  %2983 = vmatpush.bf16.msrb.mxu2 %v3769_v30  ;;  %v1038_v36 = vmul.f32 0.2, %v966_v43 }
 0x278   :  { %v1698_v4 = vpop.f32.mrf.mxu3 }
 0x279   :  { %v1699_v31 = vadd.f32 %v1698_v4, %v3868_v62 }
 0x27b   :  { %v2254_v24 = vmax.f32 %v2253_v53, %v1699_v31  ;;  %v1624_v15 = vpop.f32.mrf.mxu2  ;;  %v3945_v53 = vor.u32 %v2918_v20, %v2707_v41  ;;  %2984 = vmatpush.bf16.msrb.mxu2 %v3780_v45  ;;  %v1070_v31 = vsel %vm1006_vm0, %v966_v43, %v1038_v36  ;;  %v973_v45 = vadd.f32 %v3823_v19, %v3843_v46  ;;  %v2910_v19 = vld [vmem:[#allocation2 + $0x1c] sm:$0xf] }
 0x27c   :  { %v1518_v12 = vpop.f32.mrf.mxu1  ;;  %1651 = vmatmul.bf16.gmra.mxu2 %v3932_v5  ;;  %1829 = vmatmul.bf16.gmra.mxu0 %v3932_v5  ;;  %v1625_v26 = vadd.f32 %v1624_v15, %v3831_v33  ;;  %v1040_v20 = vmul.f32 0.2, %v971_v16  ;;  %v2678_v41 = vor.u32 %v2910_v19, %v2675_v55 }
 0x27d   :  { %v1519_v27 = vadd.f32 %v1518_v12, %v3885_v37  ;;  %1740 = vmatmul.bf16.gmra.mxu3 %v3932_v5  ;;  %2123 = vmatpush.bf16.msra.mxu0 %v3945_v53  ;;  %v1041_v0 = vmul.f32 0.2, %v973_v45  ;;  %vm1009_vm2 = vcmp.gt.f32.partialorder %v973_v45, 0.0 }
 0x27e   :  { %v2239_v3 = vmax.f32 %v2238_v1, %v1625_v26  ;;  %v1072_v43 = vsel %vm1008_vm1, %v971_v16, %v1040_v20 }
 0x27f   :  { %v2211_v32 = vmax.f32 %v2210_v10, %v1519_v27  ;;  %1557 = vmatmul.bf16.gmra.mxu1 %v3914_v63  ;;  %v1071_v10 = vsel %vm1007_vm15, %v968_v42, %v1039_v28  ;;  %2985 = vmatpush.bf16.msrb.mxu2 %v3802_v34  ;;  %v2914_v27 = vld [vmem:[#allocation2 + $0x34] sm:$0xf0]  ;;  %v1073_v26 = vsel %vm1009_vm2, %v973_v45, %v1041_v0 }
 0x280   :  { %v1701_v35 = vpop.f32.mrf.mxu3  ;;  %v3955_v30 = vpack.c.bf16 %v1071_v10, %v1070_v31  ;;  %v2674_v6 = vor.u32 %v2914_v27, %v2673_v18 }
 0x281   :  { %v1702_v48 = vadd.f32 %v1701_v35, %v3868_v62  ;;  %2124 = vmatpush.bf16.msra.mxu0 %v2678_v41 }
 0x282   :  { %2035 = vmatpush.bf16.msra.mxu3 %v2674_v6 }
 0x283   :  { %v2255_v51 = vmax.f32 %v2254_v24, %v1702_v48  ;;  %v1627_v47 = vpop.f32.mrf.mxu2  ;;  %2986 = vmatpush.bf16.msrb.mxu2 %v3837_v57 }
 0x284   :  { %v1628_v54 = vadd.f32 %v1627_v47, %v3831_v33  ;;  %v1520_v21 = vpop.f32.mrf.mxu1 }
 0x285   :  { %v1521_v14 = vadd.f32 %v1520_v21, %v3885_v37 }
 0x286   :  { %v3951_v61 = vmax.f32 %v2239_v3, %v1628_v54 }
 0x287   :  { %v2212_v4 = vmax.f32 %v2211_v32, %v1521_v14  ;;  %v2665_v32 = vld [vmem:[#allocation2 + $0x10] sm:$0xf]  ;;  %2987 = vmatpush.bf16.msrb.mxu2 %v3863_v7  ;;  %v3973_v7 = vpack.c.bf16 %v1073_v26, %v1072_v43  ;;  %v1807_v14 = vpop.f32.mrf.mxu0 }
 0x288   :  { %v1703_v2 = vpop.f32.mrf.mxu3  ;;  %v2666_v25 = vor.u32 %v2913_v38, %v2665_v32 }
 0x289   :  { %v1704_v24 = vadd.f32 %v1703_v2, %v3868_v62 }
 0x28a   :  { %1857 = vmatpush.bf16.msra.mxu1 %v2666_v25 }
 0x28b   :  { %v2256_v1 = vmax.f32 %v2255_v51, %v1704_v24  ;;  %2988 = vmatpush.bf16.msrb.mxu2 %v3905_v40  ;;  %v1629_v18 = vpop.f32.mrf.mxu2 }
 0x28c   :  { %v1523_v15 = vpop.f32.mrf.mxu1  ;;  %1656 = vmatmul.bf16.gmra.mxu2 %v3955_v30  ;;  %1834 = vmatmul.bf16.gmra.mxu0 %v3955_v30  ;;  %v1630_v6 = vadd.f32 %v1629_v18, %v3831_v33 }
 0x28d   :  { %v1524_v12 = vadd.f32 %v1523_v15, %v3885_v37  ;;  %1745 = vmatmul.bf16.gmra.mxu3 %v3955_v30 }
 0x28f   :  { %v2213_v44 = vmax.f32 %v2212_v4, %v1524_v12  ;;  %1562 = vmatmul.bf16.gmra.mxu1 %v3932_v5  ;;  %2989 = vmatpush.bf16.msrb.mxu2 %v3945_v53  ;;  %v1808_v4 = vadd.f32 %v1807_v14, %v3760_v9 }
 0x290   :  { %v1706_v34 = vpop.f32.mrf.mxu3 }
 0x291   :  { %v1707_v49 = vadd.f32 %v1706_v34, %v3868_v62 }
 0x293   :  { %v2257_v42 = vmax.f32 %v2256_v1, %v1707_v49  ;;  %2990 = vmatpush.bf16.msrb.mxu2 %v2678_v41  ;;  %v2283_v1 = vmax.f32 %v3916_v29, %v1808_v4 }
 0x294   :  { %v1525_v46 = vpop.f32.mrf.mxu1 }
 0x295   :  { %v1526_v57 = vadd.f32 %v1525_v46, %v3885_v37 }
 0x297   :  { %v2214_v35 = vmax.f32 %v2213_v44, %v1526_v57  ;;  %v2284_v44 = vrot.slane %v2283_v1, 4 }
 0x298   :  { %v1708_v39 = vpop.f32.mrf.mxu3 }
 0x299   :  { %v1709_v48 = vadd.f32 %v1708_v39, %v3868_v62  ;;  %v2285_v16 = vmax.f32 %v2283_v1, %v2284_v44 }
 0x29b   :  { %v2258_v28 = vmax.f32 %v2257_v42, %v1709_v48  ;;  %v2241_v42 = vmax.f32 %v3951_v61, %v1630_v6  ;;  %v2286_v46 = vrot.slane %v2285_v16, 2 }
 0x29c   :  { %v1528_v51 = vpop.f32.mrf.mxu1  ;;  %1661 = vmatmul.bf16.gmra.mxu2 %v3973_v7  ;;  %1839 = vmatmul.bf16.gmra.mxu0 %v3973_v7 }
 0x29d   :  { %v1529_v47 = vadd.f32 %v1528_v51, %v3885_v37  ;;  %1750 = vmatmul.bf16.gmra.mxu3 %v3973_v7  ;;  %v2242_v57 = vrot.slane %v2241_v42, 4 }
 0x29f   :  { %v2215_v40 = vmax.f32 %v2214_v35, %v1529_v47  ;;  %1567 = vmatmul.bf16.gmra.mxu1 %v3955_v30  ;;  %v2287_v35 = vmax.f32 %v2285_v16, %v2286_v46  ;;  %v2243_v61 = vmax.f32 %v2241_v42, %v2242_v57 }
 0x2a0   :  { %v1711_v3 = vpop.f32.mrf.mxu3 }
 0x2a1   :  { %v1712_v54 = vadd.f32 %v1711_v3, %v3868_v62  ;;  %v2244_v3 = vrot.slane %v2243_v61, 2 }
 0x2a3   :  { %v2259_v21 = vmax.f32 %v2258_v28, %v1712_v54  ;;  %v2288_v28 = vrot.slane %v2287_v35, 1  ;;  %v2245_v4 = vmax.f32 %v2243_v61, %v2244_v3 }
 0x2a4   :  { %v1530_v36 = vpop.f32.mrf.mxu1 }
 0x2a5   :  { %v1531_v53 = vadd.f32 %v1530_v36, %v3885_v37  ;;  %v1810_v32 = vpop.f32.mrf.mxu0  ;;  %v2246_v16 = vrot.slane %v2245_v4, 1 }
 0x2a7   :  { %v2216_v10 = vmax.f32 %v2215_v40, %v1531_v53  ;;  %v2247_v57 = vmax.f32 %v2245_v4, %v2246_v16 }
 0x2a8   :  { %v1713_v2 = vpop.f32.mrf.mxu3 }
 0x2a9   :  { %v1714_v31 = vadd.f32 %v1713_v2, %v3868_v62 }
 0x2ab   :  { %v2260_v24 = vmax.f32 %v2259_v21, %v1714_v31  ;;  %v1632_v55 = vpop.f32.mrf.mxu2  ;;  %v2289_v21 = vmax.f32 %v2287_v35, %v2288_v28 }
 0x2ac   :  { %v1533_v15 = vpop.f32.mrf.mxu1  ;;  %1666 = vmatmul.bf16.gmra.mxu2 %v3858_v8  ;;  %1844 = vmatmul.bf16.gmra.mxu0 %v3858_v8 }
 0x2ad   :  { %v1534_v12 = vadd.f32 %v1533_v15, %v3885_v37  ;;  %1755 = vmatmul.bf16.gmra.mxu3 %v3858_v8  ;;  %v1812_v47 = vpop.f32.mrf.mxu0  ;;  %v2384_v1 = vrot.slane %v2289_v21, 5  ;;  %v1811_v15 = vadd.f32 %v1810_v32, %v3760_v9 }
 0x2af   :  { %v2217_v45 = vmax.f32 %v2216_v10, %v1534_v12  ;;  %1572 = vmatmul.bf16.gmra.mxu1 %v3973_v7  ;;  %v1813_v10 = vadd.f32 %v1812_v47, %v3760_v9  ;;  %v2382_v47 = vrot.slane %v2247_v57, 7 }
 0x2b0   :  { %v1716_v27 = vpop.f32.mrf.mxu3 }
 0x2b1   :  { %v1717_v34 = vadd.f32 %v1716_v27, %v3868_v62  ;;  %v2468_v6 = vmax.f32 %v1811_v15, %v1813_v10 }
 0x2b3   :  { %v2261_v29 = vmax.f32 %v2260_v24, %v1717_v34  ;;  %v1634_v2 = vpop.f32.mrf.mxu2 }
 0x2b4   :  { %v1535_v49 = vpop.f32.mrf.mxu1 }
 0x2b5   :  { %v1536_v0 = vadd.f32 %v1535_v49, %v3885_v37 }
 0x2b7   :  { %v2218_v38 = vmax.f32 %v2217_v45, %v1536_v0 }
 0x2b8   :  { %v1718_v25 = vpop.f32.mrf.mxu3 }
 0x2b9   :  { %v1719_v20 = vadd.f32 %v1718_v25, %v3868_v62 }
 0x2bb   :  { %v2262_v26 = vmax.f32 %v2261_v29, %v1719_v20  ;;  %v1633_v20 = vadd.f32 %v1632_v55, %v3831_v33 }
 0x2bc   :  { %v1538_v19 = vpop.f32.mrf.mxu1  ;;  %1947 = vmatmul.bf16.vlgmr.msra.gmra.mxu2 %v3579_v11  ;;  %2125 = vmatmul.bf16.vlgmr.msra.gmra.mxu0 %v3579_v11 }
 0x2bd   :  { %v2263_v39 = vrot.slane %v2262_v26, 4  ;;  %v1539_v41 = vadd.f32 %v1538_v19, %v3885_v37  ;;  %2036 = vmatmul.bf16.vlgmr.msra.gmra.mxu3 %v3579_v11 }
 0x2bf   :  { %v2264_v43 = vmax.f32 %v2262_v26, %v2263_v39  ;;  %v2219_v48 = vmax.f32 %v2218_v38, %v1539_v41  ;;  %1577 = vmatmul.bf16.gmra.mxu1 %v3858_v8  ;;  %v1635_v38 = vadd.f32 %v1634_v2, %v3831_v33 }
 0x2c0   :  { %v1721_v51 = vpop.f32.mrf.mxu3 }
 0x2c1   :  { %v2265_v40 = vrot.slane %v2264_v43, 2  ;;  %v1722_v44 = vadd.f32 %v1721_v51, %v3868_v62  ;;  %v2426_v19 = vmax.f32 %v1633_v20, %v1635_v38 }
 0x2c3   :  { %v2266_v54 = vmax.f32 %v2264_v43, %v2265_v40 }
 0x2c4   :  { %v1540_v36 = vpop.f32.mrf.mxu1 }
 0x2c5   :  { %v2267_v14 = vrot.slane %v2266_v54, 1  ;;  %v1541_v53 = vadd.f32 %v1540_v36, %v3885_v37 }
 0x2c7   :  { %v2268_v31 = vmax.f32 %v2266_v54, %v2267_v14  ;;  %v2220_v24 = vmax.f32 %v2219_v48, %v1541_v53 }
 0x2c8   :  { %v1723_v12 = vpop.f32.mrf.mxu3 }
 0x2c9   :  { %v2383_v45 = vrot.slane %v2268_v31, 6  ;;  %v2221_v18 = vrot.slane %v2220_v24, 4  ;;  %v1724_v27 = vadd.f32 %v1723_v12, %v3868_v62  ;;  %v1815_v34 = vpop.f32.mrf.mxu0 }
 0x2ca   :  { %v1816_v29 = vadd.f32 %v1815_v34, %v3760_v9 }
 0x2cb   :  { %v2222_v49 = vmax.f32 %v2220_v24, %v2221_v18  ;;  %v2447_v0 = vmax.f32 %v1722_v44, %v1724_v27  ;;  %v2392_v42 = vsel %vm2391_vm3, %v2383_v45, %v2384_v1 }
 0x2cc   :  { %v2469_v32 = vmax.f32 %v2468_v6, %v1816_v29  ;;  %v1543_v46 = vpop.f32.mrf.mxu1  ;;  %1952 = vmatmul.bf16.gmra.mxu2 %v3627_v13  ;;  %2130 = vmatmul.bf16.gmra.mxu0 %v3627_v13 }
 0x2cd   :  { %v2223_v25 = vrot.slane %v2222_v49, 2  ;;  %2041 = vmatmul.bf16.gmra.mxu3 %v3627_v13 }
 0x2cf   :  { %v2224_v26 = vmax.f32 %v2222_v49, %v2223_v25  ;;  %v1637_v35 = vpop.f32.mrf.mxu2  ;;  %1858 = vmatmul.bf16.vlgmr.msra.gmra.mxu1 %v3579_v11  ;;  %v1544_v11 = vadd.f32 %v1543_v46, %v3885_v37 }
 0x2d0   :  { %v1638_v39 = vadd.f32 %v1637_v35, %v3831_v33  ;;  %v1726_v41 = vpop.f32.mrf.mxu3 }
 0x2d1   :  { %v2225_v61 = vrot.slane %v2224_v26, 1  ;;  %v1727_v43 = vadd.f32 %v1726_v41, %v3868_v62  ;;  %v1817_v48 = vpop.f32.mrf.mxu0 }
 0x2d2   :  { %v2427_v28 = vmax.f32 %v2426_v19, %v1638_v39  ;;  %v1818_v51 = vadd.f32 %v1817_v48, %v3760_v9 }
 0x2d3   :  { %v2226_v40 = vmax.f32 %v2224_v26, %v2225_v61  ;;  %v2448_v55 = vmax.f32 %v2447_v0, %v1727_v43 }
 0x2d4   :  { %v2470_v3 = vmax.f32 %v2469_v32, %v1818_v51  ;;  %v1545_v54 = vpop.f32.mrf.mxu1 }
 0x2d5   :  { %v1546_v21 = vadd.f32 %v1545_v54, %v3885_v37  ;;  %v2390_v36 = vsel %vm2389_vm4, %v2226_v40, %v2382_v47 }
 0x2d6   :  { %v4021_v14 = vsel %vm2393_vm5, %v2390_v36, %v2392_v42 }
 0x2d7   :  { %v2405_v53 = vmax.f32 %v1544_v11, %v1546_v21  ;;  %v1639_v10 = vpop.f32.mrf.mxu2 }
 0x2d8   :  { %v1640_v4 = vadd.f32 %v1639_v10, %v3831_v33  ;;  %v1728_v2 = vpop.f32.mrf.mxu3 }
 0x2d9   :  { %v1729_v31 = vadd.f32 %v1728_v2, %v3868_v62  ;;  %v1820_v24 = vpop.f32.mrf.mxu0 }
 0x2da   :  { %v2428_v1 = vmax.f32 %v2427_v28, %v1640_v4  ;;  %v1821_v15 = vadd.f32 %v1820_v24, %v3760_v9 }
 0x2db   :  { %v2449_v12 = vmax.f32 %v2448_v55, %v1729_v31 }
 0x2dc   :  { %v2471_v45 = vmax.f32 %v2470_v3, %v1821_v15  ;;  %v1548_v44 = vpop.f32.mrf.mxu1  ;;  %1957 = vmatmul.bf16.gmra.mxu2 %v3672_v59  ;;  %2135 = vmatmul.bf16.gmra.mxu0 %v3672_v59 }
 0x2dd   :  { %v1549_v18 = vadd.f32 %v1548_v44, %v3885_v37  ;;  %2046 = vmatmul.bf16.gmra.mxu3 %v3672_v59 }
 0x2df   :  { %v2406_v27 = vmax.f32 %v2405_v53, %v1549_v18  ;;  %v1642_v34 = vpop.f32.mrf.mxu2  ;;  %1863 = vmatmul.bf16.gmra.mxu1 %v3627_v13 }
 0x2e0   :  { %v1643_v6 = vadd.f32 %v1642_v34, %v3831_v33  ;;  %v1731_v29 = vpop.f32.mrf.mxu3 }
 0x2e1   :  { %v1732_v16 = vadd.f32 %v1731_v29, %v3868_v62  ;;  %v1822_v49 = vpop.f32.mrf.mxu0 }
 0x2e2   :  { %v2429_v0 = vmax.f32 %v2428_v1, %v1643_v6  ;;  %v1823_v42 = vadd.f32 %v1822_v49, %v3760_v9 }
 0x2e3   :  { %v2450_v38 = vmax.f32 %v2449_v12, %v1732_v16 }
 0x2e4   :  { %v2472_v32 = vmax.f32 %v2471_v45, %v1823_v42  ;;  %v1550_v46 = vpop.f32.mrf.mxu1 }
 0x2e5   :  { %v1551_v25 = vadd.f32 %v1550_v46, %v3885_v37 }
 0x2e7   :  { %v2407_v20 = vmax.f32 %v2406_v27, %v1551_v25  ;;  %v1644_v57 = vpop.f32.mrf.mxu2 }
 0x2e8   :  { %v1645_v26 = vadd.f32 %v1644_v57, %v3831_v33  ;;  %v1733_v35 = vpop.f32.mrf.mxu3 }
 0x2e9   :  { %v1734_v13 = vadd.f32 %v1733_v35, %v3868_v62  ;;  %v1825_v19 = vpop.f32.mrf.mxu0 }
 0x2ea   :  { %v2430_v39 = vmax.f32 %v2429_v0, %v1645_v26  ;;  %v1826_v41 = vadd.f32 %v1825_v19, %v3760_v9 }
 0x2eb   :  { %v2451_v61 = vmax.f32 %v2450_v38, %v1734_v13 }
 0x2ec   :  { %v2473_v43 = vmax.f32 %v2472_v32, %v1826_v41  ;;  %v1553_v48 = vpop.f32.mrf.mxu1  ;;  %1962 = vmatmul.bf16.gmra.mxu2 %v3701_v23  ;;  %2140 = vmatmul.bf16.gmra.mxu0 %v3701_v23 }
 0x2ed   :  { %v1554_v28 = vadd.f32 %v1553_v48, %v3885_v37  ;;  %2051 = vmatmul.bf16.gmra.mxu3 %v3701_v23 }
 0x2ef   :  { %v2408_v51 = vmax.f32 %v2407_v20, %v1554_v28  ;;  %v1647_v47 = vpop.f32.mrf.mxu2  ;;  %1868 = vmatmul.bf16.gmra.mxu1 %v3672_v59 }
 0x2f0   :  { %v1648_v40 = vadd.f32 %v1647_v47, %v3831_v33  ;;  %v1736_v55 = vpop.f32.mrf.mxu3 }
 0x2f1   :  { %v1737_v3 = vadd.f32 %v1736_v55, %v3868_v62  ;;  %v1827_v54 = vpop.f32.mrf.mxu0 }
 0x2f2   :  { %v2431_v11 = vmax.f32 %v2430_v39, %v1648_v40  ;;  %v1828_v21 = vadd.f32 %v1827_v54, %v3760_v9 }
 0x2f3   :  { %v2452_v36 = vmax.f32 %v2451_v61, %v1737_v3 }
 0x2f4   :  { %v2474_v53 = vmax.f32 %v2473_v43, %v1828_v21  ;;  %v1555_v10 = vpop.f32.mrf.mxu1 }
 0x2f5   :  { %v1556_v4 = vadd.f32 %v1555_v10, %v3885_v37 }
 0x2f7   :  { %v2409_v2 = vmax.f32 %v2408_v51, %v1556_v4  ;;  %v1649_v31 = vpop.f32.mrf.mxu2 }
 0x2f8   :  { %v1650_v24 = vadd.f32 %v1649_v31, %v3831_v33  ;;  %v1738_v1 = vpop.f32.mrf.mxu3 }
 0x2f9   :  { %v1739_v59 = vadd.f32 %v1738_v1, %v3868_v62  ;;  %v1830_v15 = vpop.f32.mrf.mxu0 }
 0x2fa   :  { %v2432_v12 = vmax.f32 %v2431_v11, %v1650_v24  ;;  %v1831_v45 = vadd.f32 %v1830_v15, %v3760_v9 }
 0x2fb   :  { %v2453_v44 = vmax.f32 %v2452_v36, %v1739_v59 }
 0x2fc   :  { %v2475_v18 = vmax.f32 %v2474_v53, %v1831_v45  ;;  %v1558_v27 = vpop.f32.mrf.mxu1  ;;  %1967 = vmatmul.bf16.gmra.mxu2 %v3716_v58  ;;  %2145 = vmatmul.bf16.gmra.mxu0 %v3716_v58 }
 0x2fd   :  { %v1559_v34 = vadd.f32 %v1558_v27, %v3885_v37  ;;  %2056 = vmatmul.bf16.gmra.mxu3 %v3716_v58 }
 0x2ff   :  { %v2410_v6 = vmax.f32 %v2409_v2, %v1559_v34  ;;  %v1652_v29 = vpop.f32.mrf.mxu2  ;;  %1873 = vmatmul.bf16.gmra.mxu1 %v3701_v23 }
 0x300   :  { %v1653_v16 = vadd.f32 %v1652_v29, %v3831_v33  ;;  %v1741_v49 = vpop.f32.mrf.mxu3 }
 0x301   :  { %v1742_v0 = vadd.f32 %v1741_v49, %v3868_v62  ;;  %v1832_v42 = vpop.f32.mrf.mxu0 }
 0x302   :  { %v2433_v38 = vmax.f32 %v2432_v12, %v1653_v16  ;;  %v1833_v32 = vadd.f32 %v1832_v42, %v3760_v9 }
 0x303   :  { %v2454_v46 = vmax.f32 %v2453_v44, %v1742_v0 }
 0x304   :  { %v2476_v25 = vmax.f32 %v2475_v18, %v1833_v32  ;;  %v1560_v20 = vpop.f32.mrf.mxu1 }
 0x305   :  { %v1561_v57 = vadd.f32 %v1560_v20, %v3885_v37 }
 0x307   :  { %v2411_v26 = vmax.f32 %v2410_v6, %v1561_v57  ;;  %v1654_v35 = vpop.f32.mrf.mxu2 }
 0x308   :  { %v1655_v13 = vadd.f32 %v1654_v35, %v3831_v33  ;;  %v1743_v19 = vpop.f32.mrf.mxu3 }
 0x309   :  { %v1744_v23 = vadd.f32 %v1743_v19, %v3868_v62  ;;  %v1835_v39 = vpop.f32.mrf.mxu0 }
 0x30a   :  { %v2434_v41 = vmax.f32 %v2433_v38, %v1655_v13  ;;  %v1836_v61 = vadd.f32 %v1835_v39, %v3760_v9 }
 0x30b   :  { %v2455_v43 = vmax.f32 %v2454_v46, %v1744_v23 }
 0x30c   :  { %v2477_v48 = vmax.f32 %v2476_v25, %v1836_v61  ;;  %v1563_v28 = vpop.f32.mrf.mxu1  ;;  %1972 = vmatmul.bf16.gmra.mxu2 %v3730_v50  ;;  %2150 = vmatmul.bf16.gmra.mxu0 %v3730_v50 }
 0x30d   :  { %v1564_v51 = vadd.f32 %v1563_v28, %v3885_v37  ;;  %2061 = vmatmul.bf16.gmra.mxu3 %v3730_v50 }
 0x30f   :  { %v2412_v47 = vmax.f32 %v2411_v26, %v1564_v51  ;;  %v1657_v40 = vpop.f32.mrf.mxu2  ;;  %1878 = vmatmul.bf16.gmra.mxu1 %v3716_v58 }
 0x310   :  { %v1658_v55 = vadd.f32 %v1657_v40, %v3831_v33  ;;  %v1746_v3 = vpop.f32.mrf.mxu3 }
 0x311   :  { %v1747_v54 = vadd.f32 %v1746_v3, %v3868_v62  ;;  %v1837_v11 = vpop.f32.mrf.mxu0 }
 0x312   :  { %v2435_v21 = vmax.f32 %v2434_v41, %v1658_v55  ;;  %v1838_v36 = vadd.f32 %v1837_v11, %v3760_v9 }
 0x313   :  { %v2456_v53 = vmax.f32 %v2455_v43, %v1747_v54 }
 0x314   :  { %v2478_v10 = vmax.f32 %v2477_v48, %v1838_v36  ;;  %v1565_v4 = vpop.f32.mrf.mxu1 }
 0x315   :  { %v1566_v2 = vadd.f32 %v1565_v4, %v3885_v37 }
 0x317   :  { %v2413_v31 = vmax.f32 %v2412_v47, %v1566_v2  ;;  %v1659_v24 = vpop.f32.mrf.mxu2 }
 0x318   :  { %v1660_v1 = vadd.f32 %v1659_v24, %v3831_v33  ;;  %v1748_v59 = vpop.f32.mrf.mxu3 }
 0x319   :  { %v1749_v58 = vadd.f32 %v1748_v59, %v3868_v62  ;;  %v1840_v15 = vpop.f32.mrf.mxu0 }
 0x31a   :  { %v2436_v12 = vmax.f32 %v2435_v21, %v1660_v1  ;;  %v1841_v45 = vadd.f32 %v1840_v15, %v3760_v9 }
 0x31b   :  { %v2457_v44 = vmax.f32 %v2456_v53, %v1749_v58 }
 0x31c   :  { %v2479_v18 = vmax.f32 %v2478_v10, %v1841_v45  ;;  %v1568_v27 = vpop.f32.mrf.mxu1  ;;  %1977 = vmatmul.bf16.gmra.mxu2 %v3744_v52  ;;  %2155 = vmatmul.bf16.gmra.mxu0 %v3744_v52 }
 0x31d   :  { %v1569_v34 = vadd.f32 %v1568_v27, %v3885_v37  ;;  %2066 = vmatmul.bf16.gmra.mxu3 %v3744_v52 }
 0x31f   :  { %v2414_v6 = vmax.f32 %v2413_v31, %v1569_v34  ;;  %v1662_v29 = vpop.f32.mrf.mxu2  ;;  %1883 = vmatmul.bf16.gmra.mxu1 %v3730_v50 }
 0x320   :  { %v1663_v16 = vadd.f32 %v1662_v29, %v3831_v33  ;;  %v1751_v49 = vpop.f32.mrf.mxu3 }
 0x321   :  { %v1752_v0 = vadd.f32 %v1751_v49, %v3868_v62  ;;  %v1842_v42 = vpop.f32.mrf.mxu0 }
 0x322   :  { %v2437_v38 = vmax.f32 %v2436_v12, %v1663_v16  ;;  %v1843_v32 = vadd.f32 %v1842_v42, %v3760_v9 }
 0x323   :  { %v2458_v46 = vmax.f32 %v2457_v44, %v1752_v0 }
 0x324   :  { %v2480_v25 = vmax.f32 %v2479_v18, %v1843_v32  ;;  %v1570_v20 = vpop.f32.mrf.mxu1 }
 0x325   :  { %v1571_v57 = vadd.f32 %v1570_v20, %v3885_v37 }
 0x327   :  { %v2415_v26 = vmax.f32 %v2414_v6, %v1571_v57  ;;  %v1664_v35 = vpop.f32.mrf.mxu2 }
 0x328   :  { %v1665_v13 = vadd.f32 %v1664_v35, %v3831_v33  ;;  %v1753_v19 = vpop.f32.mrf.mxu3 }
 0x329   :  { %v1754_v50 = vadd.f32 %v1753_v19, %v3868_v62  ;;  %v1845_v23 = vpop.f32.mrf.mxu0 }
 0x32a   :  { %v2438_v39 = vmax.f32 %v2437_v38, %v1665_v13  ;;  %v1846_v41 = vadd.f32 %v1845_v23, %v3760_v9 }
 0x32b   :  { %v2459_v61 = vmax.f32 %v2458_v46, %v1754_v50 }
 0x32c   :  { %v2481_v43 = vmax.f32 %v2480_v25, %v1846_v41  ;;  %v1573_v48 = vpop.f32.mrf.mxu1  ;;  %1982 = vmatmul.bf16.gmra.mxu2 %v3784_v22  ;;  %2160 = vmatmul.bf16.gmra.mxu0 %v3784_v22 }
 0x32d   :  { %v1574_v28 = vadd.f32 %v1573_v48, %v3885_v37  ;;  %2071 = vmatmul.bf16.gmra.mxu3 %v3784_v22 }
 0x32f   :  { %v2416_v51 = vmax.f32 %v2415_v26, %v1574_v28  ;;  %v1667_v47 = vpop.f32.mrf.mxu2  ;;  %1888 = vmatmul.bf16.gmra.mxu1 %v3744_v52 }
 0x330   :  { %v1668_v40 = vadd.f32 %v1667_v47, %v3831_v33  ;;  %v1756_v55 = vpop.f32.mrf.mxu3 }
 0x331   :  { %v1757_v3 = vadd.f32 %v1756_v55, %v3868_v62  ;;  %v1847_v54 = vpop.f32.mrf.mxu0 }
 0x332   :  { %v2439_v11 = vmax.f32 %v2438_v39, %v1668_v40  ;;  %v1848_v21 = vadd.f32 %v1847_v54, %v3760_v9 }
 0x333   :  { %v2460_v36 = vmax.f32 %v2459_v61, %v1757_v3 }
 0x334   :  { %v2482_v53 = vmax.f32 %v2481_v43, %v1848_v21  ;;  %v1575_v10 = vpop.f32.mrf.mxu1 }
 0x335   :  { %v1576_v4 = vadd.f32 %v1575_v10, %v3885_v37 }
 0x336   :  { %v2483_v2 = vrot.slane %v2482_v53, 4 }
 0x337   :  { %v2417_v31 = vmax.f32 %v2416_v51, %v1576_v4  ;;  %v1669_v24 = vpop.f32.mrf.mxu2 }
 0x338   :  { %v2484_v1 = vmax.f32 %v2482_v53, %v2483_v2  ;;  %v1670_v52 = vadd.f32 %v1669_v24, %v3831_v33  ;;  %v1758_v59 = vpop.f32.mrf.mxu3  ;;  %v3078_v33 = vld [vmem:[%s4361_s6] sm:$0xff]  ;;  %s3137_s6 = smov [#allocation5]  }
 0x339   :  { %v1759_v58 = vadd.f32 %v1758_v59, %v3868_v62  ;;  %v2126_v15 = vpop.f32.mrf.mxu0  ;;  %v4104_v62 = vperm.slane %v3078_v33, 7  ;;  %v4109_v35 = vperm.slane %v3078_v33, 5  ;;  %v4111_v13 = vperm.slane %v3078_v33, 6  ;;  %s2603_s24 = sshll.u32 %s3137_s6, 4  ;;  %s2604_s24 = int_to_ptr.vmem [resolvable:$true] %s2603_s24 }
 0x33a   :  { %v2485_v12 = vrot.slane %v2484_v1, 2  ;;  %v2440_v45 = vmax.f32 %v2439_v11, %v1670_v52 }
 0x33b   :  { %v2461_v44 = vmax.f32 %v2460_v36, %v1759_v58  ;;  %v2127_v25 = vadd.f32 %v2126_v15, %v4104_v62 }
 0x33c   :  { %v2441_v18 = vrot.slane %v2440_v45, 4  ;;  %v1578_v9 = vpop.f32.mrf.mxu1  ;;  %1987 = vmatmul.bf16.gmra.mxu2 %v3841_v56  ;;  %2165 = vmatmul.bf16.gmra.mxu0 %v3841_v56  ;;  %v2486_v27 = vmax.f32 %v2484_v1, %v2485_v12 }
 0x33d   :  { %v2462_v34 = vrot.slane %v2461_v44, 4  ;;  %v1579_v6 = vadd.f32 %v1578_v9, %v3885_v37  ;;  %2076 = vmatmul.bf16.gmra.mxu3 %v3841_v56 }
 0x33e   :  { %v2442_v29 = vmax.f32 %v2440_v45, %v2441_v18  ;;  %v2487_v38 = vrot.slane %v2486_v27, 1 }
 0x33f   :  { %v2463_v16 = vmax.f32 %v2461_v44, %v2462_v34  ;;  %v2418_v49 = vmax.f32 %v2417_v31, %v1579_v6  ;;  %1893 = vmatmul.bf16.gmra.mxu1 %v3784_v22  ;;  %v1948_v0 = vpop.f32.mrf.mxu2  ;;  %v4125_v44 = vperm.slane %v3078_v33, 4 }
 0x340   :  { %v2037_v42 = vpop.f32.mrf.mxu3  ;;  %v2443_v57 = vrot.slane %v2442_v29, 2  ;;  %v2488_v23 = vmax.f32 %v2486_v27, %v2487_v38  ;;  %v1949_v28 = vadd.f32 %v1948_v0, %v4109_v35 }
 0x341   :  { %v2464_v32 = vrot.slane %v2463_v16, 2  ;;  %v2128_v46 = vpop.f32.mrf.mxu0  ;;  %v2038_v51 = vadd.f32 %v2037_v42, %v4111_v13 }
 0x342   :  { %v2129_v20 = vadd.f32 %v2128_v46, %v4104_v62  ;;  %v2444_v41 = vmax.f32 %v2442_v29, %v2443_v57  ;;  %v2583_v55 = vrot.slane %v2488_v23, 5 }
 0x343   :  { %v2465_v26 = vmax.f32 %v2463_v16, %v2464_v32 }
 0x344   :  { %v2353_v19 = vmax.f32 %v2127_v25, %v2129_v20  ;;  %v1580_v50 = vpop.f32.mrf.mxu1  ;;  %v2445_v53 = vrot.slane %v2444_v41, 1 }
 0x345   :  { %v2466_v39 = vrot.slane %v2465_v26, 1  ;;  %v1581_v22 = vadd.f32 %v1580_v50, %v3885_v37 }
 0x346   :  { %v2446_v52 = vmax.f32 %v2444_v41, %v2445_v53 }
 0x347   :  { %v2467_v61 = vmax.f32 %v2465_v26, %v2466_v39  ;;  %v2419_v43 = vmax.f32 %v2418_v49, %v1581_v22  ;;  %v1950_v48 = vpop.f32.mrf.mxu2 }
 0x348   :  { %v1951_v47 = vadd.f32 %v1950_v48, %v4109_v35  ;;  %v2039_v40 = vpop.f32.mrf.mxu3  ;;  %v2581_v6 = vrot.slane %v2446_v52, 7 }
 0x349   :  { %v2582_v3 = vrot.slane %v2467_v61, 6  ;;  %v2420_v54 = vrot.slane %v2419_v43, 4  ;;  %v2040_v11 = vadd.f32 %v2039_v40, %v4111_v13  ;;  %v2131_v21 = vpop.f32.mrf.mxu0 }
 0x34a   :  { %v2311_v36 = vmax.f32 %v1949_v28, %v1951_v47  ;;  %v2132_v37 = vadd.f32 %v2131_v21, %v4104_v62 }
 0x34b   :  { %v2421_v10 = vmax.f32 %v2419_v43, %v2420_v54  ;;  %v2332_v4 = vmax.f32 %v2038_v51, %v2040_v11  ;;  %v2589_v2 = vsel %vm2391_vm3, %v2582_v3, %v2583_v55 }
 0x34c   :  { %v2354_v31 = vmax.f32 %v2353_v19, %v2132_v37  ;;  %v1859_v24 = vpop.f32.mrf.mxu1  ;;  %1992 = vmatmul.bf16.gmra.mxu2 %v3873_v17  ;;  %2170 = vmatmul.bf16.gmra.mxu0 %v3873_v17 }
 0x34d   :  { %v2422_v1 = vrot.slane %v2421_v10, 2  ;;  %2081 = vmatmul.bf16.gmra.mxu3 %v3873_v17 }
 0x34f   :  { %v2423_v59 = vmax.f32 %v2421_v10, %v2422_v1  ;;  %1898 = vmatmul.bf16.gmra.mxu1 %v3841_v56  ;;  %v1953_v58 = vpop.f32.mrf.mxu2  ;;  %v1860_v56 = vadd.f32 %v1859_v24, %v4125_v44 }
 0x350   :  { %v1954_v15 = vadd.f32 %v1953_v58, %v4109_v35  ;;  %v2042_v12 = vpop.f32.mrf.mxu3 }
 0x351   :  { %v2424_v45 = vrot.slane %v2423_v59, 1  ;;  %v2043_v18 = vadd.f32 %v2042_v12, %v4111_v13  ;;  %v2133_v9 = vpop.f32.mrf.mxu0 }
 0x352   :  { %v2312_v27 = vmax.f32 %v2311_v36, %v1954_v15  ;;  %v2134_v34 = vadd.f32 %v2133_v9, %v4104_v62 }
 0x353   :  { %v2425_v29 = vmax.f32 %v2423_v59, %v2424_v45  ;;  %v2333_v16 = vmax.f32 %v2332_v4, %v2043_v18 }
 0x354   :  { %v2355_v49 = vmax.f32 %v2354_v31, %v2134_v34  ;;  %v1861_v0 = vpop.f32.mrf.mxu1 }
 0x355   :  { %v1862_v42 = vadd.f32 %v1861_v0, %v4125_v44  ;;  %v2588_v38 = vsel %vm2389_vm4, %v2425_v29, %v2581_v6 }
 0x356   :  { %v4133_v33 = vsel %vm2393_vm5, %v2588_v38, %v2589_v2 }
 0x357   :  { %v2290_v32 = vmax.f32 %v1860_v56, %v1862_v42  ;;  %v1955_v46 = vpop.f32.mrf.mxu2 }
 0x358   :  { %v1956_v25 = vadd.f32 %v1955_v46, %v4109_v35  ;;  %v2044_v20 = vpop.f32.mrf.mxu3 }
 0x359   :  { %v2045_v57 = vadd.f32 %v2044_v20, %v4111_v13  ;;  %v2136_v26 = vpop.f32.mrf.mxu0 }
 0x35a   :  { %v2313_v19 = vmax.f32 %v2312_v27, %v1956_v25  ;;  %v2137_v50 = vadd.f32 %v2136_v26, %v4104_v62 }
 0x35b   :  { %v2334_v23 = vmax.f32 %v2333_v16, %v2045_v57 }
 0x35c   :  { %v4138_v39 = vmax.f32 %v2355_v49, %v2137_v50  ;;  %v1864_v22 = vpop.f32.mrf.mxu1  ;;  %1997 = vmatmul.bf16.gmra.mxu2 %v3892_v60  ;;  %2175 = vmatmul.bf16.gmra.mxu0 %v3892_v60 }
 0x35d   :  { %v1865_v41 = vadd.f32 %v1864_v22, %v4125_v44  ;;  %2086 = vmatmul.bf16.gmra.mxu3 %v3892_v60 }
 0x35f   :  { %v2291_v61 = vmax.f32 %v2290_v32, %v1865_v41  ;;  %1903 = vmatmul.bf16.gmra.mxu1 %v3873_v17  ;;  %v1958_v43 = vpop.f32.mrf.mxu2 }
 0x360   :  { %v1959_v48 = vadd.f32 %v1958_v43, %v4109_v35  ;;  %v2047_v28 = vpop.f32.mrf.mxu3 }
 0x361   :  { %v2048_v51 = vadd.f32 %v2047_v28, %v4111_v13  ;;  %v2138_v47 = vpop.f32.mrf.mxu0 }
 0x362   :  { %v2314_v40 = vmax.f32 %v2313_v19, %v1959_v48  ;;  %v2139_v25 = vadd.f32 %v2138_v47, %v4104_v62 }
 0x363   :  { %v4147_v55 = vmax.f32 %v2334_v23, %v2048_v51 }
 0x364   :  { %v1866_v3 = vpop.f32.mrf.mxu1  ;;  %v2357_v26 = vmax.f32 %v4138_v39, %v2139_v25 }
 0x365   :  { %v1867_v54 = vadd.f32 %v1866_v3, %v4125_v44 }
 0x367   :  { %v2292_v11 = vmax.f32 %v2291_v61, %v1867_v54  ;;  %v1960_v21 = vpop.f32.mrf.mxu2 }
 0x368   :  { %v1961_v36 = vadd.f32 %v1960_v21, %v4109_v35  ;;  %v2049_v37 = vpop.f32.mrf.mxu3 }
 0x369   :  { %v2141_v53 = vpop.f32.mrf.mxu0  ;;  %v2050_v61 = vadd.f32 %v2049_v37, %v4111_v13 }
 0x36a   :  { %v2315_v17 = vmax.f32 %v2314_v40, %v1961_v36 }
 0x36b   :  { %v2336_v40 = vmax.f32 %v4147_v55, %v2050_v61 }
 0x36c   :  { %v1869_v10 = vpop.f32.mrf.mxu1  ;;  %2002 = vmatmul.bf16.gmra.mxu2 %v3914_v63  ;;  %2180 = vmatmul.bf16.gmra.mxu0 %v3914_v63 }
 0x36d   :  { %v1870_v4 = vadd.f32 %v1869_v10, %v4125_v44  ;;  %2091 = vmatmul.bf16.gmra.mxu3 %v3914_v63 }
 0x36f   :  { %v4155_v2 = vmax.f32 %v2292_v11, %v1870_v4  ;;  %1908 = vmatmul.bf16.gmra.mxu1 %v3892_v60  ;;  %v1963_v31 = vpop.f32.mrf.mxu2 }
 0x370   :  { %v1964_v24 = vadd.f32 %v1963_v31, %v4109_v35  ;;  %v2052_v1 = vpop.f32.mrf.mxu3 }
 0x371   :  { %v2143_v52 = vpop.f32.mrf.mxu0  ;;  %v2053_v51 = vadd.f32 %v2052_v1, %v4111_v13 }
 0x372   :  { %v4159_v59 = vmax.f32 %v2315_v17, %v1964_v24  ;;  %v2144_v19 = vadd.f32 %v2143_v52, %v4104_v62 }
 0x374   :  { %v4161_v58 = vpop.f32.mrf.mxu1 }
 0x377   :  { %v1965_v15 = vpop.f32.mrf.mxu2 }
 0x378   :  { %v2054_v12 = vpop.f32.mrf.mxu3 }
 0x379   :  { %v2146_v45 = vpop.f32.mrf.mxu0  ;;  %v2055_v3 = vadd.f32 %v2054_v12, %v4111_v13 }
 0x37a   :  { %v2147_v41 = vadd.f32 %v2146_v45, %v4104_v62 }
 0x37c   :  { %v4163_v18 = vpop.f32.mrf.mxu1  ;;  %2007 = vmatmul.bf16.gmra.mxu2 %v3932_v5  ;;  %2185 = vmatmul.bf16.gmra.mxu0 %v3932_v5 }
 0x37d   :  { %2096 = vmatmul.bf16.gmra.mxu3 %v3932_v5 }
 0x37f   :  { %1913 = vmatmul.bf16.gmra.mxu1 %v3914_v63  ;;  %v1968_v60 = vpop.f32.mrf.mxu2 }
 0x380   :  { %v2057_v9 = vpop.f32.mrf.mxu3  ;;  %v1969_v11 = vadd.f32 %v1968_v60, %v4109_v35 }
 0x381   :  { %v2148_v27 = vpop.f32.mrf.mxu0  ;;  %v2058_v17 = vadd.f32 %v2057_v9, %v4111_v13 }
 0x382   :  { %v2149_v48 = vadd.f32 %v2148_v27, %v4104_v62 }
 0x384   :  { %v4169_v34 = vpop.f32.mrf.mxu1 }
 0x387   :  { %v1970_v6 = vpop.f32.mrf.mxu2 }
 0x388   :  { %v2059_v29 = vpop.f32.mrf.mxu3  ;;  %v1971_v31 = vadd.f32 %v1970_v6, %v4109_v35 }
 0x389   :  { %v2151_v16 = vpop.f32.mrf.mxu0  ;;  %v2060_v52 = vadd.f32 %v2059_v29, %v4111_v13 }
 0x38a   :  { %v2152_v39 = vadd.f32 %v2151_v16, %v4104_v62 }
 0x38c   :  { %v4171_v49 = vpop.f32.mrf.mxu1  ;;  %2012 = vmatmul.bf16.gmra.mxu2 %v3955_v30  ;;  %2190 = vmatmul.bf16.gmra.mxu0 %v3955_v30 }
 0x38d   :  { %2101 = vmatmul.bf16.gmra.mxu3 %v3955_v30 }
 0x38f   :  { %1918 = vmatmul.bf16.gmra.mxu1 %v3932_v5  ;;  %v1973_v0 = vpop.f32.mrf.mxu2  ;;  %v2142_v5 = vadd.f32 %v2141_v53, %v4104_v62  ;;  %v2337_v53 = vmax.f32 %v2336_v40, %v2053_v51 }
 0x390   :  { %v2062_v63 = vpop.f32.mrf.mxu3  ;;  %v1974_v12 = vadd.f32 %v1973_v0, %v4109_v35  ;;  %v1872_v0 = vadd.f32 %v4161_v58, %v4125_v44 }
 0x391   :  { %v2153_v56 = vpop.f32.mrf.mxu0  ;;  %v2358_v22 = vmax.f32 %v2357_v26, %v2142_v5  ;;  %v2338_v1 = vmax.f32 %v2337_v53, %v2055_v3  ;;  %v1880_v3 = vadd.f32 %v4171_v49, %v4125_v44 }
 0x392   :  { %v2154_v36 = vadd.f32 %v2153_v56, %v4104_v62 }
 0x393   :  { %v2359_v43 = vmax.f32 %v2358_v22, %v2144_v19  ;;  %v2339_v9 = vmax.f32 %v2338_v1, %v2058_v17 }
 0x394   :  { %v4177_v42 = vpop.f32.mrf.mxu1 }
 0x395   :  { %v2360_v47 = vmax.f32 %v2359_v43, %v2147_v41 }
 0x397   :  { %v1975_v38 = vpop.f32.mrf.mxu2  ;;  %v2361_v21 = vmax.f32 %v2360_v47, %v2149_v48 }
 0x398   :  { %v2064_v32 = vpop.f32.mrf.mxu3  ;;  %v1976_v16 = vadd.f32 %v1975_v38, %v4109_v35  ;;  %v1875_v38 = vadd.f32 %v4163_v18, %v4125_v44 }
 0x399   :  { %v2156_v46 = vpop.f32.mrf.mxu0  ;;  %v2362_v24 = vmax.f32 %v2361_v21, %v2152_v39  ;;  %v2065_v25 = vadd.f32 %v2064_v32, %v4111_v13 }
 0x39a   :  { %v2157_v55 = vadd.f32 %v2156_v46, %v4104_v62  ;;  %v2340_v46 = vmax.f32 %v2339_v9, %v2060_v52 }
 0x39b   :  { %v2363_v45 = vmax.f32 %v2362_v24, %v2154_v36 }
 0x39c   :  { %v4180_v20 = vpop.f32.mrf.mxu1  ;;  %2017 = vmatmul.bf16.gmra.mxu2 %v3973_v7  ;;  %2195 = vmatmul.bf16.gmra.mxu0 %v3973_v7 }
 0x39d   :  { %2106 = vmatmul.bf16.gmra.mxu3 %v3973_v7  ;;  %v2364_v56 = vmax.f32 %v2363_v45, %v2157_v55  ;;  %v1885_v49 = vadd.f32 %v4180_v20, %v4125_v44 }
 0x39f   :  { %1923 = vmatmul.bf16.gmra.mxu1 %v3955_v30  ;;  %v1978_v57 = vpop.f32.mrf.mxu2  ;;  %v1966_v30 = vadd.f32 %v1965_v15, %v4109_v35 }
 0x3a0   :  { %v2067_v50 = vpop.f32.mrf.mxu3 }
 0x3a1   :  { %v2158_v23 = vpop.f32.mrf.mxu0  ;;  %v2317_v4 = vmax.f32 %v4159_v59, %v1966_v30  ;;  %v2063_v59 = vadd.f32 %v2062_v63, %v4111_v13  ;;  %v1979_v63 = vadd.f32 %v1978_v57, %v4109_v35  ;;  %v2068_v41 = vadd.f32 %v2067_v50, %v4111_v13 }
 0x3a2   :  { %v2159_v60 = vadd.f32 %v2158_v23, %v4104_v62  ;;  %v1877_v57 = vadd.f32 %v4169_v34, %v4125_v44  ;;  %v1882_v34 = vadd.f32 %v4177_v42, %v4125_v44 }
 0x3a3   :  { %v2318_v15 = vmax.f32 %v2317_v4, %v1969_v11  ;;  %v2341_v22 = vmax.f32 %v2340_v46, %v2063_v59 }
 0x3a4   :  { %v4192_v28 = vpop.f32.mrf.mxu1  ;;  %v2365_v19 = vmax.f32 %v2364_v56, %v2159_v60 }
 0x3a5   :  { %v2319_v6 = vmax.f32 %v2318_v15, %v1971_v31  ;;  %v2342_v51 = vmax.f32 %v2341_v22, %v2065_v25  ;;  %v1887_v42 = vadd.f32 %v4192_v28, %v4125_v44 }
 0x3a7   :  { %v1980_v54 = vpop.f32.mrf.mxu2  ;;  %v2320_v26 = vmax.f32 %v2319_v6, %v1974_v12 }
 0x3a8   :  { %v2069_v37 = vpop.f32.mrf.mxu3  ;;  %v1981_v58 = vadd.f32 %v1980_v54, %v4109_v35  ;;  %v2343_v54 = vmax.f32 %v2342_v51, %v2068_v41 }
 0x3a9   :  { %v2161_v10 = vpop.f32.mrf.mxu0  ;;  %v2321_v43 = vmax.f32 %v2320_v26, %v1976_v16  ;;  %v2070_v30 = vadd.f32 %v2069_v37, %v4111_v13 }
 0x3aa   :  { %v2162_v29 = vadd.f32 %v2161_v10, %v4104_v62 }
 0x3ab   :  { %v2322_v47 = vmax.f32 %v2321_v43, %v1979_v63  ;;  %v2344_v53 = vmax.f32 %v2343_v54, %v2070_v30 }
 0x3ac   :  { %v1889_v27 = vpop.f32.mrf.mxu1  ;;  %2022 = vmatmul.bf16.gmra.mxu2 %v3858_v8  ;;  %v2366_v48 = vmax.f32 %v2365_v19, %v2162_v29 }
 0x3ad   :  { %2111 = vmatmul.bf16.gmra.mxu3 %v3858_v8  ;;  %v2323_v21 = vmax.f32 %v2322_v47, %v1981_v58  ;;  %v1890_v16 = vadd.f32 %v1889_v27, %v4125_v44 }
 0x3af   :  { %1928 = vmatmul.bf16.gmra.mxu1 %v3973_v7  ;;  %v1983_v5 = vpop.f32.mrf.mxu2  ;;  %v2294_v7 = vmax.f32 %v4155_v2, %v1872_v0 }
 0x3b0   :  { %v2072_v23 = vpop.f32.mrf.mxu3  ;;  %v1984_v18 = vadd.f32 %v1983_v5, %v4109_v35 }
 0x3b1   :  { %v2163_v61 = vpop.f32.mrf.mxu0  ;;  %v2295_v40 = vmax.f32 %v2294_v7, %v1875_v38  ;;  %v2073_v11 = vadd.f32 %v2072_v23, %v4111_v13 }
 0x3b2   :  { %v2164_v32 = vadd.f32 %v2163_v61, %v4104_v62  ;;  %v2324_v17 = vmax.f32 %v2323_v21, %v1984_v18 }
 0x3b3   :  { %v2296_v36 = vmax.f32 %v2295_v40, %v1877_v57  ;;  %v2345_v55 = vmax.f32 %v2344_v53, %v2073_v11 }
 0x3b4   :  { %v2367_v39 = vmax.f32 %v2366_v48, %v2164_v32  ;;  %v1891_v50 = vpop.f32.mrf.mxu1 }
 0x3b5   :  { %v2297_v24 = vmax.f32 %v2296_v36, %v1880_v3  ;;  %v1892_v0 = vadd.f32 %v1891_v50, %v4125_v44 }
 0x3b6   :  { %v2368_v2 = vrot.slane %v2367_v39, 4 }
 0x3b7   :  { %v1985_v37 = vpop.f32.mrf.mxu2  ;;  %v2298_v45 = vmax.f32 %v2297_v24, %v1882_v34 }
 0x3b8   :  { %v2369_v10 = vmax.f32 %v2367_v39, %v2368_v2  ;;  %v1986_v4 = vadd.f32 %v1985_v37, %v4109_v35  ;;  %v2074_v31 = vpop.f32.mrf.mxu3 }
 0x3b9   :  { %v2075_v1 = vadd.f32 %v2074_v31, %v4111_v13  ;;  %v2166_v52 = vpop.f32.mrf.mxu0  ;;  %v2299_v6 = vmax.f32 %v2298_v45, %v1885_v49 }
 0x3ba   :  { %v2370_v15 = vrot.slane %v2369_v10, 2  ;;  %v2325_v12 = vmax.f32 %v2324_v17, %v1986_v4  ;;  %v2167_v22 = vadd.f32 %v2166_v52, %v4104_v62 }
 0x3bb   :  { %v2346_v60 = vmax.f32 %v2345_v55, %v2075_v1  ;;  %v2300_v29 = vmax.f32 %v2299_v6, %v1887_v42 }
 0x3bc   :  { %v2371_v9 = vmax.f32 %v2369_v10, %v2370_v15  ;;  %v1894_v59 = vpop.f32.mrf.mxu1  ;;  %2200 = vmatmul.bf16.vlgmr.msrb.gmra.mxu2 %v3858_v8  ;;  %v2326_v56 = vrot.slane %v2325_v12, 4 }
 0x3bd   :  { %v2347_v20 = vrot.slane %v2346_v60, 4  ;;  %v2301_v28 = vmax.f32 %v2300_v29, %v1890_v16  ;;  %v1895_v23 = vadd.f32 %v1894_v59, %v4125_v44 }
 0x3be   :  { %v2372_v5 = vrot.slane %v2371_v9, 1  ;;  %v2327_v63 = vmax.f32 %v2325_v12, %v2326_v56 }
 0x3bf   :  { %v2348_v46 = vmax.f32 %v2346_v60, %v2347_v20  ;;  %1933 = vmatmul.bf16.gmra.mxu1 %v3858_v8  ;;  %v1988_v25 = vpop.f32.mrf.mxu2  ;;  %v2302_v41 = vmax.f32 %v2301_v28, %v1892_v0 }
 0x3c0   :  { %v2077_v26 = vpop.f32.mrf.mxu3  ;;  %v2373_v43 = vmax.f32 %v2371_v9, %v2372_v5  ;;  %v2328_v32 = vrot.slane %v2327_v63, 2  ;;  %v1989_v39 = vadd.f32 %v1988_v25, %v4109_v35 }
 0x3c1   :  { %v2349_v19 = vrot.slane %v2348_v46, 2  ;;  %v2168_v38 = vpop.f32.mrf.mxu0  ;;  %v2303_v7 = vmax.f32 %v2302_v41, %v1895_v23  ;;  %v2078_v50 = vadd.f32 %v2077_v26, %v4111_v13 }
 0x3c2   :  { %v2169_v27 = vadd.f32 %v2168_v38, %v4104_v62  ;;  %v2388_v18 = vrot.slane %v2373_v43, 1  ;;  %v2329_v54 = vmax.f32 %v2327_v63, %v2328_v32 }
 0x3c3   :  { %v2350_v61 = vmax.f32 %v2348_v46, %v2349_v19 }
 0x3c4   :  { %v2552_v58 = vmax.f32 %v2167_v22, %v2169_v27  ;;  %v1896_v48 = vpop.f32.mrf.mxu1  ;;  %v2330_v24 = vrot.slane %v2329_v54, 1 }
 0x3c5   :  { %v2351_v8 = vrot.slane %v2350_v61, 1  ;;  %v1897_v57 = vadd.f32 %v1896_v48, %v4125_v44 }
 0x3c6   :  { %v2331_v12 = vmax.f32 %v2329_v54, %v2330_v24 }
 0x3c7   :  { %v2352_v51 = vmax.f32 %v2350_v61, %v2351_v8  ;;  %v2304_v30 = vmax.f32 %v2303_v7, %v1897_v57  ;;  %v1990_v47 = vpop.f32.mrf.mxu2 }
 0x3c8   :  { %v1991_v40 = vadd.f32 %v1990_v47, %v4109_v35  ;;  %v2079_v3 = vpop.f32.mrf.mxu3  ;;  %v2386_v16 = vrot.slane %v2331_v12, 3 }
 0x3c9   :  { %v2387_v11 = vrot.slane %v2352_v51, 2  ;;  %v2305_v21 = vrot.slane %v2304_v30, 4  ;;  %v2080_v2 = vadd.f32 %v2079_v3, %v4111_v13  ;;  %v2171_v36 = vpop.f32.mrf.mxu0 }
 0x3ca   :  { %v2510_v34 = vmax.f32 %v1989_v39, %v1991_v40  ;;  %v2172_v53 = vadd.f32 %v2171_v36, %v4104_v62 }
 0x3cb   :  { %v2306_v37 = vmax.f32 %v2304_v30, %v2305_v21  ;;  %v2531_v17 = vmax.f32 %v2078_v50, %v2080_v2  ;;  %v2398_v10 = vsel %vm2397_vm6, %v2387_v11, %v2388_v18 }
 0x3cc   :  { %v4253_v4 = vmax.f32 %v2552_v58, %v2172_v53  ;;  %v1899_v31 = vpop.f32.mrf.mxu1 }
 0x3cd   :  { %v2307_v49 = vrot.slane %v2306_v37, 2  ;;  %v1900_v20 = vadd.f32 %v1899_v31, %v4125_v44 }
 0x3cf   :  { %v2308_v55 = vmax.f32 %v2306_v37, %v2307_v49  ;;  %v1993_v1 = vpop.f32.mrf.mxu2 }
 0x3d0   :  { %v1994_v52 = vadd.f32 %v1993_v1, %v4109_v35  ;;  %v2082_v15 = vpop.f32.mrf.mxu3 }
 0x3d1   :  { %v2309_v45 = vrot.slane %v2308_v55, 1  ;;  %v2083_v42 = vadd.f32 %v2082_v15, %v4111_v13  ;;  %v4265_v38 = vpop.f32.mrf.mxu0 }
 0x3d2   :  { %v2511_v60 = vmax.f32 %v2510_v34, %v1994_v52 }
 0x3d3   :  { %v2310_v9 = vmax.f32 %v2308_v55, %v2309_v45  ;;  %v2532_v59 = vmax.f32 %v2531_v17, %v2083_v42 }
 0x3d4   :  { %v1901_v6 = vpop.f32.mrf.mxu1 }
 0x3d5   :  { %v2385_v56 = vrot.slane %v2310_v9, 4  ;;  %v1902_v29 = vadd.f32 %v1901_v6, %v4125_v44 }
 0x3d7   :  { %v2489_v0 = vmax.f32 %v1900_v20, %v1902_v29  ;;  %v1995_v46 = vpop.f32.mrf.mxu2  ;;  %v2396_v25 = vsel %vm2395_vm7, %v2385_v56, %v2386_v16 }
 0x3d8   :  { %v1996_v5 = vadd.f32 %v1995_v46, %v4109_v35  ;;  %v2084_v26 = vpop.f32.mrf.mxu3  ;;  %v2400_v28 = vsel %vm2399_vm8, %v2396_v25, %v2398_v10 }
 0x3d9   :  { %v2085_v63 = vadd.f32 %v2084_v26, %v4111_v13  ;;  %v2402_v19 = vsel %vm2401_vm9, %v4021_v14, %v2400_v28  ;;  %v2176_v51 = vpop.f32.mrf.mxu0 }
 0x3da   :  { %v2512_v23 = vmax.f32 %v2511_v60, %v1996_v5  ;;  %2404 = vst [vmem:[#allocation5] ss:$2 sm:$0xff] %v2402_v19 }
 0x3db   :  { %v2533_v22 = vmax.f32 %v2532_v59, %v2085_v63 }
 0x3dc   :  { %v1904_v27 = vpop.f32.mrf.mxu1 }
 0x3dd   :  { %v1905_v41 = vadd.f32 %v1904_v27, %v4125_v44 }
 0x3df   :  { %v2490_v61 = vmax.f32 %v2489_v0, %v1905_v41  ;;  %v1998_v43 = vpop.f32.mrf.mxu2 }
 0x3e0   :  { %v1999_v58 = vadd.f32 %v1998_v43, %v4109_v35  ;;  %v2087_v48 = vpop.f32.mrf.mxu3 }
 0x3e1   :  { %v2088_v32 = vadd.f32 %v2087_v48, %v4111_v13  ;;  %v2178_v54 = vpop.f32.mrf.mxu0 }
 0x3e2   :  { %v2513_v8 = vmax.f32 %v2512_v23, %v1999_v58 }
 0x3e3   :  { %v2534_v7 = vmax.f32 %v2533_v22, %v2088_v32 }
 0x3e4   :  { %v1906_v57 = vpop.f32.mrf.mxu1 }
 0x3e5   :  { %v1907_v14 = vadd.f32 %v1906_v57, %v4125_v44 }
 0x3e7   :  { %v2491_v30 = vmax.f32 %v2490_v61, %v1907_v14  ;;  %v2000_v47 = vpop.f32.mrf.mxu2 }
 0x3e8   :  { %v2001_v18 = vadd.f32 %v2000_v47, %v4109_v35  ;;  %v2089_v39 = vpop.f32.mrf.mxu3 }
 0x3e9   :  { %v2181_v31 = vpop.f32.mrf.mxu0  ;;  %v2090_v5 = vadd.f32 %v2089_v39, %v4111_v13 }
 0x3ea   :  { %v2514_v50 = vmax.f32 %v2513_v8, %v2001_v18 }
 0x3eb   :  { %v2535_v19 = vmax.f32 %v2534_v7, %v2090_v5  ;;  %v2174_v7 = vadd.f32 %v4265_v38, %v4104_v62 }
 0x3ec   :  { %v1909_v40 = vpop.f32.mrf.mxu1 }
 0x3ed   :  { %v1910_v3 = vadd.f32 %v1909_v40, %v4125_v44  ;;  %v2554_v38 = vmax.f32 %v4253_v4, %v2174_v7 }
 0x3ef   :  { %v4273_v11 = vmax.f32 %v2491_v30, %v1910_v3  ;;  %v2003_v21 = vpop.f32.mrf.mxu2 }
 0x3f0   :  { %v2004_v2 = vadd.f32 %v2003_v21, %v4109_v35  ;;  %v2092_v36 = vpop.f32.mrf.mxu3 }
 0x3f1   :  { %v4277_v52 = vpop.f32.mrf.mxu0  ;;  %v2093_v28 = vadd.f32 %v2092_v36, %v4111_v13 }
 0x3f2   :  { %v2515_v34 = vmax.f32 %v2514_v50, %v2004_v2  ;;  %v2177_v50 = vadd.f32 %v2176_v51, %v4104_v62 }
 0x3f3   :  { %v2536_v41 = vmax.f32 %v2535_v19, %v2093_v28  ;;  %v2184_v28 = vadd.f32 %v4277_v52, %v4104_v62 }
 0x3f4   :  { %v1911_v53 = vpop.f32.mrf.mxu1 }
 0x3f5   :  { %v1912_v40 = vadd.f32 %v1911_v53, %v4125_v44 }
 0x3f7   :  { %v2005_v37 = vpop.f32.mrf.mxu2 }
 0x3f8   :  { %v2006_v17 = vadd.f32 %v2005_v37, %v4109_v35  ;;  %v2094_v10 = vpop.f32.mrf.mxu3 }
 0x3f9   :  { %v4279_v60 = vpop.f32.mrf.mxu0  ;;  %v2095_v23 = vadd.f32 %v2094_v10, %v4111_v13 }
 0x3fa   :  { %v2516_v24 = vmax.f32 %v2515_v34, %v2006_v17  ;;  %v2179_v17 = vadd.f32 %v2178_v54, %v4104_v62 }
 0x3fb   :  { %v2537_v48 = vmax.f32 %v2536_v41, %v2095_v23 }
 0x3fc   :  { %v1914_v49 = vpop.f32.mrf.mxu1 }
 0x3fd   :  { %v1915_v10 = vadd.f32 %v1914_v49, %v4125_v44 }
 0x3ff   :  { %v2008_v55 = vpop.f32.mrf.mxu2 }
 0x400   :  { %v2097_v1 = vpop.f32.mrf.mxu3  ;;  %v2009_v22 = vadd.f32 %v2008_v55, %v4109_v35 }
 0x401   :  { %v4283_v16 = vpop.f32.mrf.mxu0  ;;  %v2098_v61 = vadd.f32 %v2097_v1, %v4111_v13  ;;  %v2555_v1 = vmax.f32 %v2554_v38, %v2177_v50 }
 0x402   :  { %v2517_v32 = vmax.f32 %v2516_v24, %v2009_v22 }
 0x403   :  { %v2538_v30 = vmax.f32 %v2537_v48, %v2098_v61 }
 0x404   :  { %v1916_v15 = vpop.f32.mrf.mxu1 }
 0x407   :  { %v2010_v12 = vpop.f32.mrf.mxu2 }
 0x408   :  { %v2099_v45 = vpop.f32.mrf.mxu3  ;;  %v2011_v43 = vadd.f32 %v2010_v12, %v4109_v35  ;;  %v2182_v12 = vadd.f32 %v2181_v31, %v4104_v62 }
 0x409   :  { %v4287_v25 = vpop.f32.mrf.mxu0  ;;  %v2100_v8 = vadd.f32 %v2099_v45, %v4111_v13  ;;  %v2493_v45 = vmax.f32 %v4273_v11, %v1912_v40 }
 0x40a   :  { %v2518_v47 = vmax.f32 %v2517_v32, %v2011_v43 }
 0x40b   :  { %v2539_v21 = vmax.f32 %v2538_v30, %v2100_v8 }
 0x40c   :  { %v1919_v42 = vpop.f32.mrf.mxu1 }
 0x40f   :  { %v2013_v9 = vpop.f32.mrf.mxu2 }
 0x410   :  { %v2102_v59 = vpop.f32.mrf.mxu3  ;;  %v2014_v57 = vadd.f32 %v2013_v9, %v4109_v35  ;;  %v1917_v9 = vadd.f32 %v1916_v15, %v4125_v44 }
 0x411   :  { %v4297_v58 = vpop.f32.mrf.mxu0  ;;  %v2103_v18 = vadd.f32 %v2102_v59, %v4111_v13 }
 0x412   :  { %v2519_v2 = vmax.f32 %v2518_v47, %v2014_v57  ;;  %v2189_v57 = vadd.f32 %v4283_v16, %v4104_v62  ;;  %v2194_v16 = vadd.f32 %v4297_v58, %v4104_v62 }
 0x413   :  { %v2540_v24 = vmax.f32 %v2539_v21, %v2103_v18 }
 0x414   :  { %v4281_v6 = vpop.f32.mrf.mxu1 }
 0x415   :  { %v1922_v23 = vadd.f32 %v4281_v6, %v4125_v44 }
 0x417   :  { %v2015_v56 = vpop.f32.mrf.mxu2 }
 0x418   :  { %v2104_v20 = vpop.f32.mrf.mxu3  ;;  %v2016_v39 = vadd.f32 %v2015_v56, %v4109_v35 }
 0x419   :  { %v2105_v36 = vadd.f32 %v2104_v20, %v4111_v13  ;;  %v2556_v20 = vmax.f32 %v2555_v1, %v2179_v17  ;;  %v2196_v5 = vpop.f32.mrf.mxu0 }
 0x41a   :  { %v2520_v55 = vmax.f32 %v2519_v2, %v2016_v39 }
 0x41b   :  { %v2541_v59 = vmax.f32 %v2540_v24, %v2105_v36  ;;  %v2557_v15 = vmax.f32 %v2556_v20, %v2182_v12 }
 0x41c   :  { %v4285_v29 = vpop.f32.mrf.mxu1 }
 0x41d   :  { %v1925_v52 = vadd.f32 %v4285_v29, %v4125_v44  ;;  %v2558_v8 = vmax.f32 %v2557_v15, %v2184_v28 }
 0x41f   :  { %v2018_v0 = vpop.f32.mrf.mxu2 }
 0x420   :  { %v2107_v46 = vpop.f32.mrf.mxu3  ;;  %v2019_v34 = vadd.f32 %v2018_v0, %v4109_v35  ;;  %v2494_v0 = vmax.f32 %v2493_v45, %v1915_v10 }
 0x421   :  { %v2108_v51 = vadd.f32 %v2107_v46, %v4111_v13  ;;  %v1920_v46 = vadd.f32 %v1919_v42, %v4125_v44 }
 0x422   :  { %v2521_v56 = vmax.f32 %v2520_v55, %v2019_v34  ;;  %v2495_v19 = vmax.f32 %v2494_v0, %v1917_v9  ;;  %v2197_v34 = vadd.f32 %v2196_v5, %v4104_v62 }
 0x423   :  { %v2542_v31 = vmax.f32 %v2541_v59, %v2108_v51 }
 0x424   :  { %v4290_v26 = vpop.f32.mrf.mxu1  ;;  %v2496_v48 = vmax.f32 %v2495_v19, %v1920_v46 }
 0x426   :  { %v2497_v30 = vmax.f32 %v2496_v48, %v1922_v23 }
 0x427   :  { %v2020_v63 = vpop.f32.mrf.mxu2 }
 0x428   :  { %v2109_v27 = vpop.f32.mrf.mxu3  ;;  %v2021_v53 = vadd.f32 %v2020_v63, %v4109_v35  ;;  %v2498_v50 = vmax.f32 %v2497_v30, %v1925_v52 }
 0x429   :  { %v2110_v4 = vadd.f32 %v2109_v27, %v4111_v13  ;;  %v2187_v27 = vadd.f32 %v4279_v60, %v4104_v62  ;;  %v1927_v60 = vadd.f32 %v4290_v26, %v4125_v44 }
 0x42a   :  { %v2522_v63 = vmax.f32 %v2521_v56, %v2021_v53 }
 0x42b   :  { %v2543_v41 = vmax.f32 %v2542_v31, %v2110_v4  ;;  %v2559_v47 = vmax.f32 %v2558_v8, %v2187_v27  ;;  %v2499_v21 = vmax.f32 %v2498_v50, %v1927_v60 }
 0x42c   :  { %v1929_v14 = vpop.f32.mrf.mxu1 }
 0x42d   :  { %v1930_v29 = vadd.f32 %v1929_v14, %v4125_v44  ;;  %v2560_v40 = vmax.f32 %v2559_v47, %v2189_v57 }
 0x42f   :  { %v2023_v3 = vpop.f32.mrf.mxu2 }
 0x430   :  { %v2112_v37 = vpop.f32.mrf.mxu3  ;;  %v2024_v54 = vadd.f32 %v2023_v3, %v4109_v35  ;;  %v2198_v3 = vpop.f32.mrf.mxu0 }
 0x431   :  { %v2113_v11 = vadd.f32 %v2112_v37, %v4111_v13  ;;  %v2199_v14 = vadd.f32 %v2198_v3, %v4104_v62 }
 0x432   :  { %v2523_v61 = vmax.f32 %v2522_v63, %v2024_v54 }
 0x433   :  { %v2544_v6 = vmax.f32 %v2543_v41, %v2113_v11 }
 0x434   :  { %v1931_v49 = vpop.f32.mrf.mxu1 }
 0x435   :  { %v1932_v2 = vadd.f32 %v1931_v49, %v4125_v44 }
 0x437   :  { %v2025_v22 = vpop.f32.mrf.mxu2 }
 0x438   :  { %v2026_v42 = vadd.f32 %v2025_v22, %v4109_v35  ;;  %v2114_v43 = vpop.f32.mrf.mxu3  ;;  %v2192_v35 = vadd.f32 %v4287_v25, %v4104_v62  ;;  %v2500_v25 = vmax.f32 %v2499_v21, %v1930_v29 }
 0x439   :  { %v2115_v32 = vadd.f32 %v2114_v43, %v4111_v13 }
 0x43a   :  { %v2524_v7 = vmax.f32 %v2523_v61, %v2026_v42  ;;  %v2561_v26 = vmax.f32 %v2560_v40, %v2192_v35  ;;  %v2501_v24 = vmax.f32 %v2500_v25, %v1932_v2 }
 0x43b   :  { %v2545_v18 = vmax.f32 %v2544_v6, %v2115_v32 }
 0x43c   :  { %v1934_v39 = vpop.f32.mrf.mxu1  ;;  %v2525_v13 = vrot.slane %v2524_v7, 4  ;;  %v2562_v10 = vmax.f32 %v2561_v26, %v2194_v16 }
 0x43d   :  { %v2546_v37 = vrot.slane %v2545_v18, 4  ;;  %v1935_v17 = vadd.f32 %v1934_v39, %v4125_v44 }
 0x43e   :  { %v2526_v38 = vmax.f32 %v2524_v7, %v2525_v13  ;;  %v2563_v55 = vmax.f32 %v2562_v10, %v2197_v34 }
 0x43f   :  { %v2201_v36 = vpop.f32.mrf.mxu2  ;;  %v2547_v51 = vmax.f32 %v2545_v18, %v2546_v37  ;;  %v2502_v12 = vmax.f32 %v2501_v24, %v1935_v17 }
 0x440   :  { %v2202_v58 = vadd.f32 %v2201_v36, %v4104_v62  ;;  %v2527_v1 = vrot.slane %v2526_v38, 2  ;;  %v2564_v9 = vmax.f32 %v2563_v55, %v2199_v14 }
 0x441   :  { %v2548_v4 = vrot.slane %v2547_v51, 2 }
 0x442   :  { %v2565_v54 = vmax.f32 %v2564_v9, %v2202_v58  ;;  %v2528_v20 = vmax.f32 %v2526_v38, %v2527_v1 }
 0x443   :  { %v2549_v28 = vmax.f32 %v2547_v51, %v2548_v4 }
 0x444   :  { %v1936_v53 = vpop.f32.mrf.mxu1  ;;  %v2529_v63 = vrot.slane %v2528_v20, 1 }
 0x445   :  { %v1937_v45 = vadd.f32 %v1936_v53, %v4125_v44  ;;  %v2550_v23 = vrot.slane %v2549_v28, 1 }
 0x446   :  { %v2530_v44 = vmax.f32 %v2528_v20, %v2529_v63 }
 0x447   :  { %v2503_v59 = vmax.f32 %v2502_v12, %v1937_v45  ;;  %v2203_v56 = vpop.f32.mrf.mxu2  ;;  %v2551_v42 = vmax.f32 %v2549_v28, %v2550_v23 }
 0x448   :  { %v2204_v49 = vadd.f32 %v2203_v56, %v4104_v62  ;;  %v2585_v48 = vrot.slane %v2530_v44, 3 }
 0x449   :  { %v2504_v0 = vrot.slane %v2503_v59, 4  ;;  %v2586_v8 = vrot.slane %v2551_v42, 2 }
 0x44a   :  { %v2566_v46 = vmax.f32 %v2565_v54, %v2204_v49 }
 0x44b   :  { %v2505_v5 = vmax.f32 %v2503_v59, %v2504_v0 }
 0x44c   :  { %v2567_v31 = vrot.slane %v2566_v46, 4 }
 0x44d   :  { %v2506_v11 = vrot.slane %v2505_v5, 2 }
 0x44e   :  { %v2568_v15 = vmax.f32 %v2566_v46, %v2567_v31 }
 0x44f   :  { %v2507_v19 = vmax.f32 %v2505_v5, %v2506_v11 }
 0x450   :  { %v2569_v22 = vrot.slane %v2568_v15, 2 }
 0x451   :  { %v2508_v27 = vrot.slane %v2507_v19, 1 }
 0x452   :  { %v2570_v41 = vmax.f32 %v2568_v15, %v2569_v22 }
 0x453   :  { %v2509_v61 = vmax.f32 %v2507_v19, %v2508_v27 }
 0x454   :  { %v2571_v43 = vrot.slane %v2570_v41, 1 }
 0x455   :  { %v2584_v62 = vrot.slane %v2509_v61, 4 }
 0x456   :  { %v2572_v52 = vmax.f32 %v2570_v41, %v2571_v43 }
 0x457   :  { %v2591_v32 = vsel %vm2395_vm7, %v2584_v62, %v2585_v48 }
 0x458   :  { %v2587_v57 = vrot.slane %v2572_v52, 1 }
 0x45a   :  { %v2592_v6 = vsel %vm2397_vm6, %v2586_v8, %v2587_v57 }
 0x45b   :  { %v2593_v7 = vsel %vm2399_vm8, %v2591_v32, %v2592_v6 }
 0x45c   :  { %v2594_v30 = vsel %vm2401_vm9, %v4133_v33, %v2593_v7 }
 0x45d   :  { %2597 = vst [vmem:[#allocation5 + $0x1] ss:$2 sm:$0xff] %v2594_v30 }
 0x45e   :  { %2608 = dma.vmem_to_hbm [thread:$0]  %s2604_s24, 256, %s2606_s27, [#allocation4]  }
 0x45f   :  { %3129 = dma.done.wait [#allocation4], 256  }
 0x460   :  { %3130 = vsyncadd [#allocation4], 4294967040 }
 0x461   :  { %2613 = vsyncpa [#allocation3], 1 }
 0x462   :  { %2614 = vsyncpa [#allocation4], 1 }

</bundles_post_ra>
